<compile_context>
chip_gen: v6e
topology: v6e:2x2x1
jax: 0.10.0
libtpu: 0.0.40
codegen_flags: <defaults>
</compile_context>

<pallas_src>
import math
import functools

import jax
import jax.numpy as jnp
from jax import lax
from jax.experimental import pallas as pl
from jax.experimental.pallas import tpu as pltpu

# ---- small, TPU-friendly hyper-parameters consistent with the module ----
# (module defaults are d_model=256, nhead=8, num_layers=4, dim_ff=512;
#  reduced here for a small synthetic run, structure identical)
D_MODEL = 128
NHEAD = 4
NUM_LAYERS = 2
DIM_FF = 256
VOCAB = 128        # input_vocab_size == output_vocab_size
MAX_LEN = 60
EPS = 1e-5
NEG_INF = -1e9
HEAD_DIM = D_MODEL // NHEAD
ATTN_SCALE = 1.0 / math.sqrt(HEAD_DIM)


# ----------------------------- in-kernel helpers -----------------------------

def _layer_norm(x, g, b):
    """LayerNorm over the last dim (f32 math, eps inside the sqrt like PyTorch)."""
    mu = jnp.mean(x, axis=-1, keepdims=True)
    var = jnp.mean(jnp.square(x - mu), axis=-1, keepdims=True)
    return (x - mu) * lax.rsqrt(var + EPS) * g + b


def _head_mask(nhead, head_dim):
    """(H, 1, E) 0/1 mask selecting each head's columns (built on iotas)."""
    e = lax.broadcasted_iota(jnp.int32, (nhead, 1, nhead * head_dim), 2)
    h = lax.broadcasted_iota(jnp.int32, (nhead, 1, nhead * head_dim), 0)
    lo = h * head_dim
    return ((e >= lo) & (e < lo + head_dim)).astype(jnp.float32)


def _attn_rows(q, k, v, head_mask, bias):
    """Multi-head attention for ONE example, all heads at once, without any
    lane slicing / transposes.  The 1/sqrt(head_dim) scale is pre-folded into
    the Q projection weights.

    q: (Lq, E), k/v: (Lk, E), head_mask: (H, 1, E),
    bias: None or additive broadcastable to (H, Lq, Lk).
    Returns (Lq, E) == concat_h softmax(q_h k_h^T + bias) v_h.
    """
    H = head_mask.shape[0]
    Lq, E = q.shape
    Lk = k.shape[0]

    # Head-masked Q: zeroing the other heads' columns makes a full-E
    # contraction equal to the per-head contraction -> ONE matmul for all heads.
    qm = (q[None, :, :] * head_mask).reshape(H * Lq, E)               # (H*Lq, E)
    s = lax.dot_general(qm, k, (((1,), (1,)), ((), ())),
                        preferred_element_type=jnp.float32)           # (H*Lq, Lk)
    s = s.reshape(H, Lq, Lk)
    if bias is not None:
        s = s + bias
    s = s - jnp.max(s, axis=-1, keepdims=True)
    p = jnp.exp(s)
    p = p / jnp.sum(p, axis=-1, keepdims=True)                        # exact softmax

    # ONE matmul for P@V (full E columns per head), then masked head-collapse.
    o = jnp.dot(p.reshape(H * Lq, Lk), v,
                preferred_element_type=jnp.float32).reshape(H, Lq, E)
    return jnp.sum(o * head_mask, axis=0)                             # (Lq, E)


# ----------------------------- Pallas kernels -----------------------------

def _encoder_stack_kernel(x_ref, kpm_ref,
                          wqkv_ref, bqkv_ref, wo_ref, bo_ref,
                          g1_ref, b1_ref,
                          w1_ref, fb1_ref, w2_ref, fb2_ref,
                          g2_ref, b2_ref,
                          gf_ref, bf_ref,
                          o_ref, *, batch, nhead, head_dim):
    """One grid step == one encoder layer; activation stays resident in o_ref."""
    l = pl.program_id(0)
    n_layers = pl.num_programs(0)
    B = batch
    E = nhead * head_dim
    S = x_ref.shape[1]
    hm = _head_mask(nhead, head_dim)

    @pl.when(l == 0)
    def _():
        o_ref[...] = x_ref[...]

    x = o_ref[...].reshape(B * S, E).astype(jnp.float32)              # (B*S, E)

    # packed QKV projection for the whole batch: one (B*S,E)@(E,3E) matmul
    qkv = jnp.dot(x, wqkv_ref[0], preferred_element_type=jnp.float32) + bqkv_ref[0]
    q, k, v = qkv[:, :E], qkv[:, E:2 * E], qkv[:, 2 * E:]

    rows = []
    for b in range(B):                       # only scores/softmax/PV per example
        rs = slice(b * S, (b + 1) * S)
        rows.append(_attn_rows(q[rs], k[rs], v[rs], hm, kpm_ref[b]))
    attn = jnp.concatenate(rows, axis=0)                              # (B*S, E)
    attn = jnp.dot(attn, wo_ref[0], preferred_element_type=jnp.float32) + bo_ref[0]

    h1 = _layer_norm(x + attn, g1_ref[0], b1_ref[0])
    f = jnp.maximum(
        jnp.dot(h1, w1_ref[0], preferred_element_type=jnp.float32) + fb1_ref[0], 0.0)
    f = jnp.dot(f, w2_ref[0], preferred_element_type=jnp.float32) + fb2_ref[0]
    h2 = _layer_norm(h1 + f, g2_ref[0], b2_ref[0])

    o_ref[...] = h2.reshape(B, S, E).astype(o_ref.dtype)

    # fused encoder-final LayerNorm (nn.Transformer encoder norm)
    @pl.when(l == n_layers - 1)
    def _():
        o_ref[...] = _layer_norm(h2, gf_ref[...], bf_ref[...]
                                 ).reshape(B, S, E).astype(o_ref.dtype)


def _decoder_stack_kernel(y_ref, mem_ref, kpm_ref,
                          sa_wqkv_ref, sa_bqkv_ref, sa_wo_ref, sa_bo_ref,
                          g1_ref, b1_ref,
                          ca_wq_ref, ca_bq_ref, ca_wkv_ref, ca_bkv_ref,
                          ca_wo_ref, ca_bo_ref,
                          g2_ref, b2_ref,
                          w1_ref, fb1_ref, w2_ref, fb2_ref,
                          g3_ref, b3_ref,
                          gf_ref, bf_ref, fcw_ref, fcb_ref,
                          logits_ref, act_ref, *, batch, nhead, head_dim):
    """One grid step == one decoder layer; activation resident in act_ref;
    final LayerNorm + fc_out fused into the last step."""
    l = pl.program_id(0)
    n_layers = pl.num_programs(0)
    B = batch
    E = nhead * head_dim
    T = y_ref.shape[1]
    S = mem_ref.shape[1]
    hm = _head_mask(nhead, head_dim)

    @pl.when(l == 0)
    def _():
        act_ref[...] = y_ref[...].reshape(B * T, E).astype(jnp.float32)

    y = act_ref[...]                                                  # (B*T, E)
    mem = mem_ref[...].reshape(B * S, E).astype(jnp.float32)          # (B*S, E)

    # causal mask built in-kernel
    r = lax.broadcasted_iota(jnp.int32, (T, T), 0)
    c = lax.broadcasted_iota(jnp.int32, (T, T), 1)
    causal = jnp.where(c > r, NEG_INF, 0.0).astype(jnp.float32)

    # ---- masked self-attention ----
    qkv = jnp.dot(y, sa_wqkv_ref[0], preferred_element_type=jnp.float32) + sa_bqkv_ref[0]
    q, k, v = qkv[:, :E], qkv[:, E:2 * E], qkv[:, 2 * E:]
    rows = []
    for b in range(B):
        rs = slice(b * T, (b + 1) * T)
        rows.append(_attn_rows(q[rs], k[rs], v[rs], hm, causal + kpm_ref[b]))
    sa = jnp.concatenate(rows, axis=0)
    sa = jnp.dot(sa, sa_wo_ref[0], preferred_element_type=jnp.float32) + sa_bo_ref[0]
    y1 = _layer_norm(y + sa, g1_ref[0], b1_ref[0])

    # ---- cross-attention (reference passes no memory key-padding mask) ----
    q2 = jnp.dot(y1, ca_wq_ref[0], preferred_element_type=jnp.float32) + ca_bq_ref[0]
    kv = jnp.dot(mem, ca_wkv_ref[0], preferred_element_type=jnp.float32) + ca_bkv_ref[0]
    k2, v2 = kv[:, :E], kv[:, E:]
    rows = []
    for b in range(B):
        rq = slice(b * T, (b + 1) * T)
        rk = slice(b * S, (b + 1) * S)
        rows.append(_attn_rows(q2[rq], k2[rk], v2[rk], hm, None))
    ca = jnp.concatenate(rows, axis=0)
    ca = jnp.dot(ca, ca_wo_ref[0], preferred_element_type=jnp.float32) + ca_bo_ref[0]
    y2 = _layer_norm(y1 + ca, g2_ref[0], b2_ref[0])

    # ---- feed-forward ----
    f = jnp.maximum(
        jnp.dot(y2, w1_ref[0], preferred_element_type=jnp.float32) + fb1_ref[0], 0.0)
    f = jnp.dot(f, w2_ref[0], preferred_element_type=jnp.float32) + fb2_ref[0]
    y3 = _layer_norm(y2 + f, g3_ref[0], b3_ref[0])
    act_ref[...] = y3

    # ---- fused decoder-final LayerNorm + fc_out (lane-dense V=128 logits) ----
    @pl.when(l == n_layers - 1)
    def _():
        yn = _layer_norm(y3, gf_ref[...], bf_ref[...])
        logits = jnp.dot(yn, fcw_ref[...],
                         preferred_element_type=jnp.float32) + fcb_ref[...]
        logits_ref[...] = logits.reshape(B, T, logits.shape[-1]).astype(logits_ref.dtype)


# ---------------------------- pallas_call wrappers ----------------------------

def _wspec(*dims):
    """Stacked per-layer weight: leading layer axis selected by the grid step."""
    return pl.BlockSpec((1,) + dims, lambda l, _d=len(dims): (l,) + (0,) * _d)


def _cspec(*dims):
    """Layer-invariant array: constant index_map, stays VMEM-resident."""
    return pl.BlockSpec(dims, lambda l, _d=len(dims): (0,) * _d)


def encoder_stack(x, kpm_bias, p, gf, bf):
    """x: (B, S, E), kpm_bias: (B, 1, S) additive 0/-1e9.  Runs ALL encoder
    layers + the final encoder LayerNorm in one pallas_call."""
    B, S, E = x.shape
    F = DIM_FF
    L = p["w_qkv"].shape[0]
    kernel = functools.partial(_encoder_stack_kernel, batch=B,
                               nhead=NHEAD, head_dim=HEAD_DIM)
    return pl.pallas_call(
        kernel,
        out_shape=jax.ShapeDtypeStruct((B, S, E), x.dtype),
        grid=(L,),
        in_specs=[
            _cspec(B, S, E),
            _cspec(B, 1, S),
            _wspec(E, 3 * E), _wspec(1, 3 * E), _wspec(E, E), _wspec(1, E),
            _wspec(1, E), _wspec(1, E),
            _wspec(E, F), _wspec(1, F), _wspec(F, E), _wspec(1, E),
            _wspec(1, E), _wspec(1, E),
            _cspec(1, E), _cspec(1, E),
        ],
        out_specs=_cspec(B, S, E),
        compiler_params=pltpu.CompilerParams(dimension_semantics=("arbitrary",)),
    )(x, kpm_bias,
      p["w_qkv"], p["b_qkv"], p["w_o"], p["b_o"],
      p["ln1_g"], p["ln1_b"],
      p["ff_w1"], p["ff_b1"], p["ff_w2"], p["ff_b2"],
      p["ln2_g"], p["ln2_b"],
      gf, bf)


def decoder_stack(y, memory, kpm_bias, p, gf, bf, fc_w, fc_b):
    """y: (B, T, E), memory: (B, S, E), kpm_bias: (B, 1, T).  Runs ALL decoder
    layers + final LayerNorm + fc_out in one pallas_call; returns logits."""
    B, T, E = y.shape
    S = memory.shape[1]
    F = DIM_FF
    V = fc_w.shape[1]
    L = p["sa_w_qkv"].shape[0]
    kernel = functools.partial(_decoder_stack_kernel, batch=B,
                               nhead=NHEAD, head_dim=HEAD_DIM)
    return pl.pallas_call(
        kernel,
        out_shape=jax.ShapeDtypeStruct((B, T, V), y.dtype),
        grid=(L,),
        in_specs=[
            _cspec(B, T, E), _cspec(B, S, E), _cspec(B, 1, T),
            _wspec(E, 3 * E), _wspec(1, 3 * E), _wspec(E, E), _wspec(1, E),
            _wspec(1, E), _wspec(1, E),
            _wspec(E, E), _wspec(1, E), _wspec(E, 2 * E), _wspec(1, 2 * E),
            _wspec(E, E), _wspec(1, E),
            _wspec(1, E), _wspec(1, E),
            _wspec(E, F), _wspec(1, F), _wspec(F, E), _wspec(1, E),
            _wspec(1, E), _wspec(1, E),
            _cspec(1, E), _cspec(1, E), _cspec(E, V), _cspec(1, V),
        ],
        out_specs=_cspec(B, T, V),
        scratch_shapes=[pltpu.VMEM((B * T, E), jnp.float32)],
        compiler_params=pltpu.CompilerParams(dimension_semantics=("arbitrary",)),
    )(y, memory, kpm_bias,
      p["sa_w_qkv"], p["sa_b_qkv"], p["sa_w_o"], p["sa_b_o"],
      p["ln1_g"], p["ln1_b"],
      p["ca_w_q"], p["ca_b_q"], p["ca_w_kv"], p["ca_b_kv"],
      p["ca_w_o"], p["ca_b_o"],
      p["ln2_g"], p["ln2_b"],
      p["ff_w1"], p["ff_b1"], p["ff_w2"], p["ff_b2"],
      p["ln3_g"], p["ln3_b"],
      gf, bf, fc_w, fc_b)


# --------------------------- model forward pass ---------------------------

def make_positional_encoding(max_len, d_model):
    position = jnp.arange(max_len, dtype=jnp.float32)[:, None]
    div_term = jnp.exp(jnp.arange(0, d_model, 2, dtype=jnp.float32)
                       * (-math.log(10000.0) / d_model))
    pe = jnp.zeros((max_len, d_model), jnp.float32)
    pe = pe.at[:, 0::2].set(jnp.sin(position * div_term))
    pe = pe.at[:, 1::2].set(jnp.cos(position * div_term))
    return pe


def transformer_forward(params, src, tgt):
    """src, tgt: (B, L) int32 token ids.  Returns (B, T, VOCAB) logits."""
    B, S = src.shape
    T = tgt.shape[1]

    # tiny additive key-padding biases (padding_idx=0); masks expanded in-kernel
    src_bias = jnp.where(src == 0, NEG_INF, 0.0).astype(jnp.float32).reshape(B, 1, S)
    tgt_bias = jnp.where(tgt == 0, NEG_INF, 0.0).astype(jnp.float32).reshape(B, 1, T)

    pe = params["pe"]
    x = jnp.take(params["enc_emb"], src, axis=0) + pe[None, :S, :]   # (B, S, E)
    y = jnp.take(params["dec_emb"], tgt, axis=0) + pe[None, :T, :]   # (B, T, E)

    memory = encoder_stack(x, src_bias, params["enc"],
                           params["enc_norm_g"], params["enc_norm_b"])
    logits = decoder_stack(y, memory, tgt_bias, params["dec"],
                           params["dec_norm_g"], params["dec_norm_b"],
                           params["fc_w"], params["fc_b"])
    return logits


# ------------------------------ parameter init ------------------------------

def init_params(key):
    kit = iter(jax.random.split(key, 32))

    def nrm(shape, scale=0.02):
        return (scale * jax.random.normal(next(kit), shape)).astype(jnp.float32)

    L, E, F, V = NUM_LAYERS, D_MODEL, DIM_FF, VOCAB
    ones = lambda s: jnp.ones(s, jnp.float32)
    zeros = lambda s: jnp.zeros(s, jnp.float32)

    def enc_stack_params():
        # packed in-projection stored pre-transposed (E, 3E); 1/sqrt(Dh) folded
        # into the Q columns (and Q bias) so the kernel never multiplies by it.
        w_qkv = nrm((L, E, 3 * E)).at[:, :, :E].multiply(ATTN_SCALE)
        return {
            "w_qkv": w_qkv, "b_qkv": zeros((L, 1, 3 * E)),
            "w_o": nrm((L, E, E)), "b_o": zeros((L, 1, E)),
            "ln1_g": ones((L, 1, E)), "ln1_b": zeros((L, 1, E)),
            "ff_w1": nrm((L, E, F)), "ff_b1": zeros((L, 1, F)),
            "ff_w2": nrm((L, F, E)), "ff_b2": zeros((L, 1, E)),
            "ln2_g": ones((L, 1, E)), "ln2_b": zeros((L, 1, E)),
        }

    def dec_stack_params():
        sa_w_qkv = nrm((L, E, 3 * E)).at[:, :, :E].multiply(ATTN_SCALE)
        return {
            "sa_w_qkv": sa_w_qkv, "sa_b_qkv": zeros((L, 1, 3 * E)),
            "sa_w_o": nrm((L, E, E)), "sa_b_o": zeros((L, 1, E)),
            "ln1_g": ones((L, 1, E)), "ln1_b": zeros((L, 1, E)),
            "ca_w_q": nrm((L, E, E)) * ATTN_SCALE, "ca_b_q": zeros((L, 1, E)),
            "ca_w_kv": nrm((L, E, 2 * E)), "ca_b_kv": zeros((L, 1, 2 * E)),
            "ca_w_o": nrm((L, E, E)), "ca_b_o": zeros((L, 1, E)),
            "ln2_g": ones((L, 1, E)), "ln2_b": zeros((L, 1, E)),
            "ff_w1": nrm((L, E, F)), "ff_b1": zeros((L, 1, F)),
            "ff_w2": nrm((L, F, E)), "ff_b2": zeros((L, 1, E)),
            "ln3_g": ones((L, 1, E)), "ln3_b": zeros((L, 1, E)),
        }

    enc_emb = nrm((V, E)).at[0].set(0.0)   # padding_idx=0
    dec_emb = nrm((V, E)).at[0].set(0.0)   # padding_idx=0

    return {
        "enc_emb": enc_emb,
        "dec_emb": dec_emb,
        "pe": make_positional_encoding(MAX_LEN, E),
        "enc": enc_stack_params(),
        "dec": dec_stack_params(),
        "enc_norm_g": ones((1, E)), "enc_norm_b": zeros((1, E)),
        "dec_norm_g": ones((1, E)), "dec_norm_b": zeros((1, E)),
        "fc_w": nrm((E, V)),                       # pre-transposed (E, V)
        "fc_b": zeros((1, V)),
    }


# ----------------------------------- main -----------------------------------

if __name__ == "__main__":
    key = jax.random.PRNGKey(0)
    pkey, skey, tkey = jax.random.split(key, 3)
    params = init_params(pkey)

    B, S, T = 2, 8, 8
    src = jax.random.randint(skey, (B, S), 1, VOCAB).astype(jnp.int32)
    tgt = jax.random.randint(tkey, (B, T), 1, VOCAB).astype(jnp.int32)
    # a few pad tokens so the key-padding masks are exercised
    src = src.at[:, -1].set(0)
    tgt = tgt.at[:, -1].set(0)

    out = jax.jit(transformer_forward)(params, src, tgt)
    out = jax.block_until_ready(out)

    assert out.shape == (B, T, VOCAB), out.shape
    assert bool(jnp.all(jnp.isfinite(out)))
    print("KERNEL_OK")
</pallas_src>

<mosaic_0001>
module attributes {stable_mosaic.version = 11 : i64} {
  func.func @_encoder_stack_kernel(%arg0: i32, %arg1: memref<2x8x128xf32, #tpu.memory_space<vmem>>, %arg2: memref<2x1x8xf32, #tpu.memory_space<vmem>>, %arg3: memref<1x128x384xf32, #tpu.memory_space<vmem>>, %arg4: memref<1x1x384xf32, #tpu.memory_space<vmem>>, %arg5: memref<1x128x128xf32, #tpu.memory_space<vmem>>, %arg6: memref<1x1x128xf32, #tpu.memory_space<vmem>>, %arg7: memref<1x1x128xf32, #tpu.memory_space<vmem>>, %arg8: memref<1x1x128xf32, #tpu.memory_space<vmem>>, %arg9: memref<1x128x256xf32, #tpu.memory_space<vmem>>, %arg10: memref<1x1x256xf32, #tpu.memory_space<vmem>>, %arg11: memref<1x256x128xf32, #tpu.memory_space<vmem>>, %arg12: memref<1x1x128xf32, #tpu.memory_space<vmem>>, %arg13: memref<1x1x128xf32, #tpu.memory_space<vmem>>, %arg14: memref<1x1x128xf32, #tpu.memory_space<vmem>>, %arg15: memref<1x128xf32, #tpu.memory_space<vmem>>, %arg16: memref<1x128xf32, #tpu.memory_space<vmem>>, %arg17: memref<2x8x128xf32, #tpu.memory_space<vmem>>) attributes {dimension_semantics = [#tpu.dimension_semantics<arbitrary>], iteration_bounds = array<i64: 2>, scalar_prefetch = 0 : i64, scratch_operands = 0 : i64, tpu.core_type = #tpu.core_type<tc>, window_params = [{pipeline_mode = #tpu.pipeline_mode<synchronous>, transform_indices = @transform_0, window_bounds = array<i64: 2, 8, 128>}, {pipeline_mode = #tpu.pipeline_mode<synchronous>, transform_indices = @transform_1, window_bounds = array<i64: 2, 1, 8>}, {transform_indices = @transform_2, window_bounds = array<i64: 1, 128, 384>}, {transform_indices = @transform_3, window_bounds = array<i64: 1, 1, 384>}, {transform_indices = @transform_4, window_bounds = array<i64: 1, 128, 128>}, {transform_indices = @transform_5, window_bounds = array<i64: 1, 1, 128>}, {transform_indices = @transform_6, window_bounds = array<i64: 1, 1, 128>}, {transform_indices = @transform_7, window_bounds = array<i64: 1, 1, 128>}, {transform_indices = @transform_8, window_bounds = array<i64: 1, 128, 256>}, {transform_indices = @transform_9, window_bounds = array<i64: 1, 1, 256>}, {transform_indices = @transform_10, window_bounds = array<i64: 1, 256, 128>}, {transform_indices = @transform_11, window_bounds = array<i64: 1, 1, 128>}, {transform_indices = @transform_12, window_bounds = array<i64: 1, 1, 128>}, {transform_indices = @transform_13, window_bounds = array<i64: 1, 1, 128>}, {pipeline_mode = #tpu.pipeline_mode<synchronous>, transform_indices = @transform_14, window_bounds = array<i64: 1, 128>}, {pipeline_mode = #tpu.pipeline_mode<synchronous>, transform_indices = @transform_15, window_bounds = array<i64: 1, 128>}, {pipeline_mode = #tpu.pipeline_mode<synchronous>, transform_indices = @transform_16, window_bounds = array<i64: 2, 8, 128>}]} {
    %0 = tpu.iota {dimensions = array<i32: 2>} : vector<4x1x128xi32>
    %1 = tpu.iota {dimensions = array<i32: 0>} : vector<4x1x128xi32>
    %c32_i32 = arith.constant 32 : i32
    %2 = vector.broadcast %c32_i32 : i32 to vector<4x1x128xi32>
    %3 = arith.muli %1, %2 : vector<4x1x128xi32>
    %4 = arith.cmpi sge, %0, %3 : vector<4x1x128xi32>
    %c32_i32_0 = arith.constant 32 : i32
    %5 = vector.broadcast %c32_i32_0 : i32 to vector<4x1x128xi32>
    %6 = arith.addi %3, %5 : vector<4x1x128xi32>
    %7 = arith.cmpi slt, %0, %6 : vector<4x1x128xi32>
    %8 = arith.andi %4, %7 : vector<4x1x128xi1>
    %9 = arith.extui %8 : vector<4x1x128xi1> to vector<4x1x128xi32>
    %10 = arith.sitofp %9 : vector<4x1x128xi32> to vector<4x1x128xf32>
    %c0_i32 = arith.constant 0 : i32
    %11 = arith.cmpi eq, %arg0, %c0_i32 : i32
    %12 = arith.extui %11 : i1 to i32
    %c0_i32_1 = arith.constant 0 : i32
    %13 = arith.cmpi ne, %12, %c0_i32_1 : i32
    scf.if %13 {
      %c0_73 = arith.constant 0 : index
      %c0_74 = arith.constant 0 : index
      %c0_75 = arith.constant 0 : index
      %169 = vector.load %arg1[%c0_73, %c0_74, %c0_75] : memref<2x8x128xf32, #tpu.memory_space<vmem>>, vector<2x8x128xf32>
      %c0_76 = arith.constant 0 : index
      %c0_77 = arith.constant 0 : index
      %c0_78 = arith.constant 0 : index
      %170 = vector.load %arg17[%c0_76, %c0_77, %c0_78] : memref<2x8x128xf32, #tpu.memory_space<vmem>>, vector<2x8x128xf32>
      tpu.vector_store %arg17[%c0_76, %c0_77, %c0_78], %169 {strides = array<i32>} : memref<2x8x128xf32, #tpu.memory_space<vmem>>, vector<2x8x128xf32>,
    } else {
    }
    %c0 = arith.constant 0 : index
    %c0_2 = arith.constant 0 : index
    %c0_3 = arith.constant 0 : index
    %14 = vector.load %arg17[%c0, %c0_2, %c0_3] : memref<2x8x128xf32, #tpu.memory_space<vmem>>, vector<2x8x128xf32>
    %15 = vector.shape_cast %14 : vector<2x8x128xf32> to vector<16x128xf32>
    %c0_4 = arith.constant 0 : index
    %c0_5 = arith.constant 0 : index
    %c0_6 = arith.constant 0 : index
    %16 = vector.load %arg3[%c0_4, %c0_5, %c0_6] : memref<1x128x384xf32, #tpu.memory_space<vmem>>, vector<1x128x384xf32>
    %17 = vector.shape_cast %16 : vector<1x128x384xf32> to vector<128x384xf32>
    %cst = arith.constant dense<0.000000e+00> : vector<16x384xf32>
    %18 = tpu.matmul %15, %17, %cst {dimension_numbers = #tpu.dot_dimension_numbers<[1], [0], [0], [1], [0, 0, 1, 1], [], []>} : vector<16x128xf32>, vector<128x384xf32>, vector<16x384xf32> -> vector<16x384xf32>
    %c0_7 = arith.constant 0 : index
    %c0_8 = arith.constant 0 : index
    %c0_9 = arith.constant 0 : index
    %19 = vector.load %arg4[%c0_7, %c0_8, %c0_9] : memref<1x1x384xf32, #tpu.memory_space<vmem>>, vector<1x1x384xf32>
    %20 = vector.shape_cast %19 : vector<1x1x384xf32> to vector<1x384xf32>
    %21 = vector.broadcast %20 : vector<1x384xf32> to vector<16x384xf32>
    %22 = arith.addf %18, %21 : vector<16x384xf32>
    %23 = vector.extract_strided_slice %22 {offsets = [0, 0], sizes = [16, 128], strides = [1, 1]} : vector<16x384xf32> to vector<16x128xf32>
    %24 = vector.extract_strided_slice %22 {offsets = [0, 128], sizes = [16, 128], strides = [1, 1]} : vector<16x384xf32> to vector<16x128xf32>
    %25 = vector.extract_strided_slice %22 {offsets = [0, 256], sizes = [16, 128], strides = [1, 1]} : vector<16x384xf32> to vector<16x128xf32>
    %26 = vector.extract_strided_slice %23 {offsets = [0, 0], sizes = [8, 128], strides = [1, 1]} : vector<16x128xf32> to vector<8x128xf32>
    %27 = vector.extract_strided_slice %24 {offsets = [0, 0], sizes = [8, 128], strides = [1, 1]} : vector<16x128xf32> to vector<8x128xf32>
    %28 = vector.extract_strided_slice %25 {offsets = [0, 0], sizes = [8, 128], strides = [1, 1]} : vector<16x128xf32> to vector<8x128xf32>
    %c0_10 = arith.constant 0 : index
    %c0_11 = arith.constant 0 : index
    %c0_12 = arith.constant 0 : index
    %29 = vector.load %arg2[%c0_10, %c0_11, %c0_12] : memref<2x1x8xf32, #tpu.memory_space<vmem>>, vector<1x1x8xf32>
    %30 = vector.shape_cast %29 : vector<1x1x8xf32> to vector<1x8xf32>
    %31 = vector.shape_cast %26 : vector<8x128xf32> to vector<1x8x128xf32>
    %32 = vector.broadcast %31 : vector<1x8x128xf32> to vector<4x8x128xf32>
    %33 = vector.broadcast %10 : vector<4x1x128xf32> to vector<4x8x128xf32>
    %34 = arith.mulf %32, %33 : vector<4x8x128xf32>
    %35 = vector.shape_cast %34 : vector<4x8x128xf32> to vector<32x128xf32>
    %cst_13 = arith.constant dense<0.000000e+00> : vector<32x8xf32>
    %36 = tpu.matmul %35, %27, %cst_13 {dimension_numbers = #tpu.dot_dimension_numbers<[1], [1], [0], [0], [0, 0, 1, 0], [], []>} : vector<32x128xf32>, vector<8x128xf32>, vector<32x8xf32> -> vector<32x8xf32>
    %37 = vector.shape_cast %36 : vector<32x8xf32> to vector<4x8x8xf32>
    %38 = vector.shape_cast %30 : vector<1x8xf32> to vector<1x1x8xf32>
    %39 = vector.broadcast %38 : vector<1x1x8xf32> to vector<4x8x8xf32>
    %40 = arith.addf %37, %39 : vector<4x8x8xf32>
    %cst_14 = arith.constant dense<0xFF800000> : vector<4x8xf32>
    %41 = vector.multi_reduction <maximumf>, %40, %cst_14 [2] : vector<4x8x8xf32> to vector<4x8xf32>
    %42 = vector.shape_cast %41 : vector<4x8xf32> to vector<4x8x1xf32>
    %43 = vector.broadcast %42 : vector<4x8x1xf32> to vector<4x8x8xf32>
    %44 = arith.subf %40, %43 : vector<4x8x8xf32>
    %45 = math.exp %44 : vector<4x8x8xf32>
    %cst_15 = arith.constant dense<0.000000e+00> : vector<4x8xf32>
    %46 = vector.multi_reduction <add>, %45, %cst_15 [2] : vector<4x8x8xf32> to vector<4x8xf32>
    %47 = vector.shape_cast %46 : vector<4x8xf32> to vector<4x8x1xf32>
    %48 = vector.broadcast %47 : vector<4x8x1xf32> to vector<4x8x8xf32>
    %49 = arith.divf %45, %48 : vector<4x8x8xf32>
    %50 = vector.shape_cast %49 : vector<4x8x8xf32> to vector<32x8xf32>
    %cst_16 = arith.constant dense<0.000000e+00> : vector<32x128xf32>
    %51 = tpu.matmul %50, %28, %cst_16 {dimension_numbers = #tpu.dot_dimension_numbers<[1], [0], [0], [1], [0, 0, 1, 1], [], []>} : vector<32x8xf32>, vector<8x128xf32>, vector<32x128xf32> -> vector<32x128xf32>
    %52 = vector.shape_cast %51 : vector<32x128xf32> to vector<4x8x128xf32>
    %53 = vector.broadcast %10 : vector<4x1x128xf32> to vector<4x8x128xf32>
    %54 = arith.mulf %52, %53 : vector<4x8x128xf32>
    %cst_17 = arith.constant dense<0.000000e+00> : vector<8x128xf32>
    %55 = vector.multi_reduction <add>, %54, %cst_17 [0] : vector<4x8x128xf32> to vector<8x128xf32>
    %56 = vector.extract_strided_slice %23 {offsets = [8, 0], sizes = [8, 128], strides = [1, 1]} : vector<16x128xf32> to vector<8x128xf32>
    %57 = vector.extract_strided_slice %24 {offsets = [8, 0], sizes = [8, 128], strides = [1, 1]} : vector<16x128xf32> to vector<8x128xf32>
    %58 = vector.extract_strided_slice %25 {offsets = [8, 0], sizes = [8, 128], strides = [1, 1]} : vector<16x128xf32> to vector<8x128xf32>
    %c1 = arith.constant 1 : index
    %c0_18 = arith.constant 0 : index
    %c0_19 = arith.constant 0 : index
    %59 = vector.load %arg2[%c1, %c0_18, %c0_19] : memref<2x1x8xf32, #tpu.memory_space<vmem>>, vector<1x1x8xf32>
    %60 = vector.shape_cast %59 : vector<1x1x8xf32> to vector<1x8xf32>
    %61 = vector.shape_cast %56 : vector<8x128xf32> to vector<1x8x128xf32>
    %62 = vector.broadcast %61 : vector<1x8x128xf32> to vector<4x8x128xf32>
    %63 = vector.broadcast %10 : vector<4x1x128xf32> to vector<4x8x128xf32>
    %64 = arith.mulf %62, %63 : vector<4x8x128xf32>
    %65 = vector.shape_cast %64 : vector<4x8x128xf32> to vector<32x128xf32>
    %cst_20 = arith.constant dense<0.000000e+00> : vector<32x8xf32>
    %66 = tpu.matmul %65, %57, %cst_20 {dimension_numbers = #tpu.dot_dimension_numbers<[1], [1], [0], [0], [0, 0, 1, 0], [], []>} : vector<32x128xf32>, vector<8x128xf32>, vector<32x8xf32> -> vector<32x8xf32>
    %67 = vector.shape_cast %66 : vector<32x8xf32> to vector<4x8x8xf32>
    %68 = vector.shape_cast %60 : vector<1x8xf32> to vector<1x1x8xf32>
    %69 = vector.broadcast %68 : vector<1x1x8xf32> to vector<4x8x8xf32>
    %70 = arith.addf %67, %69 : vector<4x8x8xf32>
    %cst_21 = arith.constant dense<0xFF800000> : vector<4x8xf32>
    %71 = vector.multi_reduction <maximumf>, %70, %cst_21 [2] : vector<4x8x8xf32> to vector<4x8xf32>
    %72 = vector.shape_cast %71 : vector<4x8xf32> to vector<4x8x1xf32>
    %73 = vector.broadcast %72 : vector<4x8x1xf32> to vector<4x8x8xf32>
    %74 = arith.subf %70, %73 : vector<4x8x8xf32>
    %75 = math.exp %74 : vector<4x8x8xf32>
    %cst_22 = arith.constant dense<0.000000e+00> : vector<4x8xf32>
    %76 = vector.multi_reduction <add>, %75, %cst_22 [2] : vector<4x8x8xf32> to vector<4x8xf32>
    %77 = vector.shape_cast %76 : vector<4x8xf32> to vector<4x8x1xf32>
    %78 = vector.broadcast %77 : vector<4x8x1xf32> to vector<4x8x8xf32>
    %79 = arith.divf %75, %78 : vector<4x8x8xf32>
    %80 = vector.shape_cast %79 : vector<4x8x8xf32> to vector<32x8xf32>
    %cst_23 = arith.constant dense<0.000000e+00> : vector<32x128xf32>
    %81 = tpu.matmul %80, %58, %cst_23 {dimension_numbers = #tpu.dot_dimension_numbers<[1], [0], [0], [1], [0, 0, 1, 1], [], []>} : vector<32x8xf32>, vector<8x128xf32>, vector<32x128xf32> -> vector<32x128xf32>
    %82 = vector.shape_cast %81 : vector<32x128xf32> to vector<4x8x128xf32>
    %83 = vector.broadcast %10 : vector<4x1x128xf32> to vector<4x8x128xf32>
    %84 = arith.mulf %82, %83 : vector<4x8x128xf32>
    %cst_24 = arith.constant dense<0.000000e+00> : vector<8x128xf32>
    %85 = vector.multi_reduction <add>, %84, %cst_24 [0] : vector<4x8x128xf32> to vector<8x128xf32>
    %86 = tpu.concatenate %55, %85 in 0 : vector<8x128xf32>, vector<8x128xf32> -> vector<16x128xf32>
    %c0_25 = arith.constant 0 : index
    %c0_26 = arith.constant 0 : index
    %c0_27 = arith.constant 0 : index
    %87 = vector.load %arg5[%c0_25, %c0_26, %c0_27] : memref<1x128x128xf32, #tpu.memory_space<vmem>>, vector<1x128x128xf32>
    %88 = vector.shape_cast %87 : vector<1x128x128xf32> to vector<128x128xf32>
    %cst_28 = arith.constant dense<0.000000e+00> : vector<16x128xf32>
    %89 = tpu.matmul %86, %88, %cst_28 {dimension_numbers = #tpu.dot_dimension_numbers<[1], [0], [0], [1], [0, 0, 1, 1], [], []>} : vector<16x128xf32>, vector<128x128xf32>, vector<16x128xf32> -> vector<16x128xf32>
    %c0_29 = arith.constant 0 : index
    %c0_30 = arith.constant 0 : index
    %c0_31 = arith.constant 0 : index
    %90 = vector.load %arg6[%c0_29, %c0_30, %c0_31] : memref<1x1x128xf32, #tpu.memory_space<vmem>>, vector<1x1x128xf32>
    %91 = vector.shape_cast %90 : vector<1x1x128xf32> to vector<1x128xf32>
    %92 = vector.broadcast %91 : vector<1x128xf32> to vector<16x128xf32>
    %93 = arith.addf %89, %92 : vector<16x128xf32>
    %94 = arith.addf %15, %93 : vector<16x128xf32>
    %c0_32 = arith.constant 0 : index
    %c0_33 = arith.constant 0 : index
    %c0_34 = arith.constant 0 : index
    %95 = vector.load %arg7[%c0_32, %c0_33, %c0_34] : memref<1x1x128xf32, #tpu.memory_space<vmem>>, vector<1x1x128xf32>
    %96 = vector.shape_cast %95 : vector<1x1x128xf32> to vector<1x128xf32>
    %c0_35 = arith.constant 0 : index
    %c0_36 = arith.constant 0 : index
    %c0_37 = arith.constant 0 : index
    %97 = vector.load %arg8[%c0_35, %c0_36, %c0_37] : memref<1x1x128xf32, #tpu.memory_space<vmem>>, vector<1x1x128xf32>
    %98 = vector.shape_cast %97 : vector<1x1x128xf32> to vector<1x128xf32>
    %cst_38 = arith.constant dense<0.000000e+00> : vector<16xf32>
    %99 = vector.multi_reduction <add>, %94, %cst_38 [1] : vector<16x128xf32> to vector<16xf32>
    %100 = vector.shape_cast %99 : vector<16xf32> to vector<16x1xf32>
    %cst_39 = arith.constant 1.280000e+02 : f32
    %101 = vector.broadcast %cst_39 : f32 to vector<16x1xf32>
    %102 = arith.divf %100, %101 : vector<16x1xf32>
    %103 = vector.broadcast %102 : vector<16x1xf32> to vector<16x128xf32>
    %104 = arith.subf %94, %103 : vector<16x128xf32>
    %105 = arith.mulf %104, %104 : vector<16x128xf32>
    %cst_40 = arith.constant dense<0.000000e+00> : vector<16xf32>
    %106 = vector.multi_reduction <add>, %105, %cst_40 [1] : vector<16x128xf32> to vector<16xf32>
    %107 = vector.shape_cast %106 : vector<16xf32> to vector<16x1xf32>
    %cst_41 = arith.constant 1.280000e+02 : f32
    %108 = vector.broadcast %cst_41 : f32 to vector<16x1xf32>
    %109 = arith.divf %107, %108 : vector<16x1xf32>
    %110 = vector.broadcast %102 : vector<16x1xf32> to vector<16x128xf32>
    %111 = arith.subf %94, %110 : vector<16x128xf32>
    %cst_42 = arith.constant 9.99999974E-6 : f32
    %112 = vector.broadcast %cst_42 : f32 to vector<16x1xf32>
    %113 = arith.addf %109, %112 : vector<16x1xf32>
    %114 = math.rsqrt %113 : vector<16x1xf32>
    %115 = vector.broadcast %114 : vector<16x1xf32> to vector<16x128xf32>
    %116 = arith.mulf %111, %115 : vector<16x128xf32>
    %117 = vector.broadcast %96 : vector<1x128xf32> to vector<16x128xf32>
    %118 = arith.mulf %116, %117 : vector<16x128xf32>
    %119 = vector.broadcast %98 : vector<1x128xf32> to vector<16x128xf32>
    %120 = arith.addf %118, %119 : vector<16x128xf32>
    %c0_43 = arith.constant 0 : index
    %c0_44 = arith.constant 0 : index
    %c0_45 = arith.constant 0 : index
    %121 = vector.load %arg9[%c0_43, %c0_44, %c0_45] : memref<1x128x256xf32, #tpu.memory_space<vmem>>, vector<1x128x256xf32>
    %122 = vector.shape_cast %121 : vector<1x128x256xf32> to vector<128x256xf32>
    %cst_46 = arith.constant dense<0.000000e+00> : vector<16x256xf32>
    %123 = tpu.matmul %120, %122, %cst_46 {dimension_numbers = #tpu.dot_dimension_numbers<[1], [0], [0], [1], [0, 0, 1, 1], [], []>} : vector<16x128xf32>, vector<128x256xf32>, vector<16x256xf32> -> vector<16x256xf32>
    %c0_47 = arith.constant 0 : index
    %c0_48 = arith.constant 0 : index
    %c0_49 = arith.constant 0 : index
    %124 = vector.load %arg10[%c0_47, %c0_48, %c0_49] : memref<1x1x256xf32, #tpu.memory_space<vmem>>, vector<1x1x256xf32>
    %125 = vector.shape_cast %124 : vector<1x1x256xf32> to vector<1x256xf32>
    %126 = vector.broadcast %125 : vector<1x256xf32> to vector<16x256xf32>
    %127 = arith.addf %123, %126 : vector<16x256xf32>
    %cst_50 = arith.constant 0.000000e+00 : f32
    %128 = vector.broadcast %cst_50 : f32 to vector<16x256xf32>
    %129 = arith.maximumf %127, %128 : vector<16x256xf32>
    %c0_51 = arith.constant 0 : index
    %c0_52 = arith.constant 0 : index
    %c0_53 = arith.constant 0 : index
    %130 = vector.load %arg11[%c0_51, %c0_52, %c0_53] : memref<1x256x128xf32, #tpu.memory_space<vmem>>, vector<1x256x128xf32>
    %131 = vector.shape_cast %130 : vector<1x256x128xf32> to vector<256x128xf32>
    %cst_54 = arith.constant dense<0.000000e+00> : vector<16x128xf32>
    %132 = tpu.matmul %129, %131, %cst_54 {dimension_numbers = #tpu.dot_dimension_numbers<[1], [0], [0], [1], [0, 0, 1, 1], [], []>} : vector<16x256xf32>, vector<256x128xf32>, vector<16x128xf32> -> vector<16x128xf32>
    %c0_55 = arith.constant 0 : index
    %c0_56 = arith.constant 0 : index
    %c0_57 = arith.constant 0 : index
    %133 = vector.load %arg12[%c0_55, %c0_56, %c0_57] : memref<1x1x128xf32, #tpu.memory_space<vmem>>, vector<1x1x128xf32>
    %134 = vector.shape_cast %133 : vector<1x1x128xf32> to vector<1x128xf32>
    %135 = vector.broadcast %134 : vector<1x128xf32> to vector<16x128xf32>
    %136 = arith.addf %132, %135 : vector<16x128xf32>
    %137 = arith.addf %120, %136 : vector<16x128xf32>
    %c0_58 = arith.constant 0 : index
    %c0_59 = arith.constant 0 : index
    %c0_60 = arith.constant 0 : index
    %138 = vector.load %arg13[%c0_58, %c0_59, %c0_60] : memref<1x1x128xf32, #tpu.memory_space<vmem>>, vector<1x1x128xf32>
    %139 = vector.shape_cast %138 : vector<1x1x128xf32> to vector<1x128xf32>
    %c0_61 = arith.constant 0 : index
    %c0_62 = arith.constant 0 : index
    %c0_63 = arith.constant 0 : index
    %140 = vector.load %arg14[%c0_61, %c0_62, %c0_63] : memref<1x1x128xf32, #tpu.memory_space<vmem>>, vector<1x1x128xf32>
    %141 = vector.shape_cast %140 : vector<1x1x128xf32> to vector<1x128xf32>
    %cst_64 = arith.constant dense<0.000000e+00> : vector<16xf32>
    %142 = vector.multi_reduction <add>, %137, %cst_64 [1] : vector<16x128xf32> to vector<16xf32>
    %143 = vector.shape_cast %142 : vector<16xf32> to vector<16x1xf32>
    %cst_65 = arith.constant 1.280000e+02 : f32
    %144 = vector.broadcast %cst_65 : f32 to vector<16x1xf32>
    %145 = arith.divf %143, %144 : vector<16x1xf32>
    %146 = vector.broadcast %145 : vector<16x1xf32> to vector<16x128xf32>
    %147 = arith.subf %137, %146 : vector<16x128xf32>
    %148 = arith.mulf %147, %147 : vector<16x128xf32>
    %cst_66 = arith.constant dense<0.000000e+00> : vector<16xf32>
    %149 = vector.multi_reduction <add>, %148, %cst_66 [1] : vector<16x128xf32> to vector<16xf32>
    %150 = vector.shape_cast %149 : vector<16xf32> to vector<16x1xf32>
    %cst_67 = arith.constant 1.280000e+02 : f32
    %151 = vector.broadcast %cst_67 : f32 to vector<16x1xf32>
    %152 = arith.divf %150, %151 : vector<16x1xf32>
    %153 = vector.broadcast %145 : vector<16x1xf32> to vector<16x128xf32>
    %154 = arith.subf %137, %153 : vector<16x128xf32>
    %cst_68 = arith.constant 9.99999974E-6 : f32
    %155 = vector.broadcast %cst_68 : f32 to vector<16x1xf32>
    %156 = arith.addf %152, %155 : vector<16x1xf32>
    %157 = math.rsqrt %156 : vector<16x1xf32>
    %158 = vector.broadcast %157 : vector<16x1xf32> to vector<16x128xf32>
    %159 = arith.mulf %154, %158 : vector<16x128xf32>
    %160 = vector.broadcast %139 : vector<1x128xf32> to vector<16x128xf32>
    %161 = arith.mulf %159, %160 : vector<16x128xf32>
    %162 = vector.broadcast %141 : vector<1x128xf32> to vector<16x128xf32>
    %163 = arith.addf %161, %162 : vector<16x128xf32>
    %164 = vector.shape_cast %163 : vector<16x128xf32> to vector<2x8x128xf32>
    %c0_69 = arith.constant 0 : index
    %c0_70 = arith.constant 0 : index
    %c0_71 = arith.constant 0 : index
    %165 = vector.load %arg17[%c0_69, %c0_70, %c0_71] : memref<2x8x128xf32, #tpu.memory_space<vmem>>, vector<2x8x128xf32>
    tpu.vector_store %arg17[%c0_69, %c0_70, %c0_71], %164 {strides = array<i32>} : memref<2x8x128xf32, #tpu.memory_space<vmem>>, vector<2x8x128xf32>,
    %c1_i32 = arith.constant 1 : i32
    %166 = arith.cmpi eq, %arg0, %c1_i32 : i32
    %167 = arith.extui %166 : i1 to i32
    %c0_i32_72 = arith.constant 0 : i32
    %168 = arith.cmpi ne, %167, %c0_i32_72 : i32
    scf.if %168 {
      %c0_73 = arith.constant 0 : index
      %c0_74 = arith.constant 0 : index
      %169 = vector.load %arg15[%c0_73, %c0_74] : memref<1x128xf32, #tpu.memory_space<vmem>>, vector<1x128xf32>
      %c0_75 = arith.constant 0 : index
      %c0_76 = arith.constant 0 : index
      %170 = vector.load %arg16[%c0_75, %c0_76] : memref<1x128xf32, #tpu.memory_space<vmem>>, vector<1x128xf32>
      %cst_77 = arith.constant dense<0.000000e+00> : vector<16xf32>
      %171 = vector.multi_reduction <add>, %163, %cst_77 [1] : vector<16x128xf32> to vector<16xf32>
      %172 = vector.shape_cast %171 : vector<16xf32> to vector<16x1xf32>
      %cst_78 = arith.constant 1.280000e+02 : f32
      %173 = vector.broadcast %cst_78 : f32 to vector<16x1xf32>
      %174 = arith.divf %172, %173 : vector<16x1xf32>
      %175 = vector.broadcast %174 : vector<16x1xf32> to vector<16x128xf32>
      %176 = arith.subf %163, %175 : vector<16x128xf32>
      %177 = arith.mulf %176, %176 : vector<16x128xf32>
      %cst_79 = arith.constant dense<0.000000e+00> : vector<16xf32>
      %178 = vector.multi_reduction <add>, %177, %cst_79 [1] : vector<16x128xf32> to vector<16xf32>
      %179 = vector.shape_cast %178 : vector<16xf32> to vector<16x1xf32>
      %cst_80 = arith.constant 1.280000e+02 : f32
      %180 = vector.broadcast %cst_80 : f32 to vector<16x1xf32>
      %181 = arith.divf %179, %180 : vector<16x1xf32>
      %182 = vector.broadcast %174 : vector<16x1xf32> to vector<16x128xf32>
      %183 = arith.subf %163, %182 : vector<16x128xf32>
      %cst_81 = arith.constant 9.99999974E-6 : f32
      %184 = vector.broadcast %cst_81 : f32 to vector<16x1xf32>
      %185 = arith.addf %181, %184 : vector<16x1xf32>
      %186 = math.rsqrt %185 : vector<16x1xf32>
      %187 = vector.broadcast %186 : vector<16x1xf32> to vector<16x128xf32>
      %188 = arith.mulf %183, %187 : vector<16x128xf32>
      %189 = vector.broadcast %169 : vector<1x128xf32> to vector<16x128xf32>
      %190 = arith.mulf %188, %189 : vector<16x128xf32>
      %191 = vector.broadcast %170 : vector<1x128xf32> to vector<16x128xf32>
      %192 = arith.addf %190, %191 : vector<16x128xf32>
      %193 = vector.shape_cast %192 : vector<16x128xf32> to vector<2x8x128xf32>
      %c0_82 = arith.constant 0 : index
      %c0_83 = arith.constant 0 : index
      %c0_84 = arith.constant 0 : index
      %194 = vector.load %arg17[%c0_82, %c0_83, %c0_84] : memref<2x8x128xf32, #tpu.memory_space<vmem>>, vector<2x8x128xf32>
      tpu.vector_store %arg17[%c0_82, %c0_83, %c0_84], %193 {strides = array<i32>} : memref<2x8x128xf32, #tpu.memory_space<vmem>>, vector<2x8x128xf32>,
    } else {
    }
    return
  }
  func.func @transform_0(%arg0: i32) -> (i32, i32, i32) {
    %c0_i32 = arith.constant 0 : i32
    %c0_i32_0 = arith.constant 0 : i32
    %c0_i32_1 = arith.constant 0 : i32
    %c0_i32_2 = arith.constant 0 : i32
    return %c0_i32, %c0_i32_0, %c0_i32_1 : i32, i32, i32
  }
  func.func @transform_1(%arg0: i32) -> (i32, i32, i32) {
    %c0_i32 = arith.constant 0 : i32
    %c0_i32_0 = arith.constant 0 : i32
    %c0_i32_1 = arith.constant 0 : i32
    %c0_i32_2 = arith.constant 0 : i32
    return %c0_i32, %c0_i32_0, %c0_i32_1 : i32, i32, i32
  }
  func.func @transform_2(%arg0: i32) -> (i32, i32, i32) {
    %c0_i32 = arith.constant 0 : i32
    %c0_i32_0 = arith.constant 0 : i32
    %c0_i32_1 = arith.constant 0 : i32
    return %arg0, %c0_i32, %c0_i32_0 : i32, i32, i32
  }
  func.func @transform_3(%arg0: i32) -> (i32, i32, i32) {
    %c0_i32 = arith.constant 0 : i32
    %c0_i32_0 = arith.constant 0 : i32
    %c0_i32_1 = arith.constant 0 : i32
    return %arg0, %c0_i32, %c0_i32_0 : i32, i32, i32
  }
  func.func @transform_4(%arg0: i32) -> (i32, i32, i32) {
    %c0_i32 = arith.constant 0 : i32
    %c0_i32_0 = arith.constant 0 : i32
    %c0_i32_1 = arith.constant 0 : i32
    return %arg0, %c0_i32, %c0_i32_0 : i32, i32, i32
  }
  func.func @transform_5(%arg0: i32) -> (i32, i32, i32) {
    %c0_i32 = arith.constant 0 : i32
    %c0_i32_0 = arith.constant 0 : i32
    %c0_i32_1 = arith.constant 0 : i32
    return %arg0, %c0_i32, %c0_i32_0 : i32, i32, i32
  }
  func.func @transform_6(%arg0: i32) -> (i32, i32, i32) {
    %c0_i32 = arith.constant 0 : i32
    %c0_i32_0 = arith.constant 0 : i32
    %c0_i32_1 = arith.constant 0 : i32
    return %arg0, %c0_i32, %c0_i32_0 : i32, i32, i32
  }
  func.func @transform_7(%arg0: i32) -> (i32, i32, i32) {
    %c0_i32 = arith.constant 0 : i32
    %c0_i32_0 = arith.constant 0 : i32
    %c0_i32_1 = arith.constant 0 : i32
    return %arg0, %c0_i32, %c0_i32_0 : i32, i32, i32
  }
  func.func @transform_8(%arg0: i32) -> (i32, i32, i32) {
    %c0_i32 = arith.constant 0 : i32
    %c0_i32_0 = arith.constant 0 : i32
    %c0_i32_1 = arith.constant 0 : i32
    return %arg0, %c0_i32, %c0_i32_0 : i32, i32, i32
  }
  func.func @transform_9(%arg0: i32) -> (i32, i32, i32) {
    %c0_i32 = arith.constant 0 : i32
    %c0_i32_0 = arith.constant 0 : i32
    %c0_i32_1 = arith.constant 0 : i32
    return %arg0, %c0_i32, %c0_i32_0 : i32, i32, i32
  }
  func.func @transform_10(%arg0: i32) -> (i32, i32, i32) {
    %c0_i32 = arith.constant 0 : i32
    %c0_i32_0 = arith.constant 0 : i32
    %c0_i32_1 = arith.constant 0 : i32
    return %arg0, %c0_i32, %c0_i32_0 : i32, i32, i32
  }
  func.func @transform_11(%arg0: i32) -> (i32, i32, i32) {
    %c0_i32 = arith.constant 0 : i32
    %c0_i32_0 = arith.constant 0 : i32
    %c0_i32_1 = arith.constant 0 : i32
    return %arg0, %c0_i32, %c0_i32_0 : i32, i32, i32
  }
  func.func @transform_12(%arg0: i32) -> (i32, i32, i32) {
    %c0_i32 = arith.constant 0 : i32
    %c0_i32_0 = arith.constant 0 : i32
    %c0_i32_1 = arith.constant 0 : i32
    return %arg0, %c0_i32, %c0_i32_0 : i32, i32, i32
  }
  func.func @transform_13(%arg0: i32) -> (i32, i32, i32) {
    %c0_i32 = arith.constant 0 : i32
    %c0_i32_0 = arith.constant 0 : i32
    %c0_i32_1 = arith.constant 0 : i32
    return %arg0, %c0_i32, %c0_i32_0 : i32, i32, i32
  }
  func.func @transform_14(%arg0: i32) -> (i32, i32) {
    %c0_i32 = arith.constant 0 : i32
    %c0_i32_0 = arith.constant 0 : i32
    %c0_i32_1 = arith.constant 0 : i32
    return %c0_i32, %c0_i32_0 : i32, i32
  }
  func.func @transform_15(%arg0: i32) -> (i32, i32) {
    %c0_i32 = arith.constant 0 : i32
    %c0_i32_0 = arith.constant 0 : i32
    %c0_i32_1 = arith.constant 0 : i32
    return %c0_i32, %c0_i32_0 : i32, i32
  }
  func.func @transform_16(%arg0: i32) -> (i32, i32, i32) {
    %c0_i32 = arith.constant 0 : i32
    %c0_i32_0 = arith.constant 0 : i32
    %c0_i32_1 = arith.constant 0 : i32
    %c0_i32_2 = arith.constant 0 : i32
    return %c0_i32, %c0_i32_0, %c0_i32_1 : i32, i32, i32
  }
}

module attributes {stable_mosaic.version = 11 : i64} {
  func.func @_decoder_stack_kernel(%arg0: i32, %arg1: memref<2x8x128xf32, #tpu.memory_space<vmem>>, %arg2: memref<2x8x128xf32, #tpu.memory_space<vmem>>, %arg3: memref<2x1x8xf32, #tpu.memory_space<vmem>>, %arg4: memref<1x128x384xf32, #tpu.memory_space<vmem>>, %arg5: memref<1x1x384xf32, #tpu.memory_space<vmem>>, %arg6: memref<1x128x128xf32, #tpu.memory_space<vmem>>, %arg7: memref<1x1x128xf32, #tpu.memory_space<vmem>>, %arg8: memref<1x1x128xf32, #tpu.memory_space<vmem>>, %arg9: memref<1x1x128xf32, #tpu.memory_space<vmem>>, %arg10: memref<1x128x128xf32, #tpu.memory_space<vmem>>, %arg11: memref<1x1x128xf32, #tpu.memory_space<vmem>>, %arg12: memref<1x128x256xf32, #tpu.memory_space<vmem>>, %arg13: memref<1x1x256xf32, #tpu.memory_space<vmem>>, %arg14: memref<1x128x128xf32, #tpu.memory_space<vmem>>, %arg15: memref<1x1x128xf32, #tpu.memory_space<vmem>>, %arg16: memref<1x1x128xf32, #tpu.memory_space<vmem>>, %arg17: memref<1x1x128xf32, #tpu.memory_space<vmem>>, %arg18: memref<1x128x256xf32, #tpu.memory_space<vmem>>, %arg19: memref<1x1x256xf32, #tpu.memory_space<vmem>>, %arg20: memref<1x256x128xf32, #tpu.memory_space<vmem>>, %arg21: memref<1x1x128xf32, #tpu.memory_space<vmem>>, %arg22: memref<1x1x128xf32, #tpu.memory_space<vmem>>, %arg23: memref<1x1x128xf32, #tpu.memory_space<vmem>>, %arg24: memref<1x128xf32, #tpu.memory_space<vmem>>, %arg25: memref<1x128xf32, #tpu.memory_space<vmem>>, %arg26: memref<128x128xf32, #tpu.memory_space<vmem>>, %arg27: memref<1x128xf32, #tpu.memory_space<vmem>>, %arg28: memref<2x8x128xf32, #tpu.memory_space<vmem>>, %arg29: memref<16x128xf32, #tpu.memory_space<vmem>>) attributes {dimension_semantics = [#tpu.dimension_semantics<arbitrary>], iteration_bounds = array<i64: 2>, scalar_prefetch = 0 : i64, scratch_operands = 1 : i64, tpu.core_type = #tpu.core_type<tc>, window_params = [{pipeline_mode = #tpu.pipeline_mode<synchronous>, transform_indices = @transform_0, window_bounds = array<i64: 2, 8, 128>}, {pipeline_mode = #tpu.pipeline_mode<synchronous>, transform_indices = @transform_1, window_bounds = array<i64: 2, 8, 128>}, {pipeline_mode = #tpu.pipeline_mode<synchronous>, transform_indices = @transform_2, window_bounds = array<i64: 2, 1, 8>}, {transform_indices = @transform_3, window_bounds = array<i64: 1, 128, 384>}, {transform_indices = @transform_4, window_bounds = array<i64: 1, 1, 384>}, {transform_indices = @transform_5, window_bounds = array<i64: 1, 128, 128>}, {transform_indices = @transform_6, window_bounds = array<i64: 1, 1, 128>}, {transform_indices = @transform_7, window_bounds = array<i64: 1, 1, 128>}, {transform_indices = @transform_8, window_bounds = array<i64: 1, 1, 128>}, {transform_indices = @transform_9, window_bounds = array<i64: 1, 128, 128>}, {transform_indices = @transform_10, window_bounds = array<i64: 1, 1, 128>}, {transform_indices = @transform_11, window_bounds = array<i64: 1, 128, 256>}, {transform_indices = @transform_12, window_bounds = array<i64: 1, 1, 256>}, {transform_indices = @transform_13, window_bounds = array<i64: 1, 128, 128>}, {transform_indices = @transform_14, window_bounds = array<i64: 1, 1, 128>}, {transform_indices = @transform_15, window_bounds = array<i64: 1, 1, 128>}, {transform_indices = @transform_16, window_bounds = array<i64: 1, 1, 128>}, {transform_indices = @transform_17, window_bounds = array<i64: 1, 128, 256>}, {transform_indices = @transform_18, window_bounds = array<i64: 1, 1, 256>}, {transform_indices = @transform_19, window_bounds = array<i64: 1, 256, 128>}, {transform_indices = @transform_20, window_bounds = array<i64: 1, 1, 128>}, {transform_indices = @transform_21, window_bounds = array<i64: 1, 1, 128>}, {transform_indices = @transform_22, window_bounds = array<i64: 1, 1, 128>}, {pipeline_mode = #tpu.pipeline_mode<synchronous>, transform_indices = @transform_23, window_bounds = array<i64: 1, 128>}, {pipeline_mode = #tpu.pipeline_mode<synchronous>, transform_indices = @transform_24, window_bounds = array<i64: 1, 128>}, {pipeline_mode = #tpu.pipeline_mode<synchronous>, transform_indices = @transform_25, window_bounds = array<i64: 128, 128>}, {pipeline_mode = #tpu.pipeline_mode<synchronous>, transform_indices = @transform_26, window_bounds = array<i64: 1, 128>}, {pipeline_mode = #tpu.pipeline_mode<synchronous>, transform_indices = @transform_27, window_bounds = array<i64: 2, 8, 128>}]} {
    %0 = tpu.iota {dimensions = array<i32: 2>} : vector<4x1x128xi32>
    %1 = tpu.iota {dimensions = array<i32: 0>} : vector<4x1x128xi32>
    %c32_i32 = arith.constant 32 : i32
    %2 = vector.broadcast %c32_i32 : i32 to vector<4x1x128xi32>
    %3 = arith.muli %1, %2 : vector<4x1x128xi32>
    %4 = arith.cmpi sge, %0, %3 : vector<4x1x128xi32>
    %c32_i32_0 = arith.constant 32 : i32
    %5 = vector.broadcast %c32_i32_0 : i32 to vector<4x1x128xi32>
    %6 = arith.addi %3, %5 : vector<4x1x128xi32>
    %7 = arith.cmpi slt, %0, %6 : vector<4x1x128xi32>
    %8 = arith.andi %4, %7 : vector<4x1x128xi1>
    %9 = arith.extui %8 : vector<4x1x128xi1> to vector<4x1x128xi32>
    %10 = arith.sitofp %9 : vector<4x1x128xi32> to vector<4x1x128xf32>
    %c0_i32 = arith.constant 0 : i32
    %11 = arith.cmpi eq, %arg0, %c0_i32 : i32
    %12 = arith.extui %11 : i1 to i32
    %c0_i32_1 = arith.constant 0 : i32
    %13 = arith.cmpi ne, %12, %c0_i32_1 : i32
    scf.if %13 {
      %c0_118 = arith.constant 0 : index
      %c0_119 = arith.constant 0 : index
      %c0_120 = arith.constant 0 : index
      %280 = vector.load %arg1[%c0_118, %c0_119, %c0_120] : memref<2x8x128xf32, #tpu.memory_space<vmem>>, vector<2x8x128xf32>
      %281 = vector.shape_cast %280 : vector<2x8x128xf32> to vector<16x128xf32>
      %c0_121 = arith.constant 0 : index
      %c0_122 = arith.constant 0 : index
      %282 = vector.load %arg29[%c0_121, %c0_122] : memref<16x128xf32, #tpu.memory_space<vmem>>, vector<16x128xf32>
      tpu.vector_store %arg29[%c0_121, %c0_122], %281 {strides = array<i32>} : memref<16x128xf32, #tpu.memory_space<vmem>>, vector<16x128xf32>,
    } else {
    }
    %c0 = arith.constant 0 : index
    %c0_2 = arith.constant 0 : index
    %14 = vector.load %arg29[%c0, %c0_2] : memref<16x128xf32, #tpu.memory_space<vmem>>, vector<16x128xf32>
    %c0_3 = arith.constant 0 : index
    %c0_4 = arith.constant 0 : index
    %c0_5 = arith.constant 0 : index
    %15 = vector.load %arg2[%c0_3, %c0_4, %c0_5] : memref<2x8x128xf32, #tpu.memory_space<vmem>>, vector<2x8x128xf32>
    %16 = vector.shape_cast %15 : vector<2x8x128xf32> to vector<16x128xf32>
    %17 = tpu.iota {dimensions = array<i32: 0>} : vector<8x8xi32>
    %18 = tpu.iota {dimensions = array<i32: 1>} : vector<8x8xi32>
    %19 = arith.cmpi sgt, %18, %17 : vector<8x8xi32>
    %cst = arith.constant -1.000000e+09 : f32
    %cst_6 = arith.constant 0.000000e+00 : f32
    %20 = vector.broadcast %cst : f32 to vector<8x8xf32>
    %21 = vector.broadcast %cst_6 : f32 to vector<8x8xf32>
    %22 = arith.select %19, %20, %21 : vector<8x8xi1>, vector<8x8xf32>
    %c0_7 = arith.constant 0 : index
    %c0_8 = arith.constant 0 : index
    %c0_9 = arith.constant 0 : index
    %23 = vector.load %arg4[%c0_7, %c0_8, %c0_9] : memref<1x128x384xf32, #tpu.memory_space<vmem>>, vector<1x128x384xf32>
    %24 = vector.shape_cast %23 : vector<1x128x384xf32> to vector<128x384xf32>
    %cst_10 = arith.constant dense<0.000000e+00> : vector<16x384xf32>
    %25 = tpu.matmul %14, %24, %cst_10 {dimension_numbers = #tpu.dot_dimension_numbers<[1], [0], [0], [1], [0, 0, 1, 1], [], []>} : vector<16x128xf32>, vector<128x384xf32>, vector<16x384xf32> -> vector<16x384xf32>
    %c0_11 = arith.constant 0 : index
    %c0_12 = arith.constant 0 : index
    %c0_13 = arith.constant 0 : index
    %26 = vector.load %arg5[%c0_11, %c0_12, %c0_13] : memref<1x1x384xf32, #tpu.memory_space<vmem>>, vector<1x1x384xf32>
    %27 = vector.shape_cast %26 : vector<1x1x384xf32> to vector<1x384xf32>
    %28 = vector.broadcast %27 : vector<1x384xf32> to vector<16x384xf32>
    %29 = arith.addf %25, %28 : vector<16x384xf32>
    %30 = vector.extract_strided_slice %29 {offsets = [0, 0], sizes = [16, 128], strides = [1, 1]} : vector<16x384xf32> to vector<16x128xf32>
    %31 = vector.extract_strided_slice %29 {offsets = [0, 128], sizes = [16, 128], strides = [1, 1]} : vector<16x384xf32> to vector<16x128xf32>
    %32 = vector.extract_strided_slice %29 {offsets = [0, 256], sizes = [16, 128], strides = [1, 1]} : vector<16x384xf32> to vector<16x128xf32>
    %33 = vector.extract_strided_slice %30 {offsets = [0, 0], sizes = [8, 128], strides = [1, 1]} : vector<16x128xf32> to vector<8x128xf32>
    %34 = vector.extract_strided_slice %31 {offsets = [0, 0], sizes = [8, 128], strides = [1, 1]} : vector<16x128xf32> to vector<8x128xf32>
    %35 = vector.extract_strided_slice %32 {offsets = [0, 0], sizes = [8, 128], strides = [1, 1]} : vector<16x128xf32> to vector<8x128xf32>
    %c0_14 = arith.constant 0 : index
    %c0_15 = arith.constant 0 : index
    %c0_16 = arith.constant 0 : index
    %36 = vector.load %arg3[%c0_14, %c0_15, %c0_16] : memref<2x1x8xf32, #tpu.memory_space<vmem>>, vector<1x1x8xf32>
    %37 = vector.shape_cast %36 : vector<1x1x8xf32> to vector<1x8xf32>
    %38 = vector.broadcast %37 : vector<1x8xf32> to vector<8x8xf32>
    %39 = arith.addf %22, %38 : vector<8x8xf32>
    %40 = vector.shape_cast %33 : vector<8x128xf32> to vector<1x8x128xf32>
    %41 = vector.broadcast %40 : vector<1x8x128xf32> to vector<4x8x128xf32>
    %42 = vector.broadcast %10 : vector<4x1x128xf32> to vector<4x8x128xf32>
    %43 = arith.mulf %41, %42 : vector<4x8x128xf32>
    %44 = vector.shape_cast %43 : vector<4x8x128xf32> to vector<32x128xf32>
    %cst_17 = arith.constant dense<0.000000e+00> : vector<32x8xf32>
    %45 = tpu.matmul %44, %34, %cst_17 {dimension_numbers = #tpu.dot_dimension_numbers<[1], [1], [0], [0], [0, 0, 1, 0], [], []>} : vector<32x128xf32>, vector<8x128xf32>, vector<32x8xf32> -> vector<32x8xf32>
    %46 = vector.shape_cast %45 : vector<32x8xf32> to vector<4x8x8xf32>
    %47 = vector.shape_cast %39 : vector<8x8xf32> to vector<1x8x8xf32>
    %48 = vector.broadcast %47 : vector<1x8x8xf32> to vector<4x8x8xf32>
    %49 = arith.addf %46, %48 : vector<4x8x8xf32>
    %cst_18 = arith.constant dense<0xFF800000> : vector<4x8xf32>
    %50 = vector.multi_reduction <maximumf>, %49, %cst_18 [2] : vector<4x8x8xf32> to vector<4x8xf32>
    %51 = vector.shape_cast %50 : vector<4x8xf32> to vector<4x8x1xf32>
    %52 = vector.broadcast %51 : vector<4x8x1xf32> to vector<4x8x8xf32>
    %53 = arith.subf %49, %52 : vector<4x8x8xf32>
    %54 = math.exp %53 : vector<4x8x8xf32>
    %cst_19 = arith.constant dense<0.000000e+00> : vector<4x8xf32>
    %55 = vector.multi_reduction <add>, %54, %cst_19 [2] : vector<4x8x8xf32> to vector<4x8xf32>
    %56 = vector.shape_cast %55 : vector<4x8xf32> to vector<4x8x1xf32>
    %57 = vector.broadcast %56 : vector<4x8x1xf32> to vector<4x8x8xf32>
    %58 = arith.divf %54, %57 : vector<4x8x8xf32>
    %59 = vector.shape_cast %58 : vector<4x8x8xf32> to vector<32x8xf32>
    %cst_20 = arith.constant dense<0.000000e+00> : vector<32x128xf32>
    %60 = tpu.matmul %59, %35, %cst_20 {dimension_numbers = #tpu.dot_dimension_numbers<[1], [0], [0], [1], [0, 0, 1, 1], [], []>} : vector<32x8xf32>, vector<8x128xf32>, vector<32x128xf32> -> vector<32x128xf32>
    %61 = vector.shape_cast %60 : vector<32x128xf32> to vector<4x8x128xf32>
    %62 = vector.broadcast %10 : vector<4x1x128xf32> to vector<4x8x128xf32>
    %63 = arith.mulf %61, %62 : vector<4x8x128xf32>
    %cst_21 = arith.constant dense<0.000000e+00> : vector<8x128xf32>
    %64 = vector.multi_reduction <add>, %63, %cst_21 [0] : vector<4x8x128xf32> to vector<8x128xf32>
    %65 = vector.extract_strided_slice %30 {offsets = [8, 0], sizes = [8, 128], strides = [1, 1]} : vector<16x128xf32> to vector<8x128xf32>
    %66 = vector.extract_strided_slice %31 {offsets = [8, 0], sizes = [8, 128], strides = [1, 1]} : vector<16x128xf32> to vector<8x128xf32>
    %67 = vector.extract_strided_slice %32 {offsets = [8, 0], sizes = [8, 128], strides = [1, 1]} : vector<16x128xf32> to vector<8x128xf32>
    %c1 = arith.constant 1 : index
    %c0_22 = arith.constant 0 : index
    %c0_23 = arith.constant 0 : index
    %68 = vector.load %arg3[%c1, %c0_22, %c0_23] : memref<2x1x8xf32, #tpu.memory_space<vmem>>, vector<1x1x8xf32>
    %69 = vector.shape_cast %68 : vector<1x1x8xf32> to vector<1x8xf32>
    %70 = vector.broadcast %69 : vector<1x8xf32> to vector<8x8xf32>
    %71 = arith.addf %22, %70 : vector<8x8xf32>
    %72 = vector.shape_cast %65 : vector<8x128xf32> to vector<1x8x128xf32>
    %73 = vector.broadcast %72 : vector<1x8x128xf32> to vector<4x8x128xf32>
    %74 = vector.broadcast %10 : vector<4x1x128xf32> to vector<4x8x128xf32>
    %75 = arith.mulf %73, %74 : vector<4x8x128xf32>
    %76 = vector.shape_cast %75 : vector<4x8x128xf32> to vector<32x128xf32>
    %cst_24 = arith.constant dense<0.000000e+00> : vector<32x8xf32>
    %77 = tpu.matmul %76, %66, %cst_24 {dimension_numbers = #tpu.dot_dimension_numbers<[1], [1], [0], [0], [0, 0, 1, 0], [], []>} : vector<32x128xf32>, vector<8x128xf32>, vector<32x8xf32> -> vector<32x8xf32>
    %78 = vector.shape_cast %77 : vector<32x8xf32> to vector<4x8x8xf32>
    %79 = vector.shape_cast %71 : vector<8x8xf32> to vector<1x8x8xf32>
    %80 = vector.broadcast %79 : vector<1x8x8xf32> to vector<4x8x8xf32>
    %81 = arith.addf %78, %80 : vector<4x8x8xf32>
    %cst_25 = arith.constant dense<0xFF800000> : vector<4x8xf32>
    %82 = vector.multi_reduction <maximumf>, %81, %cst_25 [2] : vector<4x8x8xf32> to vector<4x8xf32>
    %83 = vector.shape_cast %82 : vector<4x8xf32> to vector<4x8x1xf32>
    %84 = vector.broadcast %83 : vector<4x8x1xf32> to vector<4x8x8xf32>
    %85 = arith.subf %81, %84 : vector<4x8x8xf32>
    %86 = math.exp %85 : vector<4x8x8xf32>
    %cst_26 = arith.constant dense<0.000000e+00> : vector<4x8xf32>
    %87 = vector.multi_reduction <add>, %86, %cst_26 [2] : vector<4x8x8xf32> to vector<4x8xf32>
    %88 = vector.shape_cast %87 : vector<4x8xf32> to vector<4x8x1xf32>
    %89 = vector.broadcast %88 : vector<4x8x1xf32> to vector<4x8x8xf32>
    %90 = arith.divf %86, %89 : vector<4x8x8xf32>
    %91 = vector.shape_cast %90 : vector<4x8x8xf32> to vector<32x8xf32>
    %cst_27 = arith.constant dense<0.000000e+00> : vector<32x128xf32>
    %92 = tpu.matmul %91, %67, %cst_27 {dimension_numbers = #tpu.dot_dimension_numbers<[1], [0], [0], [1], [0, 0, 1, 1], [], []>} : vector<32x8xf32>, vector<8x128xf32>, vector<32x128xf32> -> vector<32x128xf32>
    %93 = vector.shape_cast %92 : vector<32x128xf32> to vector<4x8x128xf32>
    %94 = vector.broadcast %10 : vector<4x1x128xf32> to vector<4x8x128xf32>
    %95 = arith.mulf %93, %94 : vector<4x8x128xf32>
    %cst_28 = arith.constant dense<0.000000e+00> : vector<8x128xf32>
    %96 = vector.multi_reduction <add>, %95, %cst_28 [0] : vector<4x8x128xf32> to vector<8x128xf32>
    %97 = tpu.concatenate %64, %96 in 0 : vector<8x128xf32>, vector<8x128xf32> -> vector<16x128xf32>
    %c0_29 = arith.constant 0 : index
    %c0_30 = arith.constant 0 : index
    %c0_31 = arith.constant 0 : index
    %98 = vector.load %arg6[%c0_29, %c0_30, %c0_31] : memref<1x128x128xf32, #tpu.memory_space<vmem>>, vector<1x128x128xf32>
    %99 = vector.shape_cast %98 : vector<1x128x128xf32> to vector<128x128xf32>
    %cst_32 = arith.constant dense<0.000000e+00> : vector<16x128xf32>
    %100 = tpu.matmul %97, %99, %cst_32 {dimension_numbers = #tpu.dot_dimension_numbers<[1], [0], [0], [1], [0, 0, 1, 1], [], []>} : vector<16x128xf32>, vector<128x128xf32>, vector<16x128xf32> -> vector<16x128xf32>
    %c0_33 = arith.constant 0 : index
    %c0_34 = arith.constant 0 : index
    %c0_35 = arith.constant 0 : index
    %101 = vector.load %arg7[%c0_33, %c0_34, %c0_35] : memref<1x1x128xf32, #tpu.memory_space<vmem>>, vector<1x1x128xf32>
    %102 = vector.shape_cast %101 : vector<1x1x128xf32> to vector<1x128xf32>
    %103 = vector.broadcast %102 : vector<1x128xf32> to vector<16x128xf32>
    %104 = arith.addf %100, %103 : vector<16x128xf32>
    %105 = arith.addf %14, %104 : vector<16x128xf32>
    %c0_36 = arith.constant 0 : index
    %c0_37 = arith.constant 0 : index
    %c0_38 = arith.constant 0 : index
    %106 = vector.load %arg8[%c0_36, %c0_37, %c0_38] : memref<1x1x128xf32, #tpu.memory_space<vmem>>, vector<1x1x128xf32>
    %107 = vector.shape_cast %106 : vector<1x1x128xf32> to vector<1x128xf32>
    %c0_39 = arith.constant 0 : index
    %c0_40 = arith.constant 0 : index
    %c0_41 = arith.constant 0 : index
    %108 = vector.load %arg9[%c0_39, %c0_40, %c0_41] : memref<1x1x128xf32, #tpu.memory_space<vmem>>, vector<1x1x128xf32>
    %109 = vector.shape_cast %108 : vector<1x1x128xf32> to vector<1x128xf32>
    %cst_42 = arith.constant dense<0.000000e+00> : vector<16xf32>
    %110 = vector.multi_reduction <add>, %105, %cst_42 [1] : vector<16x128xf32> to vector<16xf32>
    %111 = vector.shape_cast %110 : vector<16xf32> to vector<16x1xf32>
    %cst_43 = arith.constant 1.280000e+02 : f32
    %112 = vector.broadcast %cst_43 : f32 to vector<16x1xf32>
    %113 = arith.divf %111, %112 : vector<16x1xf32>
    %114 = vector.broadcast %113 : vector<16x1xf32> to vector<16x128xf32>
    %115 = arith.subf %105, %114 : vector<16x128xf32>
    %116 = arith.mulf %115, %115 : vector<16x128xf32>
    %cst_44 = arith.constant dense<0.000000e+00> : vector<16xf32>
    %117 = vector.multi_reduction <add>, %116, %cst_44 [1] : vector<16x128xf32> to vector<16xf32>
    %118 = vector.shape_cast %117 : vector<16xf32> to vector<16x1xf32>
    %cst_45 = arith.constant 1.280000e+02 : f32
    %119 = vector.broadcast %cst_45 : f32 to vector<16x1xf32>
    %120 = arith.divf %118, %119 : vector<16x1xf32>
    %121 = vector.broadcast %113 : vector<16x1xf32> to vector<16x128xf32>
    %122 = arith.subf %105, %121 : vector<16x128xf32>
    %cst_46 = arith.constant 9.99999974E-6 : f32
    %123 = vector.broadcast %cst_46 : f32 to vector<16x1xf32>
    %124 = arith.addf %120, %123 : vector<16x1xf32>
    %125 = math.rsqrt %124 : vector<16x1xf32>
    %126 = vector.broadcast %125 : vector<16x1xf32> to vector<16x128xf32>
    %127 = arith.mulf %122, %126 : vector<16x128xf32>
    %128 = vector.broadcast %107 : vector<1x128xf32> to vector<16x128xf32>
    %129 = arith.mulf %127, %128 : vector<16x128xf32>
    %130 = vector.broadcast %109 : vector<1x128xf32> to vector<16x128xf32>
    %131 = arith.addf %129, %130 : vector<16x128xf32>
    %c0_47 = arith.constant 0 : index
    %c0_48 = arith.constant 0 : index
    %c0_49 = arith.constant 0 : index
    %132 = vector.load %arg10[%c0_47, %c0_48, %c0_49] : memref<1x128x128xf32, #tpu.memory_space<vmem>>, vector<1x128x128xf32>
    %133 = vector.shape_cast %132 : vector<1x128x128xf32> to vector<128x128xf32>
    %cst_50 = arith.constant dense<0.000000e+00> : vector<16x128xf32>
    %134 = tpu.matmul %131, %133, %cst_50 {dimension_numbers = #tpu.dot_dimension_numbers<[1], [0], [0], [1], [0, 0, 1, 1], [], []>} : vector<16x128xf32>, vector<128x128xf32>, vector<16x128xf32> -> vector<16x128xf32>
    %c0_51 = arith.constant 0 : index
    %c0_52 = arith.constant 0 : index
    %c0_53 = arith.constant 0 : index
    %135 = vector.load %arg11[%c0_51, %c0_52, %c0_53] : memref<1x1x128xf32, #tpu.memory_space<vmem>>, vector<1x1x128xf32>
    %136 = vector.shape_cast %135 : vector<1x1x128xf32> to vector<1x128xf32>
    %137 = vector.broadcast %136 : vector<1x128xf32> to vector<16x128xf32>
    %138 = arith.addf %134, %137 : vector<16x128xf32>
    %c0_54 = arith.constant 0 : index
    %c0_55 = arith.constant 0 : index
    %c0_56 = arith.constant 0 : index
    %139 = vector.load %arg12[%c0_54, %c0_55, %c0_56] : memref<1x128x256xf32, #tpu.memory_space<vmem>>, vector<1x128x256xf32>
    %140 = vector.shape_cast %139 : vector<1x128x256xf32> to vector<128x256xf32>
    %cst_57 = arith.constant dense<0.000000e+00> : vector<16x256xf32>
    %141 = tpu.matmul %16, %140, %cst_57 {dimension_numbers = #tpu.dot_dimension_numbers<[1], [0], [0], [1], [0, 0, 1, 1], [], []>} : vector<16x128xf32>, vector<128x256xf32>, vector<16x256xf32> -> vector<16x256xf32>
    %c0_58 = arith.constant 0 : index
    %c0_59 = arith.constant 0 : index
    %c0_60 = arith.constant 0 : index
    %142 = vector.load %arg13[%c0_58, %c0_59, %c0_60] : memref<1x1x256xf32, #tpu.memory_space<vmem>>, vector<1x1x256xf32>
    %143 = vector.shape_cast %142 : vector<1x1x256xf32> to vector<1x256xf32>
    %144 = vector.broadcast %143 : vector<1x256xf32> to vector<16x256xf32>
    %145 = arith.addf %141, %144 : vector<16x256xf32>
    %146 = vector.extract_strided_slice %145 {offsets = [0, 0], sizes = [16, 128], strides = [1, 1]} : vector<16x256xf32> to vector<16x128xf32>
    %147 = vector.extract_strided_slice %145 {offsets = [0, 128], sizes = [16, 128], strides = [1, 1]} : vector<16x256xf32> to vector<16x128xf32>
    %148 = vector.extract_strided_slice %138 {offsets = [0, 0], sizes = [8, 128], strides = [1, 1]} : vector<16x128xf32> to vector<8x128xf32>
    %149 = vector.extract_strided_slice %146 {offsets = [0, 0], sizes = [8, 128], strides = [1, 1]} : vector<16x128xf32> to vector<8x128xf32>
    %150 = vector.extract_strided_slice %147 {offsets = [0, 0], sizes = [8, 128], strides = [1, 1]} : vector<16x128xf32> to vector<8x128xf32>
    %151 = vector.shape_cast %148 : vector<8x128xf32> to vector<1x8x128xf32>
    %152 = vector.broadcast %151 : vector<1x8x128xf32> to vector<4x8x128xf32>
    %153 = vector.broadcast %10 : vector<4x1x128xf32> to vector<4x8x128xf32>
    %154 = arith.mulf %152, %153 : vector<4x8x128xf32>
    %155 = vector.shape_cast %154 : vector<4x8x128xf32> to vector<32x128xf32>
    %cst_61 = arith.constant dense<0.000000e+00> : vector<32x8xf32>
    %156 = tpu.matmul %155, %149, %cst_61 {dimension_numbers = #tpu.dot_dimension_numbers<[1], [1], [0], [0], [0, 0, 1, 0], [], []>} : vector<32x128xf32>, vector<8x128xf32>, vector<32x8xf32> -> vector<32x8xf32>
    %157 = vector.shape_cast %156 : vector<32x8xf32> to vector<4x8x8xf32>
    %cst_62 = arith.constant dense<0xFF800000> : vector<4x8xf32>
    %158 = vector.multi_reduction <maximumf>, %157, %cst_62 [2] : vector<4x8x8xf32> to vector<4x8xf32>
    %159 = vector.shape_cast %158 : vector<4x8xf32> to vector<4x8x1xf32>
    %160 = vector.broadcast %159 : vector<4x8x1xf32> to vector<4x8x8xf32>
    %161 = arith.subf %157, %160 : vector<4x8x8xf32>
    %162 = math.exp %161 : vector<4x8x8xf32>
    %cst_63 = arith.constant dense<0.000000e+00> : vector<4x8xf32>
    %163 = vector.multi_reduction <add>, %162, %cst_63 [2] : vector<4x8x8xf32> to vector<4x8xf32>
    %164 = vector.shape_cast %163 : vector<4x8xf32> to vector<4x8x1xf32>
    %165 = vector.broadcast %164 : vector<4x8x1xf32> to vector<4x8x8xf32>
    %166 = arith.divf %162, %165 : vector<4x8x8xf32>
    %167 = vector.shape_cast %166 : vector<4x8x8xf32> to vector<32x8xf32>
    %cst_64 = arith.constant dense<0.000000e+00> : vector<32x128xf32>
    %168 = tpu.matmul %167, %150, %cst_64 {dimension_numbers = #tpu.dot_dimension_numbers<[1], [0], [0], [1], [0, 0, 1, 1], [], []>} : vector<32x8xf32>, vector<8x128xf32>, vector<32x128xf32> -> vector<32x128xf32>
    %169 = vector.shape_cast %168 : vector<32x128xf32> to vector<4x8x128xf32>
    %170 = vector.broadcast %10 : vector<4x1x128xf32> to vector<4x8x128xf32>
    %171 = arith.mulf %169, %170 : vector<4x8x128xf32>
    %cst_65 = arith.constant dense<0.000000e+00> : vector<8x128xf32>
    %172 = vector.multi_reduction <add>, %171, %cst_65 [0] : vector<4x8x128xf32> to vector<8x128xf32>
    %173 = vector.extract_strided_slice %138 {offsets = [8, 0], sizes = [8, 128], strides = [1, 1]} : vector<16x128xf32> to vector<8x128xf32>
    %174 = vector.extract_strided_slice %146 {offsets = [8, 0], sizes = [8, 128], strides = [1, 1]} : vector<16x128xf32> to vector<8x128xf32>
    %175 = vector.extract_strided_slice %147 {offsets = [8, 0], sizes = [8, 128], strides = [1, 1]} : vector<16x128xf32> to vector<8x128xf32>
    %176 = vector.shape_cast %173 : vector<8x128xf32> to vector<1x8x128xf32>
    %177 = vector.broadcast %176 : vector<1x8x128xf32> to vector<4x8x128xf32>
    %178 = vector.broadcast %10 : vector<4x1x128xf32> to vector<4x8x128xf32>
    %179 = arith.mulf %177, %178 : vector<4x8x128xf32>
    %180 = vector.shape_cast %179 : vector<4x8x128xf32> to vector<32x128xf32>
    %cst_66 = arith.constant dense<0.000000e+00> : vector<32x8xf32>
    %181 = tpu.matmul %180, %174, %cst_66 {dimension_numbers = #tpu.dot_dimension_numbers<[1], [1], [0], [0], [0, 0, 1, 0], [], []>} : vector<32x128xf32>, vector<8x128xf32>, vector<32x8xf32> -> vector<32x8xf32>
    %182 = vector.shape_cast %181 : vector<32x8xf32> to vector<4x8x8xf32>
    %cst_67 = arith.constant dense<0xFF800000> : vector<4x8xf32>
    %183 = vector.multi_reduction <maximumf>, %182, %cst_67 [2] : vector<4x8x8xf32> to vector<4x8xf32>
    %184 = vector.shape_cast %183 : vector<4x8xf32> to vector<4x8x1xf32>
    %185 = vector.broadcast %184 : vector<4x8x1xf32> to vector<4x8x8xf32>
    %186 = arith.subf %182, %185 : vector<4x8x8xf32>
    %187 = math.exp %186 : vector<4x8x8xf32>
    %cst_68 = arith.constant dense<0.000000e+00> : vector<4x8xf32>
    %188 = vector.multi_reduction <add>, %187, %cst_68 [2] : vector<4x8x8xf32> to vector<4x8xf32>
    %189 = vector.shape_cast %188 : vector<4x8xf32> to vector<4x8x1xf32>
    %190 = vector.broadcast %189 : vector<4x8x1xf32> to vector<4x8x8xf32>
    %191 = arith.divf %187, %190 : vector<4x8x8xf32>
    %192 = vector.shape_cast %191 : vector<4x8x8xf32> to vector<32x8xf32>
    %cst_69 = arith.constant dense<0.000000e+00> : vector<32x128xf32>
    %193 = tpu.matmul %192, %175, %cst_69 {dimension_numbers = #tpu.dot_dimension_numbers<[1], [0], [0], [1], [0, 0, 1, 1], [], []>} : vector<32x8xf32>, vector<8x128xf32>, vector<32x128xf32> -> vector<32x128xf32>
    %194 = vector.shape_cast %193 : vector<32x128xf32> to vector<4x8x128xf32>
    %195 = vector.broadcast %10 : vector<4x1x128xf32> to vector<4x8x128xf32>
    %196 = arith.mulf %194, %195 : vector<4x8x128xf32>
    %cst_70 = arith.constant dense<0.000000e+00> : vector<8x128xf32>
    %197 = vector.multi_reduction <add>, %196, %cst_70 [0] : vector<4x8x128xf32> to vector<8x128xf32>
    %198 = tpu.concatenate %172, %197 in 0 : vector<8x128xf32>, vector<8x128xf32> -> vector<16x128xf32>
    %c0_71 = arith.constant 0 : index
    %c0_72 = arith.constant 0 : index
    %c0_73 = arith.constant 0 : index
    %199 = vector.load %arg14[%c0_71, %c0_72, %c0_73] : memref<1x128x128xf32, #tpu.memory_space<vmem>>, vector<1x128x128xf32>
    %200 = vector.shape_cast %199 : vector<1x128x128xf32> to vector<128x128xf32>
    %cst_74 = arith.constant dense<0.000000e+00> : vector<16x128xf32>
    %201 = tpu.matmul %198, %200, %cst_74 {dimension_numbers = #tpu.dot_dimension_numbers<[1], [0], [0], [1], [0, 0, 1, 1], [], []>} : vector<16x128xf32>, vector<128x128xf32>, vector<16x128xf32> -> vector<16x128xf32>
    %c0_75 = arith.constant 0 : index
    %c0_76 = arith.constant 0 : index
    %c0_77 = arith.constant 0 : index
    %202 = vector.load %arg15[%c0_75, %c0_76, %c0_77] : memref<1x1x128xf32, #tpu.memory_space<vmem>>, vector<1x1x128xf32>
    %203 = vector.shape_cast %202 : vector<1x1x128xf32> to vector<1x128xf32>
    %204 = vector.broadcast %203 : vector<1x128xf32> to vector<16x128xf32>
    %205 = arith.addf %201, %204 : vector<16x128xf32>
    %206 = arith.addf %131, %205 : vector<16x128xf32>
    %c0_78 = arith.constant 0 : index
    %c0_79 = arith.constant 0 : index
    %c0_80 = arith.constant 0 : index
    %207 = vector.load %arg16[%c0_78, %c0_79, %c0_80] : memref<1x1x128xf32, #tpu.memory_space<vmem>>, vector<1x1x128xf32>
    %208 = vector.shape_cast %207 : vector<1x1x128xf32> to vector<1x128xf32>
    %c0_81 = arith.constant 0 : index
    %c0_82 = arith.constant 0 : index
    %c0_83 = arith.constant 0 : index
    %209 = vector.load %arg17[%c0_81, %c0_82, %c0_83] : memref<1x1x128xf32, #tpu.memory_space<vmem>>, vector<1x1x128xf32>
    %210 = vector.shape_cast %209 : vector<1x1x128xf32> to vector<1x128xf32>
    %cst_84 = arith.constant dense<0.000000e+00> : vector<16xf32>
    %211 = vector.multi_reduction <add>, %206, %cst_84 [1] : vector<16x128xf32> to vector<16xf32>
    %212 = vector.shape_cast %211 : vector<16xf32> to vector<16x1xf32>
    %cst_85 = arith.constant 1.280000e+02 : f32
    %213 = vector.broadcast %cst_85 : f32 to vector<16x1xf32>
    %214 = arith.divf %212, %213 : vector<16x1xf32>
    %215 = vector.broadcast %214 : vector<16x1xf32> to vector<16x128xf32>
    %216 = arith.subf %206, %215 : vector<16x128xf32>
    %217 = arith.mulf %216, %216 : vector<16x128xf32>
    %cst_86 = arith.constant dense<0.000000e+00> : vector<16xf32>
    %218 = vector.multi_reduction <add>, %217, %cst_86 [1] : vector<16x128xf32> to vector<16xf32>
    %219 = vector.shape_cast %218 : vector<16xf32> to vector<16x1xf32>
    %cst_87 = arith.constant 1.280000e+02 : f32
    %220 = vector.broadcast %cst_87 : f32 to vector<16x1xf32>
    %221 = arith.divf %219, %220 : vector<16x1xf32>
    %222 = vector.broadcast %214 : vector<16x1xf32> to vector<16x128xf32>
    %223 = arith.subf %206, %222 : vector<16x128xf32>
    %cst_88 = arith.constant 9.99999974E-6 : f32
    %224 = vector.broadcast %cst_88 : f32 to vector<16x1xf32>
    %225 = arith.addf %221, %224 : vector<16x1xf32>
    %226 = math.rsqrt %225 : vector<16x1xf32>
    %227 = vector.broadcast %226 : vector<16x1xf32> to vector<16x128xf32>
    %228 = arith.mulf %223, %227 : vector<16x128xf32>
    %229 = vector.broadcast %208 : vector<1x128xf32> to vector<16x128xf32>
    %230 = arith.mulf %228, %229 : vector<16x128xf32>
    %231 = vector.broadcast %210 : vector<1x128xf32> to vector<16x128xf32>
    %232 = arith.addf %230, %231 : vector<16x128xf32>
    %c0_89 = arith.constant 0 : index
    %c0_90 = arith.constant 0 : index
    %c0_91 = arith.constant 0 : index
    %233 = vector.load %arg18[%c0_89, %c0_90, %c0_91] : memref<1x128x256xf32, #tpu.memory_space<vmem>>, vector<1x128x256xf32>
    %234 = vector.shape_cast %233 : vector<1x128x256xf32> to vector<128x256xf32>
    %cst_92 = arith.constant dense<0.000000e+00> : vector<16x256xf32>
    %235 = tpu.matmul %232, %234, %cst_92 {dimension_numbers = #tpu.dot_dimension_numbers<[1], [0], [0], [1], [0, 0, 1, 1], [], []>} : vector<16x128xf32>, vector<128x256xf32>, vector<16x256xf32> -> vector<16x256xf32>
    %c0_93 = arith.constant 0 : index
    %c0_94 = arith.constant 0 : index
    %c0_95 = arith.constant 0 : index
    %236 = vector.load %arg19[%c0_93, %c0_94, %c0_95] : memref<1x1x256xf32, #tpu.memory_space<vmem>>, vector<1x1x256xf32>
    %237 = vector.shape_cast %236 : vector<1x1x256xf32> to vector<1x256xf32>
    %238 = vector.broadcast %237 : vector<1x256xf32> to vector<16x256xf32>
    %239 = arith.addf %235, %238 : vector<16x256xf32>
    %cst_96 = arith.constant 0.000000e+00 : f32
    %240 = vector.broadcast %cst_96 : f32 to vector<16x256xf32>
    %241 = arith.maximumf %239, %240 : vector<16x256xf32>
    %c0_97 = arith.constant 0 : index
    %c0_98 = arith.constant 0 : index
    %c0_99 = arith.constant 0 : index
    %242 = vector.load %arg20[%c0_97, %c0_98, %c0_99] : memref<1x256x128xf32, #tpu.memory_space<vmem>>, vector<1x256x128xf32>
    %243 = vector.shape_cast %242 : vector<1x256x128xf32> to vector<256x128xf32>
    %cst_100 = arith.constant dense<0.000000e+00> : vector<16x128xf32>
    %244 = tpu.matmul %241, %243, %cst_100 {dimension_numbers = #tpu.dot_dimension_numbers<[1], [0], [0], [1], [0, 0, 1, 1], [], []>} : vector<16x256xf32>, vector<256x128xf32>, vector<16x128xf32> -> vector<16x128xf32>
    %c0_101 = arith.constant 0 : index
    %c0_102 = arith.constant 0 : index
    %c0_103 = arith.constant 0 : index
    %245 = vector.load %arg21[%c0_101, %c0_102, %c0_103] : memref<1x1x128xf32, #tpu.memory_space<vmem>>, vector<1x1x128xf32>
    %246 = vector.shape_cast %245 : vector<1x1x128xf32> to vector<1x128xf32>
    %247 = vector.broadcast %246 : vector<1x128xf32> to vector<16x128xf32>
    %248 = arith.addf %244, %247 : vector<16x128xf32>
    %249 = arith.addf %232, %248 : vector<16x128xf32>
    %c0_104 = arith.constant 0 : index
    %c0_105 = arith.constant 0 : index
    %c0_106 = arith.constant 0 : index
    %250 = vector.load %arg22[%c0_104, %c0_105, %c0_106] : memref<1x1x128xf32, #tpu.memory_space<vmem>>, vector<1x1x128xf32>
    %251 = vector.shape_cast %250 : vector<1x1x128xf32> to vector<1x128xf32>
    %c0_107 = arith.constant 0 : index
    %c0_108 = arith.constant 0 : index
    %c0_109 = arith.constant 0 : index
    %252 = vector.load %arg23[%c0_107, %c0_108, %c0_109] : memref<1x1x128xf32, #tpu.memory_space<vmem>>, vector<1x1x128xf32>
    %253 = vector.shape_cast %252 : vector<1x1x128xf32> to vector<1x128xf32>
    %cst_110 = arith.constant dense<0.000000e+00> : vector<16xf32>
    %254 = vector.multi_reduction <add>, %249, %cst_110 [1] : vector<16x128xf32> to vector<16xf32>
    %255 = vector.shape_cast %254 : vector<16xf32> to vector<16x1xf32>
    %cst_111 = arith.constant 1.280000e+02 : f32
    %256 = vector.broadcast %cst_111 : f32 to vector<16x1xf32>
    %257 = arith.divf %255, %256 : vector<16x1xf32>
    %258 = vector.broadcast %257 : vector<16x1xf32> to vector<16x128xf32>
    %259 = arith.subf %249, %258 : vector<16x128xf32>
    %260 = arith.mulf %259, %259 : vector<16x128xf32>
    %cst_112 = arith.constant dense<0.000000e+00> : vector<16xf32>
    %261 = vector.multi_reduction <add>, %260, %cst_112 [1] : vector<16x128xf32> to vector<16xf32>
    %262 = vector.shape_cast %261 : vector<16xf32> to vector<16x1xf32>
    %cst_113 = arith.constant 1.280000e+02 : f32
    %263 = vector.broadcast %cst_113 : f32 to vector<16x1xf32>
    %264 = arith.divf %262, %263 : vector<16x1xf32>
    %265 = vector.broadcast %257 : vector<16x1xf32> to vector<16x128xf32>
    %266 = arith.subf %249, %265 : vector<16x128xf32>
    %cst_114 = arith.constant 9.99999974E-6 : f32
    %267 = vector.broadcast %cst_114 : f32 to vector<16x1xf32>
    %268 = arith.addf %264, %267 : vector<16x1xf32>
    %269 = math.rsqrt %268 : vector<16x1xf32>
    %270 = vector.broadcast %269 : vector<16x1xf32> to vector<16x128xf32>
    %271 = arith.mulf %266, %270 : vector<16x128xf32>
    %272 = vector.broadcast %251 : vector<1x128xf32> to vector<16x128xf32>
    %273 = arith.mulf %271, %272 : vector<16x128xf32>
    %274 = vector.broadcast %253 : vector<1x128xf32> to vector<16x128xf32>
    %275 = arith.addf %273, %274 : vector<16x128xf32>
    %c0_115 = arith.constant 0 : index
    %c0_116 = arith.constant 0 : index
    %276 = vector.load %arg29[%c0_115, %c0_116] : memref<16x128xf32, #tpu.memory_space<vmem>>, vector<16x128xf32>
    tpu.vector_store %arg29[%c0_115, %c0_116], %275 {strides = array<i32>} : memref<16x128xf32, #tpu.memory_space<vmem>>, vector<16x128xf32>,
    %c1_i32 = arith.constant 1 : i32
    %277 = arith.cmpi eq, %arg0, %c1_i32 : i32
    %278 = arith.extui %277 : i1 to i32
    %c0_i32_117 = arith.constant 0 : i32
    %279 = arith.cmpi ne, %278, %c0_i32_117 : i32
    scf.if %279 {
      %c0_118 = arith.constant 0 : index
      %c0_119 = arith.constant 0 : index
      %280 = vector.load %arg24[%c0_118, %c0_119] : memref<1x128xf32, #tpu.memory_space<vmem>>, vector<1x128xf32>
      %c0_120 = arith.constant 0 : index
      %c0_121 = arith.constant 0 : index
      %281 = vector.load %arg25[%c0_120, %c0_121] : memref<1x128xf32, #tpu.memory_space<vmem>>, vector<1x128xf32>
      %cst_122 = arith.constant dense<0.000000e+00> : vector<16xf32>
      %282 = vector.multi_reduction <add>, %275, %cst_122 [1] : vector<16x128xf32> to vector<16xf32>
      %283 = vector.shape_cast %282 : vector<16xf32> to vector<16x1xf32>
      %cst_123 = arith.constant 1.280000e+02 : f32
      %284 = vector.broadcast %cst_123 : f32 to vector<16x1xf32>
      %285 = arith.divf %283, %284 : vector<16x1xf32>
      %286 = vector.broadcast %285 : vector<16x1xf32> to vector<16x128xf32>
      %287 = arith.subf %275, %286 : vector<16x128xf32>
      %288 = arith.mulf %287, %287 : vector<16x128xf32>
      %cst_124 = arith.constant dense<0.000000e+00> : vector<16xf32>
      %289 = vector.multi_reduction <add>, %288, %cst_124 [1] : vector<16x128xf32> to vector<16xf32>
      %290 = vector.shape_cast %289 : vector<16xf32> to vector<16x1xf32>
      %cst_125 = arith.constant 1.280000e+02 : f32
      %291 = vector.broadcast %cst_125 : f32 to vector<16x1xf32>
      %292 = arith.divf %290, %291 : vector<16x1xf32>
      %293 = vector.broadcast %285 : vector<16x1xf32> to vector<16x128xf32>
      %294 = arith.subf %275, %293 : vector<16x128xf32>
      %cst_126 = arith.constant 9.99999974E-6 : f32
      %295 = vector.broadcast %cst_126 : f32 to vector<16x1xf32>
      %296 = arith.addf %292, %295 : vector<16x1xf32>
      %297 = math.rsqrt %296 : vector<16x1xf32>
      %298 = vector.broadcast %297 : vector<16x1xf32> to vector<16x128xf32>
      %299 = arith.mulf %294, %298 : vector<16x128xf32>
      %300 = vector.broadcast %280 : vector<1x128xf32> to vector<16x128xf32>
      %301 = arith.mulf %299, %300 : vector<16x128xf32>
      %302 = vector.broadcast %281 : vector<1x128xf32> to vector<16x128xf32>
      %303 = arith.addf %301, %302 : vector<16x128xf32>
      %c0_127 = arith.constant 0 : index
      %c0_128 = arith.constant 0 : index
      %304 = vector.load %arg26[%c0_127, %c0_128] : memref<128x128xf32, #tpu.memory_space<vmem>>, vector<128x128xf32>
      %cst_129 = arith.constant dense<0.000000e+00> : vector<16x128xf32>
      %305 = tpu.matmul %303, %304, %cst_129 {dimension_numbers = #tpu.dot_dimension_numbers<[1], [0], [0], [1], [0, 0, 1, 1], [], []>} : vector<16x128xf32>, vector<128x128xf32>, vector<16x128xf32> -> vector<16x128xf32>
      %c0_130 = arith.constant 0 : index
      %c0_131 = arith.constant 0 : index
      %306 = vector.load %arg27[%c0_130, %c0_131] : memref<1x128xf32, #tpu.memory_space<vmem>>, vector<1x128xf32>
      %307 = vector.broadcast %306 : vector<1x128xf32> to vector<16x128xf32>
      %308 = arith.addf %305, %307 : vector<16x128xf32>
      %309 = vector.shape_cast %308 : vector<16x128xf32> to vector<2x8x128xf32>
      %c0_132 = arith.constant 0 : index
      %c0_133 = arith.constant 0 : index
      %c0_134 = arith.constant 0 : index
      %310 = vector.load %arg28[%c0_132, %c0_133, %c0_134] : memref<2x8x128xf32, #tpu.memory_space<vmem>>, vector<2x8x128xf32>
      tpu.vector_store %arg28[%c0_132, %c0_133, %c0_134], %309 {strides = array<i32>} : memref<2x8x128xf32, #tpu.memory_space<vmem>>, vector<2x8x128xf32>,
    } else {
    }
    return
  }
  func.func @transform_0(%arg0: i32) -> (i32, i32, i32) {
    %c0_i32 = arith.constant 0 : i32
    %c0_i32_0 = arith.constant 0 : i32
    %c0_i32_1 = arith.constant 0 : i32
    %c0_i32_2 = arith.constant 0 : i32
    return %c0_i32, %c0_i32_0, %c0_i32_1 : i32, i32, i32
  }
  func.func @transform_1(%arg0: i32) -> (i32, i32, i32) {
    %c0_i32 = arith.constant 0 : i32
    %c0_i32_0 = arith.constant 0 : i32
    %c0_i32_1 = arith.constant 0 : i32
    %c0_i32_2 = arith.constant 0 : i32
    return %c0_i32, %c0_i32_0, %c0_i32_1 : i32, i32, i32
  }
  func.func @transform_2(%arg0: i32) -> (i32, i32, i32) {
    %c0_i32 = arith.constant 0 : i32
    %c0_i32_0 = arith.constant 0 : i32
    %c0_i32_1 = arith.constant 0 : i32
    %c0_i32_2 = arith.constant 0 : i32
    return %c0_i32, %c0_i32_0, %c0_i32_1 : i32, i32, i32
  }
  func.func @transform_3(%arg0: i32) -> (i32, i32, i32) {
    %c0_i32 = arith.constant 0 : i32
    %c0_i32_0 = arith.constant 0 : i32
    %c0_i32_1 = arith.constant 0 : i32
    return %arg0, %c0_i32, %c0_i32_0 : i32, i32, i32
  }
  func.func @transform_4(%arg0: i32) -> (i32, i32, i32) {
    %c0_i32 = arith.constant 0 : i32
    %c0_i32_0 = arith.constant 0 : i32
    %c0_i32_1 = arith.constant 0 : i32
    return %arg0, %c0_i32, %c0_i32_0 : i32, i32, i32
  }
  func.func @transform_5(%arg0: i32) -> (i32, i32, i32) {
    %c0_i32 = arith.constant 0 : i32
    %c0_i32_0 = arith.constant 0 : i32
    %c0_i32_1 = arith.constant 0 : i32
    return %arg0, %c0_i32, %c0_i32_0 : i32, i32, i32
  }
  func.func @transform_6(%arg0: i32) -> (i32, i32, i32) {
    %c0_i32 = arith.constant 0 : i32
    %c0_i32_0 = arith.constant 0 : i32
    %c0_i32_1 = arith.constant 0 : i32
    return %arg0, %c0_i32, %c0_i32_0 : i32, i32, i32
  }
  func.func @transform_7(%arg0: i32) -> (i32, i32, i32) {
    %c0_i32 = arith.constant 0 : i32
    %c0_i32_0 = arith.constant 0 : i32
    %c0_i32_1 = arith.constant 0 : i32
    return %arg0, %c0_i32, %c0_i32_0 : i32, i32, i32
  }
  func.func @transform_8(%arg0: i32) -> (i32, i32, i32) {
    %c0_i32 = arith.constant 0 : i32
    %c0_i32_0 = arith.constant 0 : i32
    %c0_i32_1 = arith.constant 0 : i32
    return %arg0, %c0_i32, %c0_i32_0 : i32, i32, i32
  }
  func.func @transform_9(%arg0: i32) -> (i32, i32, i32) {
    %c0_i32 = arith.constant 0 : i32
    %c0_i32_0 = arith.constant 0 : i32
    %c0_i32_1 = arith.constant 0 : i32
    return %arg0, %c0_i32, %c0_i32_0 : i32, i32, i32
  }
  func.func @transform_10(%arg0: i32) -> (i32, i32, i32) {
    %c0_i32 = arith.constant 0 : i32
    %c0_i32_0 = arith.constant 0 : i32
    %c0_i32_1 = arith.constant 0 : i32
    return %arg0, %c0_i32, %c0_i32_0 : i32, i32, i32
  }
  func.func @transform_11(%arg0: i32) -> (i32, i32, i32) {
    %c0_i32 = arith.constant 0 : i32
    %c0_i32_0 = arith.constant 0 : i32
    %c0_i32_1 = arith.constant 0 : i32
    return %arg0, %c0_i32, %c0_i32_0 : i32, i32, i32
  }
  func.func @transform_12(%arg0: i32) -> (i32, i32, i32) {
    %c0_i32 = arith.constant 0 : i32
    %c0_i32_0 = arith.constant 0 : i32
    %c0_i32_1 = arith.constant 0 : i32
    return %arg0, %c0_i32, %c0_i32_0 : i32, i32, i32
  }
  func.func @transform_13(%arg0: i32) -> (i32, i32, i32) {
    %c0_i32 = arith.constant 0 : i32
    %c0_i32_0 = arith.constant 0 : i32
    %c0_i32_1 = arith.constant 0 : i32
    return %arg0, %c0_i32, %c0_i32_0 : i32, i32, i32
  }
  func.func @transform_14(%arg0: i32) -> (i32, i32, i32) {
    %c0_i32 = arith.constant 0 : i32
    %c0_i32_0 = arith.constant 0 : i32
    %c0_i32_1 = arith.constant 0 : i32
    return %arg0, %c0_i32, %c0_i32_0 : i32, i32, i32
  }
  func.func @transform_15(%arg0: i32) -> (i32, i32, i32) {
    %c0_i32 = arith.constant 0 : i32
    %c0_i32_0 = arith.constant 0 : i32
    %c0_i32_1 = arith.constant 0 : i32
    return %arg0, %c0_i32, %c0_i32_0 : i32, i32, i32
  }
  func.func @transform_16(%arg0: i32) -> (i32, i32, i32) {
    %c0_i32 = arith.constant 0 : i32
    %c0_i32_0 = arith.constant 0 : i32
    %c0_i32_1 = arith.constant 0 : i32
    return %arg0, %c0_i32, %c0_i32_0 : i32, i32, i32
  }
  func.func @transform_17(%arg0: i32) -> (i32, i32, i32) {
    %c0_i32 = arith.constant 0 : i32
    %c0_i32_0 = arith.constant 0 : i32
    %c0_i32_1 = arith.constant 0 : i32
    return %arg0, %c0_i32, %c0_i32_0 : i32, i32, i32
  }
  func.func @transform_18(%arg0: i32) -> (i32, i32, i32) {
    %c0_i32 = arith.constant 0 : i32
    %c0_i32_0 = arith.constant 0 : i32
    %c0_i32_1 = arith.constant 0 : i32
    return %arg0, %c0_i32, %c0_i32_0 : i32, i32, i32
  }
  func.func @transform_19(%arg0: i32) -> (i32, i32, i32) {
    %c0_i32 = arith.constant 0 : i32
    %c0_i32_0 = arith.constant 0 : i32
    %c0_i32_1 = arith.constant 0 : i32
    return %arg0, %c0_i32, %c0_i32_0 : i32, i32, i32
  }
  func.func @transform_20(%arg0: i32) -> (i32, i32, i32) {
    %c0_i32 = arith.constant 0 : i32
    %c0_i32_0 = arith.constant 0 : i32
    %c0_i32_1 = arith.constant 0 : i32
    return %arg0, %c0_i32, %c0_i32_0 : i32, i32, i32
  }
  func.func @transform_21(%arg0: i32) -> (i32, i32, i32) {
    %c0_i32 = arith.constant 0 : i32
    %c0_i32_0 = arith.constant 0 : i32
    %c0_i32_1 = arith.constant 0 : i32
    return %arg0, %c0_i32, %c0_i32_0 : i32, i32, i32
  }
  func.func @transform_22(%arg0: i32) -> (i32, i32, i32) {
    %c0_i32 = arith.constant 0 : i32
    %c0_i32_0 = arith.constant 0 : i32
    %c0_i32_1 = arith.constant 0 : i32
    return %arg0, %c0_i32, %c0_i32_0 : i32, i32, i32
  }
  func.func @transform_23(%arg0: i32) -> (i32, i32) {
    %c0_i32 = arith.constant 0 : i32
    %c0_i32_0 = arith.constant 0 : i32
    %c0_i32_1 = arith.constant 0 : i32
    return %c0_i32, %c0_i32_0 : i32, i32
  }
  func.func @transform_24(%arg0: i32) -> (i32, i32) {
    %c0_i32 = arith.constant 0 : i32
    %c0_i32_0 = arith.constant 0 : i32
    %c0_i32_1 = arith.constant 0 : i32
    return %c0_i32, %c0_i32_0 : i32, i32
  }
  func.func @transform_25(%arg0: i32) -> (i32, i32) {
    %c0_i32 = arith.constant 0 : i32
    %c0_i32_0 = arith.constant 0 : i32
    %c0_i32_1 = arith.constant 0 : i32
    return %c0_i32, %c0_i32_0 : i32, i32
  }
  func.func @transform_26(%arg0: i32) -> (i32, i32) {
    %c0_i32 = arith.constant 0 : i32
    %c0_i32_0 = arith.constant 0 : i32
    %c0_i32_1 = arith.constant 0 : i32
    return %c0_i32, %c0_i32_0 : i32, i32
  }
  func.func @transform_27(%arg0: i32) -> (i32, i32, i32) {
    %c0_i32 = arith.constant 0 : i32
    %c0_i32_0 = arith.constant 0 : i32
    %c0_i32_1 = arith.constant 0 : i32
    %c0_i32_2 = arith.constant 0 : i32
    return %c0_i32, %c0_i32_0, %c0_i32_1 : i32, i32, i32
  }
}

</mosaic_0001>

<bundles_post_ra>
// kernel: transformer_forward.2
= control target key start
LH: loop header
LB: loop body
LE: loop exit
PB: predicated region body
PF: predicated region fallthrough
CT: control target
= control target key end

     0   :  { %s3750_s0 = inlined_call_operand.vmem [shape: f32[2,8,128], index: 0, kind: input, shape index: {}]   ;;  %s3751_s1 = inlined_call_operand.vmem [shape: f32[2,1,8], index: 1, kind: input, shape index: {}]   ;;  %s3752_s2 = inlined_call_operand.hbm [shape: f32[2,128,384], index: 2, kind: input, shape index: {}]   ;;  %s3753_s3 = inlined_call_operand.vmem [shape: f32[2,1,384], index: 3, kind: input, shape index: {}]   ;;  %s3754_s4 = inlined_call_operand.vmem [shape: f32[2,128,128], index: 4, kind: input, shape index: {}]   ;;  %s3755_s5 = inlined_call_operand.vmem [shape: f32[2,1,128], index: 5, kind: input, shape index: {}]   ;;  %s3756_s6 = inlined_call_operand.hbm [shape: f32[2,1,128], index: 6, kind: input, shape index: {}]   ;;  %s3757_s7 = inlined_call_operand.hbm [shape: f32[2,1,128], index: 7, kind: input, shape index: {}]   ;;  %s3758_s8 = inlined_call_operand.hbm [shape: f32[2,128,256], index: 8, kind: input, shape index: {}]   ;;  %s3759_s9 = inlined_call_operand.vmem [shape: f32[2,1,256], index: 9, kind: input, shape index: {}]   ;;  %s3760_s10 = inlined_call_operand.hbm [shape: f32[2,256,128], index: 10, kind: input, shape index: {}]   ;;  %s3761_s11 = inlined_call_operand.vmem [shape: f32[2,1,128], index: 11, kind: input, shape index: {}]   ;;  %s3762_s12 = inlined_call_operand.hbm [shape: f32[2,1,128], index: 12, kind: input, shape index: {}]   ;;  %s3763_s13 = inlined_call_operand.hbm [shape: f32[2,1,128], index: 13, kind: input, shape index: {}]   ;;  %s3764_s14 = inlined_call_operand.hbm [shape: f32[1,128], index: 14, kind: input, shape index: {}]   ;;  %s3765_s15 = inlined_call_operand.hbm [shape: f32[1,128], index: 15, kind: input, shape index: {}]   ;;  %s3766_s16 = inlined_call_operand.vmem [shape: f32[2,8,128], index: 16, kind: output, shape index: {}]  }
   0x1   :  { %3786 = sst [smem:[#allocation25_spill]] %s3750_s0 }
   0x2   :  { %3787 = sst [smem:[#allocation26_spill]] %s3751_s1 }
   0x3   :  { %3788 = sst [smem:[#allocation27_spill]] %s3752_s2 }
   0x4   :  { %3789 = sst [smem:[#allocation28_spill]] %s3753_s3 }
   0x5   :  { %3790 = sst [smem:[#allocation29_spill]] %s3754_s4 }
   0x6   :  { %3791 = sst [smem:[#allocation30_spill]] %s3755_s5 }
   0x7   :  { %3792 = sst [smem:[#allocation31_spill]] %s3756_s6 }
   0x8   :  { %3793 = sst [smem:[#allocation32_spill]] %s3758_s8 }
   0x9   :  { %3794 = sst [smem:[#allocation33_spill]] %s3759_s9 }
   0xa   :  { %3795 = sst [smem:[#allocation34_spill]] %s3761_s11 }
   0xb   :  { %3796 = sst [smem:[#allocation35_spill]] %s3764_s14 }
   0xc   :  { %3797 = sst [smem:[#allocation36_spill]] %s3766_s16 }
   0xd   :  { %21 = vsyncpa [#allocation3], 0 }
   0xe   :  { %23 = vsyncpa [#allocation3 + $0x1], 0 }
   0xf   :  { %24 = vsyncpa [#allocation5], 0 }
  0x10   :  { %26 = vsyncpa [#allocation5 + $0x1], 0 }
  0x11   :  { %27 = vsyncpa [#allocation8], 0 }
  0x12   :  { %29 = vsyncpa [#allocation8 + $0x1], 0 }
  0x13   :  { %30 = vsyncpa [#allocation11], 0 }
  0x14   :  { %32 = vsyncpa [#allocation11 + $0x1], 0 }
  0x15   :  { %33 = vsyncpa [#allocation14], 0  ;;  %s3083_s21 = smov 0   ;;  %s3085_s22 = smov 0  }
  0x16   :  { %s3087_s23 = smov 0   ;;  %s3089_s24 = smov 0  }
  0x17 LB: > { %3798 = sst [smem:[#allocation21_spill]] %s2976_s23  ;;  %s3102_s25 = sadd.s32 4294967295, %s2980_s24   ;;  %s2980_s24 = sphi %s3089_s24, %s3839_s24   ;;  %s2976_s23 = sphi %s3087_s23, %s3841_s23   ;;  %s2972_s22 = sphi %s3085_s22, %s3843_s22   ;;  %s2968_s21 = sphi %s3083_s21, %s3842_s21  }
  0x18   : > { %3799 = sst [smem:[#allocation22_spill]] %s3102_s25  ;;  %s3105_s26 = sadd.s32 1, %s2980_s24  }
  0x19   : > { %3800 = sst [smem:[#allocation23_spill]] %s3105_s26  ;;  %s85_s27 = ssub.s32 %s2980_s24, %s3105_s26 }
  0x1a   : > { %s88_s28 = sadd.s32 1, %s2976_s23  ;;  %p86_p0 = scmp.eq.s32.totalorder %s85_s27, 0 }
  0x1b   : > { %p95_p1 = scmp.ne.s32.totalorder %s2976_s23, %s2972_s22  ;;  %p96_p2 = scmp.eq.s32.totalorder %s2980_s24, 0 }
  0x1c   : > { %p101_p3 = scmp.ne.s32.totalorder %s2972_s22, %s2968_s21  ;;  %p3768_p5 = scmp.eq.s32.totalorder %s3102_s25, 0 }
  0x1d   : > { %s3115_s29 = scalar_select %p86_p0, %s2976_s23, %s88_s28  }
  0x1e   : > { %p3117_p4 = por %p96_p2, %p95_p1  ;;  %p2288_p6 = scmp.ge.s32.totalorder %s2980_s24, 1 }
  0x1f   : > { %3801 = sst [smem:[#allocation24_spill]] %s3115_s29  ;;  %p461_p7 = scmp.lt.s32.totalorder %s2980_s24, 3 }
  0x20   : > { %p3126_p8 = por %p3768_p5, %p101_p3  ;;  %s2982_s18 = smov [#allocation13]  }
  0x21   : > { %p3131_p10 = pnand %p2288_p6, %p461_p7  ;;  %s480_s19 = sshll.u32 %s2982_s18, 4  ;;  %s481_s19 = int_to_ptr.vmem [resolvable:$true] %s480_s19 }
  0x22   : > { %s3803_s0 = scalar_select %p3126_p8, 1, 0 }
  0x23   : > { %s3804_s17 = scalar_select %p3131_p10, 1, 0 }
  0x24   : > { %p2563_p11 = pneg %p3131_p10  ;;  %p2594_p12 = scmp.lt.s32.totalorder %s2980_s24, 2 }
  0x25   : > { %s3139_s20 = sand.u32 1, %s2976_s23   ;;  %s3148_s27 = sand.u32 1, %s2980_s24  }
  0x26   : > { %p3143_p13 = pnand %p2563_p11, %p3768_p5  ;;  %p3152_p0 = pnand %p2594_p12, %p3117_p4 }
  0x27   : > { %s2693_s18 = scalar_lea.vmem %s481_s19, 16  ;;  %s2700_s29 = scalar_lea.vmem %s481_s19, 32 }
  0x28   : > { %s3805_s21 = scalar_select %p3143_p13, 1, 0 }
  0x29   : > { %p3776_p1 = pneg %p3143_p13  ;;  %p2694_p2 = scmp.ne.s32.totalorder %s481_s19, %s2693_s18 }
  0x2a   : > { %p2701_p7 = scmp.lt.s32.totalorder %s481_s19, %s481_s19  ;;  %p2702_p11 = scmp.lt.s32.totalorder %s2700_s29, %s2693_s18 }
  0x2b   : > { %p2696_p3 = pnand %p2694_p2, %p3776_p1 }
  0x2c   : > { %p2703_p9 = por %p2702_p11, %p2701_p7 }
  0x2d   : > { %p2697_p6 = pneg %p2696_p3 }
  0x2f   : > { %p2704_p5 = pnand %p2703_p9, %p2697_p6 }
  0x31   : > { %2707 = shalt.err (!%p2704_p5)
}
  0x32   : > { %s3807_s14 = sld [smem:[#allocation35_spill]]  ;;  %s3167_s26 = sshll.u32 %s2980_s24, 4 }
  0x33   : > { %s3808_s6 = sld [smem:[#allocation31_spill]]  ;;  %s547_s18 = scalar_lea.vmem [#allocation4], %s3139_s20 }
  0x34   : > { %s554_s11 = sshll.u32 %s547_s18, 4  ;;  %p3181_p5 = pneg %p3152_p0  ;;  %s555_s11 = int_to_ptr.vmem [resolvable:$true] %s554_s11 }
  0x38   : > { %2566 = dma.hbm_to_vmem [thread:$0]  (!%p3143_p13), %s3807_s14, 16, %s481_s19, [#allocation14]  }
  0x39   : > { %s3173_s29 = scalar_lea.hbm %s3808_s6, %s3167_s26  ;;  %s2713_s14 = scalar_lea.hbm %s3808_s6, 32 }
  0x3a   : > { %s2708_s30 = scalar_lea.hbm %s3173_s29, 16  ;;  %p2714_p2 = scmp.lt.s32.totalorder %s3173_s29, %s3808_s6 }
  0x3b   : > { %p2709_p4 = scmp.ne.s32.totalorder %s3173_s29, %s2708_s30  ;;  %p2715_p3 = scmp.lt.s32.totalorder %s2713_s14, %s2708_s30 }
  0x3d   : > { %p2711_p9 = pnand %p3181_p5, %p2709_p4  ;;  %p2716_p6 = por %p2715_p3, %p2714_p2 }
  0x3f   : > { %p2712_p12 = pneg %p2711_p9 }
  0x41   : > { %p2717_p7 = pnand %p2716_p6, %p2712_p12 }
  0x43   : > { %2720 = shalt.err (!%p2717_p7)
}
  0x44   : > { %s2721_s18 = scalar_lea.vmem %s555_s11, 16  ;;  %s2983_s23 = smov [#allocation4]  }
  0x45   : > { %p2722_p11 = scmp.ne.s32.totalorder %s555_s11, %s2721_s18  ;;  %s2726_s5 = sshll.u32 %s2983_s23, 4  ;;  %s2727_s5 = int_to_ptr.vmem [resolvable:$false] %s2726_s5 }
  0x46   : > { %s2728_s4 = scalar_lea.vmem %s2727_s5, 32  ;;  %p2729_p4 = scmp.lt.s32.totalorder %s555_s11, %s2727_s5 }
  0x47   : > { %p2724_p1 = pnand %p2722_p11, %p3181_p5  ;;  %p2730_p9 = scmp.lt.s32.totalorder %s2728_s4, %s2721_s18 }
  0x49   : > { %p2725_p8 = pneg %p2724_p1  ;;  %p2731_p10 = por %p2730_p9, %p2729_p4 }
  0x4b   : > { %p2732_p13 = pnand %p2731_p10, %p2725_p8 }
  0x4d   : > { %2735 = shalt.err (!%p2732_p13)
}
  0x4e   : > { %s3810_s3 = scalar_lea.sflag [#allocation5], %s3148_s27  ;;  %s3781_s9 = sshll.u32 %s3139_s20, 8 }
  0x4f   : > { %2576 = dma.hbm_to_vmem [thread:$0]  (!%p3152_p0), %s3173_s29, 16, %s555_s11, %s3810_s3  }
  0x50   : > { %s2338_s14 = sshll.u32 %s2980_s24, 12  ;;  %s3811_s8 = sld [smem:[#allocation32_spill]] }
  0x51   : > { %s582_s30 = scalar_lea.vmem [#allocation7], %s3781_s9  ;;  %s3784_s16 = scalar_lea.sflag [#allocation8], %s3148_s27 }
  0x52   : > { %s589_s1 = sshll.u32 %s582_s30, 4  ;;  %s3212_s1 = int_to_ptr.vmem [resolvable:$true] %s589_s1 }
  0x56   : > { %s3208_s23 = scalar_lea.hbm %s3811_s8, %s2338_s14  ;;  %s2741_s3 = scalar_lea.hbm %s3811_s8, 8192 }
  0x57   : > { %s2736_s18 = scalar_lea.hbm %s3208_s23, 4096  ;;  %p2742_p1 = scmp.lt.s32.totalorder %s3208_s23, %s3811_s8 }
  0x58   : > { %p2737_p8 = scmp.ne.s32.totalorder %s3208_s23, %s2736_s18  ;;  %p2743_p12 = scmp.lt.s32.totalorder %s2741_s3, %s2736_s18 }
  0x5a   : > { %p2739_p10 = pnand %p2737_p8, %p3181_p5  ;;  %p2744_p2 = por %p2743_p12, %p2742_p1 }
  0x5c   : > { %p2740_p13 = pneg %p2739_p10 }
  0x5e   : > { %p2745_p3 = pnand %p2744_p2, %p2740_p13 }
  0x60   : > { %2748 = shalt.err (!%p2745_p3)
}
  0x61   : > { %s2749_s30 = scalar_lea.vmem %s3212_s1, 4096  ;;  %s2984_s9 = smov [#allocation7]  }
  0x62   : > { %p2750_p6 = scmp.ne.s32.totalorder %s3212_s1, %s2749_s30  ;;  %s2754_s11 = sshll.u32 %s2984_s9, 4  ;;  %s2755_s11 = int_to_ptr.vmem [resolvable:$false] %s2754_s11 }
  0x63   : > { %s2756_s29 = scalar_lea.vmem %s2755_s11, 8192  ;;  %p2757_p4 = scmp.lt.s32.totalorder %s3212_s1, %s2755_s11 }
  0x64   : > { %p2752_p7 = pnand %p2750_p6, %p3181_p5  ;;  %p2758_p9 = scmp.lt.s32.totalorder %s2756_s29, %s2749_s30 }
  0x66   : > { %p2753_p11 = pneg %p2752_p7  ;;  %p2759_p8 = por %p2758_p9, %p2757_p4 }
  0x68   : > { %p2760_p10 = pnand %p2759_p8, %p2753_p11 }
  0x6a   : > { %2763 = shalt.err (!%p2760_p10)
}
  0x6b   : > { %s2985_s18 = smov 256   ;;  %s2986_s3 = smov 16  }
  0x6c   : > { %2582 = dma.hbm_to_vmem [thread:$0]  (!%p3152_p0), %s3208_s23, 4096, %s3212_s1, %s3784_s16, %s2985_s18, %s2985_s18, %s2986_s3  }
  0x6d   : > { %s3242_s4 = scalar_lea.hbm %s3760_s10, %s2338_s14  ;;  %s3812_s30 = sshll.u32 %s3139_s20, 8 }
  0x6e   : > { %s610_s11 = scalar_lea.vmem [#allocation9], %s3812_s30  ;;  %s3252_s25 = scalar_lea.hbm %s3762_s12, %s3167_s26 }
  0x6f   : > { %s617_s29 = sshll.u32 %s610_s11, 4  ;;  %s636_s23 = scalar_lea.vmem [#allocation10], %s3139_s20  ;;  %s3246_s29 = int_to_ptr.vmem [resolvable:$true] %s617_s29 }
  0x70   : > { %s643_s1 = sshll.u32 %s636_s23, 4  ;;  %s3785_s18 = scalar_lea.sflag [#allocation11], %s3148_s27  ;;  %s644_s1 = int_to_ptr.vmem [resolvable:$true] %s643_s1 }
  0x71   : > { %s2764_s3 = scalar_lea.hbm %s3252_s25, 16  ;;  %s2769_s5 = scalar_lea.hbm %s3762_s12, 32 }
  0x72   : > { %p2765_p13 = scmp.ne.s32.totalorder %s3252_s25, %s2764_s3  ;;  %p2770_p2 = scmp.lt.s32.totalorder %s3252_s25, %s3762_s12 }
  0x73   : > { %p2771_p3 = scmp.lt.s32.totalorder %s2769_s5, %s2764_s3 }
  0x74   : > { %p2767_p1 = pnand %p2765_p13, %p3181_p5 }
  0x75   : > { %p2772_p6 = por %p2771_p3, %p2770_p2 }
  0x76   : > { %p2768_p12 = pneg %p2767_p1 }
  0x78   : > { %p2773_p7 = pnand %p2772_p6, %p2768_p12 }
  0x7a   : > { %2776 = shalt.err (!%p2773_p7)
}
  0x7b   : > { %s2777_s8 = scalar_lea.vmem %s644_s1, 16  ;;  %s2987_s11 = smov [#allocation10]  }
  0x7c   : > { %p2778_p11 = scmp.ne.s32.totalorder %s644_s1, %s2777_s8  ;;  %s2782_s23 = sshll.u32 %s2987_s11, 4  ;;  %s2783_s23 = int_to_ptr.vmem [resolvable:$false] %s2782_s23 }
  0x7d   : > { %s2784_s16 = scalar_lea.vmem %s2783_s23, 32  ;;  %p2785_p8 = scmp.lt.s32.totalorder %s644_s1, %s2783_s23 }
  0x7e   : > { %p2780_p4 = pnand %p2778_p11, %p3181_p5  ;;  %p2786_p10 = scmp.lt.s32.totalorder %s2784_s16, %s2777_s8 }
  0x80   : > { %p2781_p9 = pneg %p2780_p4  ;;  %p2787_p13 = por %p2786_p10, %p2785_p8 }
  0x82   : > { %p2788_p1 = pnand %p2787_p13, %p2781_p9 }
  0x84   : > { %2791 = shalt.err (!%p2788_p1)
}
  0x85   : > { %2588 = dma.hbm_to_vmem [thread:$0]  (!%p3152_p0), %s3252_s25, 16, %s644_s1, %s3785_s18  }
  0x86   : > { %s2988_s3 = smov [#allocation15]   ;;  %s2537_s9 = smul.u32 384, %s3139_s20 }
  0x87   : > { %s491_s14 = sshll.u32 %s2988_s3, 4  ;;  %p3813_p2 = scmp.ne.s32.totalorder %s3805_s21, 0  ;;  %s492_s14 = int_to_ptr.vmem [resolvable:$true] %s491_s14 }
  0x88   : > { %s2803_s5 = scalar_lea.vmem %s492_s14, 16  ;;  %s2810_s16 = scalar_lea.vmem %s492_s14, 32 }
  0x89   : > { %p2804_p12 = scmp.ne.s32.totalorder %s492_s14, %s2803_s5  ;;  %p3814_p3 = pneg %p3813_p2 }
  0x8a   : > { %p2811_p11 = scmp.lt.s32.totalorder %s492_s14, %s492_s14  ;;  %p2812_p4 = scmp.lt.s32.totalorder %s2810_s16, %s2803_s5 }
  0x8b   : > { %p2806_p6 = pnand %p2804_p12, %p3814_p3 }
  0x8c   : > { %p2813_p9 = por %p2812_p4, %p2811_p11 }
  0x8d   : > { %p2807_p7 = pneg %p2806_p6 }
  0x8f   : > { %p2814_p8 = pnand %p2813_p9, %p2807_p7 }
  0x91   : > { %2817 = shalt.err (!%p2814_p8)
}
  0x92   : > { %2569 = dma.hbm_to_vmem [thread:$0]  (!%p3813_p2), %s3765_s15, 16, %s492_s14, [#allocation14]  }
  0x93   : > { %s2538_s1 = smul.u32 6144, %s2980_s24  ;;  %s506_s6 = scalar_lea.vmem [#allocation2], %s2537_s9 }
  0x94   : > { %s513_s8 = sshll.u32 %s506_s6, 4  ;;  %s3815_s2 = sld [smem:[#allocation27_spill]]  ;;  %s3289_s8 = int_to_ptr.vmem [resolvable:$true] %s513_s8 }
  0x95   : > { %s503_s21 = scalar_lea.sflag [#allocation3], %s3139_s20 }
  0x9a   : > { %s3287_s3 = scalar_lea.hbm %s3815_s2, %s2538_s1  ;;  %s2823_s9 = scalar_lea.hbm %s3815_s2, 12288 }
  0x9b   : > { %s2818_s5 = scalar_lea.hbm %s3287_s3, 6144  ;;  %p2824_p12 = scmp.lt.s32.totalorder %s3287_s3, %s3815_s2 }
  0x9c   : > { %p2819_p10 = scmp.ne.s32.totalorder %s3287_s3, %s2818_s5  ;;  %p2825_p2 = scmp.lt.s32.totalorder %s2823_s9, %s2818_s5 }
  0x9e   : > { %p2821_p13 = pnand %p2819_p10, %p3181_p5  ;;  %p2826_p3 = por %p2825_p2, %p2824_p12 }
  0xa0   : > { %p2822_p1 = pneg %p2821_p13 }
  0xa2   : > { %p2827_p6 = pnand %p2826_p3, %p2822_p1 }
  0xa4   : > { %2830 = shalt.err (!%p2827_p6)
}
  0xa5   : > { %s2831_s25 = scalar_lea.vmem %s3289_s8, 6144  ;;  %s2989_s1 = smov [#allocation2]  }
  0xa6   : > { %p2832_p7 = scmp.ne.s32.totalorder %s3289_s8, %s2831_s25  ;;  %s2836_s6 = sshll.u32 %s2989_s1, 4  ;;  %s2837_s6 = int_to_ptr.vmem [resolvable:$false] %s2836_s6 }
  0xa7   : > { %s2838_s11 = scalar_lea.vmem %s2837_s6, 12288  ;;  %p2839_p9 = scmp.lt.s32.totalorder %s3289_s8, %s2837_s6 }
  0xa8   : > { %p2834_p11 = pnand %p2832_p7, %p3181_p5  ;;  %p2840_p8 = scmp.lt.s32.totalorder %s2838_s11, %s2831_s25 }
  0xaa   : > { %p2835_p4 = pneg %p2834_p11  ;;  %p2841_p10 = por %p2840_p8, %p2839_p9 }
  0xac   : > { %p2842_p13 = pnand %p2841_p10, %p2835_p4 }
  0xae   : > { %2845 = shalt.err (!%p2842_p13)
}
  0xaf   : > { %s2990_s23 = smov 384   ;;  %s2991_s5 = smov 24  }
  0xb0   : > { %2573 = dma.hbm_to_vmem [thread:$0]  (!%p3152_p0), %s3287_s3, 6144, %s3289_s8, %s503_s21, %s2990_s23, %s2990_s23, %s2991_s5  }
  0xb1   : > { %s569_s9 = scalar_lea.hbm %s3757_s7, %s3167_s26  ;;  %s564_s16 = scalar_lea.vmem [#allocation6], %s3139_s20 }
  0xb2   : > { %s571_s30 = sshll.u32 %s564_s16, 4  ;;  %s2846_s25 = scalar_lea.hbm %s569_s9, 16  ;;  %s572_s30 = int_to_ptr.vmem [resolvable:$true] %s571_s30 }
  0xb3   : > { %p2847_p1 = scmp.ne.s32.totalorder %s569_s9, %s2846_s25  ;;  %s2851_s11 = scalar_lea.hbm %s3757_s7, 32 }
  0xb4   : > { %p2852_p3 = scmp.lt.s32.totalorder %s569_s9, %s3757_s7  ;;  %p2853_p6 = scmp.lt.s32.totalorder %s2851_s11, %s2846_s25 }
  0xb5   : > { %p2849_p12 = pnand %p2847_p1, %p3181_p5 }
  0xb6   : > { %p2854_p7 = por %p2853_p6, %p2852_p3 }
  0xb7   : > { %p2850_p2 = pneg %p2849_p12 }
  0xb9   : > { %p2855_p11 = pnand %p2854_p7, %p2850_p2 }
  0xbb   : > { %2858 = shalt.err (!%p2855_p11)
}
  0xbc   : > { %s2859_s8 = scalar_lea.vmem %s572_s30, 16  ;;  %s2992_s3 = smov [#allocation6]  }
  0xbd   : > { %p2860_p4 = scmp.ne.s32.totalorder %s572_s30, %s2859_s8  ;;  %s2864_s21 = sshll.u32 %s2992_s3, 4  ;;  %s2865_s21 = int_to_ptr.vmem [resolvable:$false] %s2864_s21 }
  0xbe   : > { %s2866_s23 = scalar_lea.vmem %s2865_s21, 32  ;;  %p2867_p10 = scmp.lt.s32.totalorder %s572_s30, %s2865_s21 }
  0xbf   : > { %p2862_p9 = pnand %p2860_p4, %p3181_p5  ;;  %p2868_p13 = scmp.lt.s32.totalorder %s2866_s23, %s2859_s8 }
  0xc1   : > { %p2863_p8 = pneg %p2862_p9  ;;  %p2869_p1 = por %p2868_p13, %p2867_p10 }
  0xc3   : > { %p2870_p12 = pnand %p2869_p1, %p2863_p8 }
  0xc5   : > { %2873 = shalt.err (!%p2870_p12)
}
  0xc6   : > { %s3816_s2 = scalar_lea.sflag [#allocation5], %s3148_s27  ;;  %s2874_s18 = scalar_lea.hbm %s3242_s4, 4096 }
  0xc7   : > { %2579 = dma.hbm_to_vmem [thread:$0]  (!%p3152_p0), %s569_s9, 16, %s572_s30, %s3816_s2  }
  0xc8   : > { %p2875_p2 = scmp.ne.s32.totalorder %s3242_s4, %s2874_s18  ;;  %s2879_s24 = scalar_lea.hbm %s3760_s10, 8192 }
  0xc9   : > { %p2880_p7 = scmp.lt.s32.totalorder %s3242_s4, %s3760_s10  ;;  %p2881_p11 = scmp.lt.s32.totalorder %s2879_s24, %s2874_s18 }
  0xca   : > { %p2877_p3 = pnand %p2875_p2, %p3181_p5 }
  0xcb   : > { %p2882_p4 = por %p2881_p11, %p2880_p7 }
  0xcc   : > { %p2878_p6 = pneg %p2877_p3 }
  0xce   : > { %p2883_p9 = pnand %p2882_p4, %p2878_p6 }
  0xd0   : > { %2886 = shalt.err (!%p2883_p9)
}
  0xd1   : > { %s2887_s9 = scalar_lea.vmem %s3246_s29, 4096  ;;  %s2993_s30 = smov [#allocation9]  }
  0xd2   : > { %p2888_p8 = scmp.ne.s32.totalorder %s3246_s29, %s2887_s9  ;;  %s2892_s1 = sshll.u32 %s2993_s30, 4  ;;  %s2893_s1 = int_to_ptr.vmem [resolvable:$false] %s2892_s1 }
  0xd3   : > { %s2894_s6 = scalar_lea.vmem %s2893_s1, 8192  ;;  %p2895_p1 = scmp.lt.s32.totalorder %s3246_s29, %s2893_s1 }
  0xd4   : > { %p2890_p10 = pnand %p2888_p8, %p3181_p5  ;;  %p2896_p12 = scmp.lt.s32.totalorder %s2894_s6, %s2887_s9 }
  0xd6   : > { %p2891_p13 = pneg %p2890_p10  ;;  %p2897_p2 = por %p2896_p12, %p2895_p1 }
  0xd8   : > { %p2898_p3 = pnand %p2897_p2, %p2891_p13 }
  0xda   : > { %2901 = shalt.err (!%p2898_p3)
}
  0xdb   : > { %s2994_s11 = smov 128   ;;  %s2995_s8 = smov 8  }
  0xdc   : > { %s3817_s3 = scalar_lea.sflag [#allocation8], %s3148_s27  ;;  %s658_s2 = scalar_lea.hbm %s3763_s13, %s3167_s26 }
  0xdd   : > { %2585 = dma.hbm_to_vmem [thread:$0]  (!%p3152_p0), %s3242_s4, 4096, %s3246_s29, %s3817_s3, %s2994_s11, %s2994_s11, %s2995_s8  }
  0xde   : > { %s653_s18 = scalar_lea.vmem [#allocation12], %s3139_s20  ;;  %s2902_s14 = scalar_lea.hbm %s658_s2, 16 }
  0xdf   : > { %s660_s5 = sshll.u32 %s653_s18, 4  ;;  %p2903_p6 = scmp.ne.s32.totalorder %s658_s2, %s2902_s14  ;;  %s661_s5 = int_to_ptr.vmem [resolvable:$true] %s660_s5 }
  0xe0   : > { %s2907_s25 = scalar_lea.hbm %s3763_s13, 32  ;;  %p2908_p4 = scmp.lt.s32.totalorder %s658_s2, %s3763_s13 }
  0xe1   : > { %p2905_p7 = pnand %p2903_p6, %p3181_p5  ;;  %p2909_p9 = scmp.lt.s32.totalorder %s2907_s25, %s2902_s14 }
  0xe3   : > { %p2906_p11 = pneg %p2905_p7  ;;  %p2910_p8 = por %p2909_p9, %p2908_p4 }
  0xe5   : > { %p2911_p10 = pnand %p2910_p8, %p2906_p11 }
  0xe7   : > { %2914 = shalt.err (!%p2911_p10)
}
  0xe8   : > { %s2915_s26 = scalar_lea.vmem %s661_s5, 16  ;;  %s2996_s20 = smov [#allocation12]  }
  0xe9   : > { %p2916_p13 = scmp.ne.s32.totalorder %s661_s5, %s2915_s26  ;;  %s2920_s4 = sshll.u32 %s2996_s20, 4  ;;  %s2921_s4 = int_to_ptr.vmem [resolvable:$false] %s2920_s4 }
  0xea   : > { %s2922_s29 = scalar_lea.vmem %s2921_s4, 32  ;;  %p2923_p2 = scmp.lt.s32.totalorder %s661_s5, %s2921_s4 }
  0xeb   : > { %p2918_p1 = pnand %p2916_p13, %p3181_p5  ;;  %p2924_p3 = scmp.lt.s32.totalorder %s2922_s29, %s2915_s26 }
  0xed   : > { %p2919_p12 = pneg %p2918_p1  ;;  %p2925_p6 = por %p2924_p3, %p2923_p2 }
  0xef   : > { %p2926_p7 = pnand %p2925_p6, %p2919_p12 }
  0xf1   : > { %2929 = shalt.err (!%p2926_p7)
}
  0xf2   : > { %s3818_s1 = scalar_lea.sflag [#allocation11], %s3148_s27  ;;  %p3819_p11 = scmp.ne.s32.totalorder %s3804_s17, 0 }
  0xf3   : > { %2591 = dma.hbm_to_vmem [thread:$0]  (!%p3152_p0), %s658_s2, 16, %s661_s5, %s3818_s1  }
  0xf4   : > { %669 = sbr.rel (%p3819_p11) target bundleno = 3284 (0xcd4), region = 84  ;;  %s3377_s19 = sand.u32 (!%p3819_p11), 1, %s2972_s22  }
  0xf5   : > { %s2539_s6 = smul.u32 (!%p3819_p11), 384, %s3377_s19  ;;  %s672_s11 = scalar_lea.sflag (!%p3819_p11), [#allocation3], %s3377_s19 }
  0xf6   : > { %p3820_p5 = scmp.ne.s32.totalorder (!%p3819_p11), %s3803_s0, 0 }
  0xf7   : > { %s3381_s8 = scalar_lea.vmem (!%p3819_p11), [#allocation2], %s2539_s6 }
  0xf9   : > { %2947 = dma.done.wait (%p3820_p5), %s672_s11, 6144  }
  0xfa   : > { %2949 = vsyncadd (%p3820_p5), %s672_s11, 4294961152  ;;  %s3821_s27 = sld [smem:[#allocation22_spill]]  ;;  %s683_s3 = scalar_lea.vmem [#allocation4], %s3377_s19 }
 0x100   : > { %s680_s17 = sand.u32 1, %s3821_s27  }
 0x101   : > { %s681_s28 = scalar_lea.sflag [#allocation5], %s680_s17 }
 0x102   : > { %2951 = dma.done.wait (%p3820_p5), %s681_s28, 32  }
 0x103   : > { %2953 = vsyncadd (%p3820_p5), %s681_s28, 4294967264  ;;  %s2304_s21 = sshll.u32 %s3377_s19, 8  ;;  %s691_s23 = scalar_lea.vmem [#allocation6], %s3377_s19 }
 0x104   : > { %s697_s2 = scalar_lea.sflag [#allocation8], %s680_s17  ;;  %s3395_s18 = scalar_lea.vmem [#allocation7], %s2304_s21 }
 0x105   : > { %2955 = dma.done.wait (%p3820_p5), %s697_s2, 8192  }
 0x106   : > { %2957 = vsyncadd (%p3820_p5), %s697_s2, 4294959104  ;;  %s3401_s5 = scalar_lea.vmem [#allocation9], %s2304_s21  ;;  %s715_s14 = scalar_lea.sflag [#allocation11], %s680_s17 }
 0x107   : > { %s717_s24 = scalar_lea.vmem [#allocation10], %s3377_s19 }
 0x108   : > { %2959 = dma.done.wait (%p3820_p5), %s715_s14, 32  }
 0x109   : > { %2961 = vsyncadd (%p3820_p5), %s715_s14, 4294967264  ;;  %p3822_p0 = scmp.eq.s32.totalorder %s3821_s27, 0 }
 0x10b   : > { %2963 = dma.done.wait (%p3822_p0), [#allocation14], 32   ;;  %p3823_p4 = pmov %p3822_p0 }
 0x10c   : > { %p822_p9 = scmp.lt.s32.totalorder %s3821_s27, 1  ;;  %v841_v0 = vlaneseq  ;;  %s3824_s20 = sld [smem:[#allocation29_spill]]  ;;  %v2997_v2 = vmov 0.0  }
 0x10d   : > { %2965 = vsyncadd (%p3823_p4), [#allocation14], 4294967264  ;;  %s3825_s6 = sld [smem:[#allocation30_spill]]  ;;  %p3829_p8 = scmp.ne.s32.totalorder %s3821_s27, 0 }
 0x10e   : > { %s3415_s25 = scalar_select %p822_p9, %s3821_s27, 1  ;;  %v842_v1 = vand.u32 127, %v841_v0 }
 0x10f   : > { %s3826_s21 = sld [smem:[#allocation28_spill]] }
 0x110   : > { %s2540_s0 = smul.u32 3, %s3415_s25  ;;  %s2340_s9 = sshll.u32 %s3415_s25, 7  ;;  %vm844_vm0 = vcmp.ge.s32.totalorder %v842_v1, 32  ;;  %vm845_vm1 = vcmp.ge.s32.totalorder %v842_v1, 64  ;;  %vm846_vm2 = vcmp.ge.s32.totalorder %v842_v1, 96  ;;  %vm847_vm3 = vcmp.lt.s32.totalorder %v842_v1, 32 }
 0x111   : > { %vm848_vm4 = vcmp.lt.s32.totalorder %v842_v1, 64  ;;  %vm849_vm5 = vcmp.lt.s32.totalorder %v842_v1, 96  ;;  %v3430_v3 = vsel %vm847_vm3, 1.0, %v2997_v2  ;;  %v3433_v4 = vsel %vm846_vm2, 1.0, %v2997_v2  ;;  %s2310_s14 = sshll.u32 %s3415_s25, 1  ;;  %s3827_s26 = sld [smem:[#allocation33_spill]] }
 0x112   : > { %s3423_s4 = scalar_lea.vmem %s3824_s20, %s2340_s9  ;;  %vm852_vm6 = vmand %vm844_vm0, %vm848_vm4  ;;  %s3830_s28 = sld [smem:[#allocation25_spill]] (!%p3829_p8) }
 0x113   : > { %s833_s11 = scalar_lea.vmem %s3825_s6, %s3415_s25  ;;  %s3828_s6 = sld [smem:[#allocation34_spill]]  ;;  %vm853_vm7 = vmand %vm845_vm1, %vm849_vm5  ;;  %v3452_v5 = vsel %vm852_vm6, 1.0, %v2997_v2 }
 0x114   : > { %v3455_v6 = vsel %vm853_vm7, 1.0, %v2997_v2 }
 0x115   : > { %s3438_s2 = scalar_lea.vmem %s3826_s21, %s2540_s0  ;;  %866 = sbr.rel (%p3829_p8) target bundleno = 286 (0x11e), region = 124 }
 0x117   : > { %s3444_s20 = scalar_lea.vmem %s3827_s26, %s2310_s14  ;;  %s3831_s26 = sld [smem:[#allocation36_spill]] (!%p3829_p8) }
 0x119   : > { %s840_s16 = scalar_lea.vmem %s3828_s6, %s3415_s25 }
 0x11a   : > { %v867_v7 = vld [vmem:[%s3830_s28] sm:$0xff]  ;;  %v868_v8 = vld [vmem:[%s3830_s28 + $0x8] sm:$0xff] }
 0x11d   : > { %869 = vst [vmem:[%s3831_s26] sm:$0xff] %v867_v7  ;;  %870 = vst [vmem:[%s3831_s26 + $0x8] sm:$0xff] %v868_v8 }
 0x11e PF: > { %v919_v9 = vld [vmem:[%s3381_s8 + $0x170] sm:$0xff]  ;;  %v918_v10 = vld [vmem:[%s3381_s8 + $0x168] sm:$0xff]  ;;  %v916_v11 = vld [vmem:[%s3381_s8 + $0x158] sm:$0xff]  ;;  %1002 = vmatprep.mubr.f32.mxu0 %v2997_v2  ;;  %s3832_s0 = sld [smem:[#allocation36_spill]]  ;;  %v3536_v59 = vshrl.u32 %v841_v0, 7  ;;  %vm1190_vm8 = vcmask 64512  }
 0x11f   : > { %938 = vmatprep.subr.mxu0 %v919_v9  ;;  %v915_v12 = vld [vmem:[%s3381_s8 + $0x150] sm:$0xff]  ;;  %v913_v13 = vld [vmem:[%s3381_s8 + $0x140] sm:$0xff]  ;;  %v912_v14 = vld [vmem:[%s3381_s8 + $0x138] sm:$0xff]  ;;  %s3833_s14 = sld [smem:[#allocation26_spill]] }
 0x120   : > { %939 = vmatpush1.msra.mxu0 %v918_v10  ;;  %v910_v15 = vld [vmem:[%s3381_s8 + $0x128] sm:$0xff]  ;;  %v909_v16 = vld [vmem:[%s3381_s8 + $0x120] sm:$0xff]  ;;  %v907_v17 = vld [vmem:[%s3381_s8 + $0x110] sm:$0xff]  ;;  %v925_v60 = vsub.s32 0, %v3536_v59  ;;  %v929_v62 = vsub.s32 1, %v3536_v59  ;;  %s3837_s1 = sld [smem:[#allocation22_spill]] }
 0x121   : > { %940 = vmatprep.subr.mxu0 %v916_v11  ;;  %v906_v18 = vld [vmem:[%s3381_s8 + $0x108] sm:$0xff]  ;;  %v904_v19 = vld [vmem:[%s3381_s8 + $0xf8] sm:$0xff]  ;;  %v903_v20 = vld [vmem:[%s3381_s8 + $0xf0] sm:$0xff] }
 0x122   : > { %941 = vmatpush1.msra.mxu0 %v915_v12  ;;  %v901_v21 = vld [vmem:[%s3381_s8 + $0xe0] sm:$0xff]  ;;  %v900_v23 = vld [vmem:[%s3381_s8 + $0xd8] sm:$0xff]  ;;  %v898_v26 = vld [vmem:[%s3381_s8 + $0xc8] sm:$0xff] }
 0x123   : > { %942 = vmatprep.subr.mxu0 %v913_v13  ;;  %v920_v24 = vld [vmem:[%s3381_s8 + $0x178] sm:$0xff]  ;;  %v917_v25 = vld [vmem:[%s3381_s8 + $0x160] sm:$0xff]  ;;  %v914_v28 = vld [vmem:[%s3381_s8 + $0x148] sm:$0xff] }
 0x124   : > { %943 = vmatpush1.msra.mxu0 %v912_v14  ;;  %v3488_v22 = vld [vmem:[%s3832_s0] sm:$0xff]  ;;  %2435 = vmatprep.subr.mxu1 %v920_v24  ;;  %v895_v29 = vld [vmem:[%s3381_s8 + $0xb0] sm:$0xff]  ;;  %v894_v30 = vld [vmem:[%s3381_s8 + $0xa8] sm:$0xff]  ;;  %v933_v14 = vsub.s32 2, %v3536_v59 }
 0x125   : > { %944 = vmatprep.subr.mxu0 %v910_v15  ;;  %2467 = vmatprep.mubr.f32.mxu1 %v3488_v22  ;;  %v897_v27 = vld [vmem:[%s3381_s8 + $0xc0] sm:$0xff]  ;;  %v911_v31 = vld [vmem:[%s3381_s8 + $0x130] sm:$0xff]  ;;  %v892_v32 = vld [vmem:[%s3381_s8 + $0x98] sm:$0xff] }
 0x126   : > { %945 = vmatpush1.msra.mxu0 %v909_v16  ;;  %2436 = vmatpush3.msra.mxu1 %v920_v24  ;;  %v891_v33 = vld [vmem:[%s3381_s8 + $0x90] sm:$0xff]  ;;  %v908_v34 = vld [vmem:[%s3381_s8 + $0x118] sm:$0xff]  ;;  %v889_v35 = vld [vmem:[%s3381_s8 + $0x80] sm:$0xff]  ;;  %p2333_p10 = scmp.ne.s32.totalorder %s3837_s1, 1 }
 0x127   : > { %946 = vmatprep.subr.mxu0 %v907_v17  ;;  %2437 = vmatprep.subr.mxu1 %v917_v25  ;;  %v888_v36 = vld [vmem:[%s3381_s8 + $0x78] sm:$0xff]  ;;  %v905_v37 = vld [vmem:[%s3381_s8 + $0x100] sm:$0xff]  ;;  %v886_v38 = vld [vmem:[%s3381_s8 + $0x68] sm:$0xff]  ;;  %s3838_s27 = sld [smem:[#allocation36_spill]] (!%p2333_p10) }
 0x128   : > { %947 = vmatpush1.msra.mxu0 %v906_v18  ;;  %2438 = vmatpush3.msra.mxu1 %v917_v25  ;;  %v885_v39 = vld [vmem:[%s3381_s8 + $0x60] sm:$0xff]  ;;  %v902_v40 = vld [vmem:[%s3381_s8 + $0xe8] sm:$0xff]  ;;  %v883_v41 = vld [vmem:[%s3381_s8 + $0x50] sm:$0xff] }
 0x129   : > { %948 = vmatprep.subr.mxu0 %v904_v19  ;;  %2439 = vmatprep.subr.mxu1 %v914_v28  ;;  %v882_v42 = vld [vmem:[%s3381_s8 + $0x48] sm:$0xff]  ;;  %v899_v43 = vld [vmem:[%s3381_s8 + $0xd0] sm:$0xff]  ;;  %v880_v44 = vld [vmem:[%s3381_s8 + $0x38] sm:$0xff] }
 0x12a   : > { %949 = vmatpush1.msra.mxu0 %v903_v20  ;;  %2440 = vmatpush3.msra.mxu1 %v914_v28  ;;  %v879_v45 = vld [vmem:[%s3381_s8 + $0x30] sm:$0xff]  ;;  %v896_v46 = vld [vmem:[%s3381_s8 + $0xb8] sm:$0xff]  ;;  %v877_v47 = vld [vmem:[%s3381_s8 + $0x20] sm:$0xff] }
 0x12b   : > { %950 = vmatprep.subr.mxu0 %v901_v21  ;;  %2441 = vmatprep.subr.mxu1 %v911_v31  ;;  %v876_v48 = vld [vmem:[%s3381_s8 + $0x18] sm:$0xff]  ;;  %v893_v49 = vld [vmem:[%s3381_s8 + $0xa0] sm:$0xff]  ;;  %v874_v50 = vld [vmem:[%s3381_s8 + $0x8] sm:$0xff] }
 0x12c   : > { %951 = vmatpush1.msra.mxu0 %v900_v23  ;;  %2442 = vmatpush3.msra.mxu1 %v911_v31  ;;  %v873_v51 = vld [vmem:[%s3381_s8] sm:$0xff]  ;;  %v890_v52 = vld [vmem:[%s3381_s8 + $0x88] sm:$0xff]  ;;  %v887_v53 = vld [vmem:[%s3381_s8 + $0x70] sm:$0xff] }
 0x12d   : > { %952 = vmatprep.subr.mxu0 %v898_v26  ;;  %2443 = vmatprep.subr.mxu1 %v908_v34  ;;  %v884_v54 = vld [vmem:[%s3381_s8 + $0x58] sm:$0xff]  ;;  %v881_v55 = vld [vmem:[%s3381_s8 + $0x40] sm:$0xff]  ;;  %v878_v56 = vld [vmem:[%s3381_s8 + $0x28] sm:$0xff] }
 0x12e   : > { %953 = vmatpush1.msra.mxu0 %v897_v27  ;;  %2444 = vmatpush3.msra.mxu1 %v908_v34  ;;  %v875_v57 = vld [vmem:[%s3381_s8 + $0x10] sm:$0xff]  ;;  %v3531_v58 = vld [vmem:[%s3832_s0 + $0x8] sm:$0xff]  ;;  %v921_v61 = vld [vmem:[%s3438_s2] sm:$0x7] }
 0x12f   : > { %954 = vmatprep.subr.mxu0 %v895_v29  ;;  %2445 = vmatprep.subr.mxu1 %v905_v37  ;;  %v3543_v63 = vrot.slane %v921_v61, %v925_v60  ;;  %v930_v1 = vrot.slane %v921_v61, %v929_v62  ;;  %v934_v15 = vrot.slane %v921_v61, %v933_v14  ;;  %v2316_v25 = vld [vmem:[%s3833_s14] ss:$0 sm:$0xff] }
 0x130   : > { %955 = vmatpush1.msra.mxu0 %v894_v30  ;;  %2446 = vmatpush3.msra.mxu1 %v905_v37  ;;  %v2330_v59 = vld [vmem:[%s840_s16] ss:$0 sm:$0xff] }
 0x131   : > { %956 = vmatprep.subr.mxu0 %v892_v32  ;;  %2447 = vmatprep.subr.mxu1 %v902_v40 }
 0x132   : > { %957 = vmatpush1.msra.mxu0 %v891_v33  ;;  %2448 = vmatpush3.msra.mxu1 %v902_v40 }
 0x133   : > { %958 = vmatprep.subr.mxu0 %v889_v35  ;;  %2449 = vmatprep.subr.mxu1 %v899_v43 }
 0x134   : > { %959 = vmatpush1.msra.mxu0 %v888_v36  ;;  %2450 = vmatpush3.msra.mxu1 %v899_v43 }
 0x135   : > { %960 = vmatprep.subr.mxu0 %v886_v38  ;;  %2451 = vmatprep.subr.mxu1 %v896_v46 }
 0x136   : > { %961 = vmatpush1.msra.mxu0 %v885_v39  ;;  %2452 = vmatpush3.msra.mxu1 %v896_v46 }
 0x137   : > { %962 = vmatprep.subr.mxu0 %v883_v41  ;;  %2453 = vmatprep.subr.mxu1 %v893_v49 }
 0x138   : > { %963 = vmatpush1.msra.mxu0 %v882_v42  ;;  %2454 = vmatpush3.msra.mxu1 %v893_v49 }
 0x139   : > { %964 = vmatprep.subr.mxu0 %v880_v44  ;;  %2455 = vmatprep.subr.mxu1 %v890_v52 }
 0x13a   : > { %965 = vmatpush1.msra.mxu0 %v879_v45  ;;  %2456 = vmatpush3.msra.mxu1 %v890_v52 }
 0x13b   : > { %966 = vmatprep.subr.mxu0 %v877_v47  ;;  %2457 = vmatprep.subr.mxu1 %v887_v53 }
 0x13c   : > { %967 = vmatpush1.msra.mxu0 %v876_v48  ;;  %2458 = vmatpush3.msra.mxu1 %v887_v53 }
 0x13d   : > { %968 = vmatprep.subr.mxu0 %v874_v50  ;;  %2459 = vmatprep.subr.mxu1 %v884_v54 }
 0x13e   : > { %969 = vmatpush1.msra.mxu0 %v873_v51  ;;  %2460 = vmatpush3.msra.mxu1 %v884_v54 }
 0x13f   : > { %1003 = vmatmul.mubr.f32.vlgmr.msra.gmra.mxu0 %v3488_v22  ;;  %2461 = vmatprep.subr.mxu1 %v881_v55 }
 0x140   : > { %1008 = vmatprep.mubr.f32.mxu0 %v2997_v2  ;;  %2462 = vmatpush3.msra.mxu1 %v881_v55 }
 0x141   : > { %2463 = vmatprep.subr.mxu1 %v878_v56 }
 0x142   : > { %2464 = vmatpush3.msra.mxu1 %v878_v56 }
 0x143   : > { %2465 = vmatprep.subr.mxu1 %v875_v57  ;;  %1009 = vmatmul.mubr.f32.gmra.mxu0 %v3531_v58 }
 0x144   : > { %2466 = vmatpush3.msra.mxu1 %v875_v57 }
 0x145   : > { %2468 = vmatmul.mubr.f32.vlgmr.msra.gmra.mxu1 %v3531_v58 }
 0x1ff   : > { %v1004_v7 = vpop.f32.mrf.mxu0 }
 0x200   : > { %v1005_v8 = vadd.f32 %v1004_v7, %v3543_v63 }
 0x201   : > { %v1006_v9 = vpop.f32.mrf.mxu0 }
 0x202   : > { %v1007_v10 = vadd.f32 %v1006_v9, %v930_v1  ;;  %v1091_v0 = vmul.f32 %v3430_v3, %v1005_v8  ;;  %v1092_v11 = vmul.f32 %v3452_v5, %v1005_v8  ;;  %v1093_v12 = vmul.f32 %v3455_v6, %v1005_v8 }
 0x203   : > { %v1094_v13 = vmul.f32 %v3433_v4, %v1005_v8  ;;  %v3553_v16 = vpop.f32.mrf.mxu0 }
 0x204   : > { %2470 = vmatprep.subr.mxu0 %v1007_v10  ;;  %2472 = vmatprep.mubr.f32.mxu0 %v1091_v0 }
 0x205   : > { %2471 = vmatpush3.xpose.msra.mxu0 %v1007_v10  ;;  %v2469_v17 = vpop.f32.mrf.mxu1  ;;  %v1012_v19 = vpop.f32.mrf.mxu0 }
 0x206   : > { %v3555_v18 = vadd.f32 %v2469_v17, %v934_v15  ;;  %v3557_v21 = vadd.f32 %v1012_v19, %v930_v1 }
 0x207   : > { %v1081_v20 = vpop.f32.mrf.mxu1 }
 0x208   : > { %2473 = vmatmul.mubr.f32.vlgmr.msra.gmra.mxu0 %v1092_v11  ;;  %v1082_v23 = vadd.f32 %v1081_v20, %v934_v15 }
 0x209   : > { %2475 = vmatprep.mubr.f32.mxu0 %v1093_v12  ;;  %v1011_v12 = vadd.f32 %v3553_v16, %v3543_v63 }
 0x20a   : > { %2478 = vmatprep.subr.mxu0 %v1082_v23 }
 0x20b   : > { %2479 = vmatpush3.msra.mxu0 %v1082_v23  ;;  %v1341_v17 = vmul.f32 %v3430_v3, %v1011_v12  ;;  %v1342_v19 = vmul.f32 %v3452_v5, %v1011_v12  ;;  %v1343_v63 = vmul.f32 %v3455_v6, %v1011_v12  ;;  %v1344_v16 = vmul.f32 %v3433_v4, %v1011_v12  ;;  %v1601_v12 = vld [vmem:[%s3423_s4 + $0x68] sm:$0xff] }
 0x20c   : > { %2476 = vmatmul.mubr.f32.gmra.mxu0 %v1094_v13  ;;  %2486 = vmatprep.subr.mxu0 %v3557_v21 }
 0x2c8   : > { %v2474_v24 = vpop.f32.mrf.mxu0 }
 0x2c9   : > { %v1187_v29 = vadd.f32 %v2474_v24, %v2316_v25 }
 0x2ca   : > { %v1161_v26 = vpop.f32.mrf.mxu0 }
 0x2cb   : > { %v1186_v27 = vadd.f32 %v2316_v25, %v1161_v26  ;;  %v1194_v34 = vsel %vm1190_vm8, %v1187_v29, -inf }
 0x2cc   : > { %v2477_v28 = vpop.f32.mrf.mxu0 }
 0x2cd   : > { %v1191_v30 = vsel %vm1190_vm8, %v1186_v27, -inf  ;;  %v1189_v33 = vadd.f32 %v2477_v28, %v2316_v25 }
 0x2ce   : > { %1192 = vmax.xlane.f32.xlu0 %v1191_v30  ;;  %v1171_v31 = vpop.f32.mrf.mxu0 }
 0x2cf   : > { %v1188_v32 = vadd.f32 %v2316_v25, %v1171_v31  ;;  %v1200_v36 = vsel %vm1190_vm8, %v1189_v33, -inf }
 0x2d1   : > { %v1197_v35 = vsel %vm1190_vm8, %v1188_v32, -inf }
 0x2d2   : > { %1195 = vmax.xlane.f32.xlu0 %v1194_v34  ;;  %1198 = vmax.xlane.f32.xlu1 %v1197_v35 }
 0x2d6   : > { %1201 = vmax.xlane.f32.xlu1 %v1200_v36 }
 0x357   : > { %v1193_v37 = vpop.xlane.xlu0 %1192 }
 0x358   : > { %v1203_v38 = vsub.f32 %v1186_v27, %v1193_v37  ;;  %v2322_v27 = vld [vmem:[%s3833_s14 + $0x1] ss:$0 sm:$0xff] }
 0x35a   : > { %v1207_v39 = vmul.f32 1.442695, %v1203_v38 }
 0x35b   : > { %v1196_v40 = vpop.xlane.xlu0 %1195  ;;  %v1199_v41 = vpop.xlane.xlu1 %1198 }
 0x35c   : > { %2638 = vpow2.f32 %v1207_v39  ;;  %v1204_v42 = vsub.f32 %v1187_v29, %v1196_v40  ;;  %v1205_v43 = vsub.f32 %v1188_v32, %v1199_v41 }
 0x35e   : > { %v1209_v44 = vmul.f32 1.442695, %v1204_v42  ;;  %v1211_v45 = vmul.f32 1.442695, %v1205_v43 }
 0x35f   : > { %v1202_v46 = vpop.xlane.xlu1 %1201 }
 0x360   : > { %2640 = vpow2.f32 %v1209_v44  ;;  %v1206_v47 = vsub.f32 %v1189_v33, %v1202_v46 }
 0x361   : > { %2642 = vpow2.f32 %v1211_v45 }
 0x362   : > { %v1213_v48 = vmul.f32 1.442695, %v1206_v47 }
 0x364   : > { %2644 = vpow2.f32 %v1213_v48 }
 0x369   : > { %v2639_v49 = vpop.eup %2638 }
 0x36a   : > { %v1215_v50 = vsel %vm1190_vm8, %v2639_v49, 0.0 }
 0x36b   : > { %1216 = vadd.xlane.f32.xlu0 %v1215_v50 }
 0x36d   : > { %v2641_v51 = vpop.eup %2640 }
 0x36e   : > { %v2643_v52 = vpop.eup %2642  ;;  %v1218_v53 = vsel %vm1190_vm8, %v2641_v51, 0.0 }
 0x36f   : > { %1219 = vadd.xlane.f32.xlu1 %v1218_v53  ;;  %v1221_v54 = vsel %vm1190_vm8, %v2643_v52, 0.0 }
 0x370   : > { %1222 = vadd.xlane.f32.xlu0 %v1221_v54 }
 0x371   : > { %v2645_v55 = vpop.eup %2644 }
 0x372   : > { %v1224_v56 = vsel %vm1190_vm8, %v2645_v55, 0.0 }
 0x373   : > { %1225 = vadd.xlane.f32.xlu1 %v1224_v56 }
 0x3f4   : > { %v1217_v57 = vpop.xlane.xlu0 %1216 }
 0x3f5   : > { %2646 = vrcp.f32 %v1217_v57 }
 0x3f8   : > { %v1220_v61 = vpop.xlane.xlu1 %1219 }
 0x3f9   : > { %v1223_v1 = vpop.xlane.xlu0 %1222  ;;  %2648 = vrcp.f32 %v1220_v61 }
 0x3fa   : > { %2650 = vrcp.f32 %v1223_v1 }
 0x3fc   : > { %v1226_v7 = vpop.xlane.xlu1 %1225 }
 0x3fd   : > { %2652 = vrcp.f32 %v1226_v7 }
 0x402   : > { %v2647_v8 = vpop.eup %2646 }
 0x403   : > { %v1228_v9 = vmul.f32 %v2647_v8, %v2639_v49 }
 0x405   : > { %2480 = vmatprep.mubr.msk.f32.mxu0 %vm1190_vm8, %v1228_v9 }
 0x406   : > { %v2649_v10 = vpop.eup %2648 }
 0x407   : > { %v2651_v0 = vpop.eup %2650  ;;  %v1230_v11 = vmul.f32 %v2649_v10, %v2641_v51 }
 0x408   : > { %v1232_v13 = vmul.f32 %v2651_v0, %v2643_v52  ;;  %v1603_v0 = vld [vmem:[%s3423_s4 + $0x78] sm:$0xff] }
 0x409   : > { %2481 = vmatmul.mubr.msk.f32.vlgmr.msra.gmra.mxu0 %vm1190_vm8, %v1230_v11  ;;  %v1602_v11 = vld [vmem:[%s3423_s4 + $0x70] sm:$0xff]  ;;  %2502 = vmatprep.subr.mxu1 %v1603_v0 }
 0x40a   : > { %v2653_v14 = vpop.eup %2652  ;;  %2487 = vmatpush3.xpose.msra.mxu0 %v3557_v21  ;;  %2483 = vmatprep.mubr.msk.f32.mxu0 %vm1190_vm8, %v1232_v13  ;;  %v1600_v13 = vld [vmem:[%s3423_s4 + $0x60] sm:$0xff] }
 0x40b   : > { %2494 = vmatprep.subr.mxu0 %v3555_v18  ;;  %v1234_v15 = vmul.f32 %v2653_v14, %v2645_v55  ;;  %2503 = vmatpush3.msra.mxu1 %v1603_v0  ;;  %v1599_v14 = vld [vmem:[%s3423_s4 + $0x58] sm:$0xff]  ;;  %v1754_v0 = vld [vmem:[%s3395_s18 + $0xc8] sm:$0xff] }
 0x40c   : > { %2504 = vmatprep.subr.mxu1 %v1602_v11 }
 0x40d   : > { %2484 = vmatmul.mubr.msk.f32.gmra.mxu0 %vm1190_vm8, %v1234_v15  ;;  %2505 = vmatpush3.msra.mxu1 %v1602_v11  ;;  %v1598_v15 = vld [vmem:[%s3423_s4 + $0x50] sm:$0xff]  ;;  %v1753_v11 = vld [vmem:[%s3395_s18 + $0xc0] sm:$0xff] }
 0x40e   : > { %2488 = vmatprep.mubr.f32.mxu0 %v1341_v17  ;;  %2506 = vmatprep.subr.mxu1 %v1601_v12  ;;  %v1597_v17 = vld [vmem:[%s3423_s4 + $0x48] sm:$0xff] }
 0x40f   : > { %2507 = vmatpush3.msra.mxu1 %v1601_v12  ;;  %v1752_v12 = vld [vmem:[%s3395_s18 + $0xb8] sm:$0xff] }
 0x410   : > { %2508 = vmatprep.subr.mxu1 %v1600_v13 }
 0x411   : > { %2489 = vmatmul.mubr.f32.vlgmr.msra.gmra.mxu0 %v1342_v19  ;;  %2509 = vmatpush3.msra.mxu1 %v1600_v13  ;;  %v1596_v19 = vld [vmem:[%s3423_s4 + $0x40] sm:$0xff]  ;;  %v1751_v13 = vld [vmem:[%s3395_s18 + $0xb0] sm:$0xff] }
 0x412   : > { %2495 = vmatpush3.msra.mxu0 %v3555_v18  ;;  %2491 = vmatprep.mubr.f32.mxu0 %v1343_v63  ;;  %v1595_v63 = vld [vmem:[%s3423_s4 + $0x38] sm:$0xff] }
 0x413   : > { %2510 = vmatprep.subr.mxu1 %v1599_v14 }
 0x414   : > { %2511 = vmatpush3.msra.mxu1 %v1599_v14  ;;  %v1750_v14 = vld [vmem:[%s3395_s18 + $0xa8] sm:$0xff] }
 0x415   : > { %2492 = vmatmul.mubr.f32.gmra.mxu0 %v1344_v16  ;;  %2512 = vmatprep.subr.mxu1 %v1598_v15  ;;  %v1594_v16 = vld [vmem:[%s3423_s4 + $0x30] sm:$0xff] }
 0x416   : > { %2513 = vmatpush3.msra.mxu1 %v1598_v15  ;;  %v1749_v15 = vld [vmem:[%s3395_s18 + $0xa0] sm:$0xff] }
 0x417   : > { %2514 = vmatprep.subr.mxu1 %v1597_v17 }
 0x418   : > { %2515 = vmatpush3.msra.mxu1 %v1597_v17  ;;  %v1748_v17 = vld [vmem:[%s3395_s18 + $0x98] sm:$0xff] }
 0x419   : > { %2516 = vmatprep.subr.mxu1 %v1596_v19 }
 0x41a   : > { %2517 = vmatpush3.msra.mxu1 %v1596_v19  ;;  %v1747_v19 = vld [vmem:[%s3395_s18 + $0x90] sm:$0xff] }
 0x41b   : > { %2518 = vmatprep.subr.mxu1 %v1595_v63 }
 0x41c   : > { %2519 = vmatpush3.msra.mxu1 %v1595_v63  ;;  %v1746_v63 = vld [vmem:[%s3395_s18 + $0x88] sm:$0xff] }
 0x41d   : > { %2520 = vmatprep.subr.mxu1 %v1594_v16 }
 0x41e   : > { %2521 = vmatpush3.msra.mxu1 %v1594_v16  ;;  %v1745_v16 = vld [vmem:[%s3395_s18 + $0x80] sm:$0xff] }
 0x4c9   : > { %v2482_v20 = vpop.f32.mrf.mxu0 }
 0x4ca   : > { %v1333_v25 = vmul.f32 %v2482_v20, %v3452_v5 }
 0x4cb   : > { %v1313_v21 = vpop.f32.mrf.mxu0 }
 0x4cc   : > { %v1332_v23 = vmul.f32 %v3430_v3, %v1313_v21 }
 0x4cd   : > { %v2485_v24 = vpop.f32.mrf.mxu0 }
 0x4ce   : > { %v1336_v28 = vadd.f32 %v1333_v25, %v1332_v23  ;;  %v1335_v30 = vmul.f32 %v2485_v24, %v3433_v4 }
 0x4cf   : > { %v1323_v26 = vpop.f32.mrf.mxu0 }
 0x4d0   : > { %v1334_v29 = vmul.f32 %v3455_v6, %v1323_v26 }
 0x4d1   : > { %v2490_v18 = vpop.f32.mrf.mxu0 }
 0x4d2   : > { %v1337_v31 = vadd.f32 %v1336_v28, %v1334_v29  ;;  %v1437_v32 = vadd.f32 %v2490_v18, %v2322_v27 }
 0x4d3   : > { %v1411_v33 = vpop.f32.mrf.mxu0 }
 0x4d4   : > { %v1436_v34 = vadd.f32 %v2322_v27, %v1411_v33  ;;  %v1443_v35 = vsel %vm1190_vm8, %v1437_v32, -inf  ;;  %v1338_v36 = vadd.f32 %v1337_v31, %v1335_v30  ;;  %v1592_v33 = vld [vmem:[%s3423_s4 + $0x20] sm:$0xff] }
 0x4d5   : > { %1444 = vmax.xlane.f32.xlu1 %v1443_v35  ;;  %v2493_v37 = vpop.f32.mrf.mxu0  ;;  %v1590_v35 = vld [vmem:[%s3423_s4 + $0x10] sm:$0xff] }
 0x4d6   : > { %v1439_v38 = vadd.f32 %v2493_v37, %v2322_v27  ;;  %2534 = vmatprep.mubr.f32.mxu1 %v1338_v36  ;;  %v1440_v39 = vsel %vm1190_vm8, %v1436_v34, -inf  ;;  %v1589_v36 = vld [vmem:[%s3423_s4 + $0x8] sm:$0xff]  ;;  %v1588_v37 = vld [vmem:[%s3423_s4] sm:$0xff] }
 0x4d7   : > { %1441 = vmax.xlane.f32.xlu0 %v1440_v39  ;;  %v1421_v40 = vpop.f32.mrf.mxu0 }
 0x4d8   : > { %v1438_v41 = vadd.f32 %v2322_v27, %v1421_v40  ;;  %v1449_v42 = vsel %vm1190_vm8, %v1439_v38, -inf }
 0x4d9   : > { %1450 = vmax.xlane.f32.xlu1 %v1449_v42 }
 0x4da   : > { %v1446_v43 = vsel %vm1190_vm8, %v1438_v41, -inf }
 0x4db   : > { %1447 = vmax.xlane.f32.xlu0 %v1446_v43 }
 0x55e   : > { %v1445_v44 = vpop.xlane.xlu1 %1444 }
 0x55f   : > { %v1453_v45 = vsub.f32 %v1437_v32, %v1445_v44  ;;  %v1593_v32 = vld [vmem:[%s3423_s4 + $0x28] sm:$0xff] }
 0x560   : > { %v1442_v46 = vpop.xlane.xlu0 %1441  ;;  %2522 = vmatprep.subr.mxu1 %v1593_v32 }
 0x561   : > { %v1458_v47 = vmul.f32 1.442695, %v1453_v45  ;;  %v1452_v48 = vsub.f32 %v1436_v34, %v1442_v46  ;;  %2523 = vmatpush3.msra.mxu1 %v1593_v32  ;;  %v1591_v34 = vld [vmem:[%s3423_s4 + $0x18] sm:$0xff] }
 0x562   : > { %v1451_v49 = vpop.xlane.xlu1 %1450  ;;  %2524 = vmatprep.subr.mxu1 %v1592_v33  ;;  %v1732_v32 = vld [vmem:[%s3395_s18 + $0x18] sm:$0xff] }
 0x563   : > { %2654 = vpow2.f32 %v1458_v47  ;;  %v1456_v50 = vmul.f32 1.442695, %v1452_v48  ;;  %v1455_v51 = vsub.f32 %v1439_v38, %v1451_v49  ;;  %2525 = vmatpush3.msra.mxu1 %v1592_v33  ;;  %v1731_v33 = vld [vmem:[%s3395_s18 + $0x10] sm:$0xff] }
 0x564   : > { %v1448_v52 = vpop.xlane.xlu0 %1447  ;;  %2526 = vmatprep.subr.mxu1 %v1591_v34 }
 0x565   : > { %2656 = vpow2.f32 %v1456_v50  ;;  %v1462_v53 = vmul.f32 1.442695, %v1455_v51  ;;  %v1454_v54 = vsub.f32 %v1438_v41, %v1448_v52  ;;  %2527 = vmatpush3.msra.mxu1 %v1591_v34  ;;  %v1760_v52 = vld [vmem:[%s3395_s18 + $0xf8] sm:$0xff]  ;;  %v1730_v34 = vld [vmem:[%s3395_s18 + $0x8] sm:$0xff] }
 0x566   : > { %2528 = vmatprep.subr.mxu1 %v1590_v35  ;;  %1773 = vmatprep.subr.mxu0 %v1760_v52  ;;  %v1875_v52 = vld [vmem:[%s3401_s5 + $0xa8] sm:$0xff] }
 0x567   : > { %2658 = vpow2.f32 %v1462_v53  ;;  %v1460_v55 = vmul.f32 1.442695, %v1454_v54  ;;  %2529 = vmatpush3.msra.mxu1 %v1590_v35  ;;  %v1759_v53 = vld [vmem:[%s3395_s18 + $0xf0] sm:$0xff]  ;;  %v1758_v54 = vld [vmem:[%s3395_s18 + $0xe8] sm:$0xff]  ;;  %v1729_v35 = vld [vmem:[%s3395_s18] sm:$0xff] }
 0x568   : > { %2530 = vmatprep.subr.mxu1 %v1589_v36 }
 0x569   : > { %2660 = vpow2.f32 %v1460_v55  ;;  %2531 = vmatpush3.msra.mxu1 %v1589_v36  ;;  %v1757_v55 = vld [vmem:[%s3395_s18 + $0xe0] sm:$0xff]  ;;  %v1885_v36 = vld [vmem:[%s3401_s5 + $0xf8] sm:$0xff] }
 0x56a   : > { %2532 = vmatprep.subr.mxu1 %v1588_v37 }
 0x56b   : > { %2533 = vmatpush3.msra.mxu1 %v1588_v37  ;;  %v1869_v37 = vld [vmem:[%s3401_s5 + $0x78] sm:$0xff] }
 0x56c   : > { %2397 = vmatprep.subr.mxu1 %v1885_v36 }
 0x570   : > { %v2655_v56 = vpop.eup %2654 }
 0x571   : > { %v1467_v57 = vsel %vm1190_vm8, %v2655_v56, 0.0 }
 0x572   : > { %v2657_v61 = vpop.eup %2656  ;;  %1468 = vadd.xlane.f32.xlu1 %v1467_v57  ;;  %v1755_v57 = vld [vmem:[%s3395_s18 + $0xd0] sm:$0xff] }
 0x573   : > { %v1464_v1 = vsel %vm1190_vm8, %v2657_v61, 0.0 }
 0x574   : > { %v2659_v7 = vpop.eup %2658  ;;  %1465 = vadd.xlane.f32.xlu0 %v1464_v1 }
 0x575   : > { %v1473_v8 = vsel %vm1190_vm8, %v2659_v7, 0.0 }
 0x576   : > { %v2661_v9 = vpop.eup %2660  ;;  %1474 = vadd.xlane.f32.xlu1 %v1473_v8 }
 0x577   : > { %v1470_v10 = vsel %vm1190_vm8, %v2661_v9, 0.0 }
 0x578   : > { %1471 = vadd.xlane.f32.xlu0 %v1470_v10 }
 0x5fb   : > { %v1469_v20 = vpop.xlane.xlu1 %1468 }
 0x5fc   : > { %2662 = vrcp.f32 %v1469_v20  ;;  %v1744_v20 = vld [vmem:[%s3395_s18 + $0x78] sm:$0xff] }
 0x5fd   : > { %v1466_v21 = vpop.xlane.xlu0 %1465 }
 0x5fe   : > { %2664 = vrcp.f32 %v1466_v21  ;;  %v1743_v21 = vld [vmem:[%s3395_s18 + $0x70] sm:$0xff] }
 0x5ff   : > { %v1475_v23 = vpop.xlane.xlu1 %1474 }
 0x600   : > { %2666 = vrcp.f32 %v1475_v23  ;;  %v1742_v23 = vld [vmem:[%s3395_s18 + $0x68] sm:$0xff] }
 0x601   : > { %v1472_v24 = vpop.xlane.xlu0 %1471 }
 0x602   : > { %2668 = vrcp.f32 %v1472_v24  ;;  %v1741_v24 = vld [vmem:[%s3395_s18 + $0x60] sm:$0xff] }
 0x609   : > { %v2663_v25 = vpop.eup %2662 }
 0x60a   : > { %v1479_v28 = vmul.f32 %v2663_v25, %v2655_v56  ;;  %v1756_v56 = vld [vmem:[%s3395_s18 + $0xd8] sm:$0xff] }
 0x60b   : > { %v2665_v26 = vpop.eup %2664  ;;  %v1740_v25 = vld [vmem:[%s3395_s18 + $0x58] sm:$0xff] }
 0x60c   : > { %v1477_v27 = vmul.f32 %v2665_v26, %v2657_v61  ;;  %v1739_v26 = vld [vmem:[%s3395_s18 + $0x50] sm:$0xff] }
 0x60d   : > { %v2667_v29 = vpop.eup %2666 }
 0x60e   : > { %2496 = vmatprep.mubr.msk.f32.mxu0 %vm1190_vm8, %v1477_v27  ;;  %v1483_v31 = vmul.f32 %v2667_v29, %v2659_v7  ;;  %v1738_v27 = vld [vmem:[%s3395_s18 + $0x48] sm:$0xff]  ;;  %v1736_v29 = vld [vmem:[%s3395_s18 + $0x38] sm:$0xff] }
 0x60f   : > { %v2669_v18 = vpop.eup %2668  ;;  %2497 = vmatmul.mubr.msk.f32.vlgmr.msra.gmra.mxu0 %vm1190_vm8, %v1479_v28  ;;  %v1737_v28 = vld [vmem:[%s3395_s18 + $0x40] sm:$0xff] }
 0x610   : > { %v1481_v30 = vmul.f32 %v2669_v18, %v2661_v9  ;;  %1774 = vmatpush1.msra.mxu0 %v1759_v53  ;;  %v1735_v18 = vld [vmem:[%s3395_s18 + $0x30] sm:$0xff]  ;;  %v1859_v53 = vld [vmem:[%s3401_s5 + $0x28] sm:$0xff] }
 0x611   : > { %1775 = vmatprep.subr.mxu0 %v1758_v54  ;;  %v1874_v54 = vld [vmem:[%s3401_s5 + $0xa0] sm:$0xff] }
 0x612   : > { %2499 = vmatprep.mubr.msk.f32.mxu0 %vm1190_vm8, %v1481_v30  ;;  %1776 = vmatpush1.msra.mxu0 %v1757_v55  ;;  %v1734_v30 = vld [vmem:[%s3395_s18 + $0x28] sm:$0xff]  ;;  %v1858_v55 = vld [vmem:[%s3401_s5 + $0x20] sm:$0xff] }
 0x613   : > { %2500 = vmatmul.mubr.msk.f32.gmra.mxu0 %vm1190_vm8, %v1483_v31  ;;  %1777 = vmatprep.subr.mxu0 %v1756_v56  ;;  %v1733_v31 = vld [vmem:[%s3395_s18 + $0x20] sm:$0xff] }
 0x614   : > { %1837 = vmatprep.mubr.f32.mxu0 %v2997_v2  ;;  %1778 = vmatpush1.msra.mxu0 %v1755_v57 }
 0x615   : > { %1779 = vmatprep.subr.mxu0 %v1754_v0 }
 0x616   : > { %1780 = vmatpush1.msra.mxu0 %v1753_v11 }
 0x617   : > { %1781 = vmatprep.subr.mxu0 %v1752_v12  ;;  %v2328_v12 = vld [vmem:[%s683_s3] ss:$0 sm:$0xff] }
 0x618   : > { %1782 = vmatpush1.msra.mxu0 %v1751_v13 }
 0x619   : > { %1783 = vmatprep.subr.mxu0 %v1750_v14  ;;  %v2329_v14 = vld [vmem:[%s691_s23] ss:$0 sm:$0xff] }
 0x61a   : > { %1784 = vmatpush1.msra.mxu0 %v1749_v15 }
 0x61b   : > { %1785 = vmatprep.subr.mxu0 %v1748_v17 }
 0x61c   : > { %1786 = vmatpush1.msra.mxu0 %v1747_v19 }
 0x61d   : > { %1787 = vmatprep.subr.mxu0 %v1746_v63  ;;  %v1872_v63 = vld [vmem:[%s3401_s5 + $0x90] sm:$0xff] }
 0x61e   : > { %1788 = vmatpush1.msra.mxu0 %v1745_v16  ;;  %v1856_v16 = vld [vmem:[%s3401_s5 + $0x10] sm:$0xff] }
 0x61f   : > { %1789 = vmatprep.subr.mxu0 %v1744_v20  ;;  %v1871_v20 = vld [vmem:[%s3401_s5 + $0x88] sm:$0xff] }
 0x620   : > { %1790 = vmatpush1.msra.mxu0 %v1743_v21  ;;  %v1855_v21 = vld [vmem:[%s3401_s5 + $0x8] sm:$0xff] }
 0x621   : > { %1791 = vmatprep.subr.mxu0 %v1742_v23  ;;  %v1870_v23 = vld [vmem:[%s3401_s5 + $0x80] sm:$0xff] }
 0x622   : > { %1792 = vmatpush1.msra.mxu0 %v1741_v24  ;;  %v1854_v24 = vld [vmem:[%s3401_s5] sm:$0xff] }
 0x623   : > { %1793 = vmatprep.subr.mxu0 %v1740_v25 }
 0x624   : > { %1794 = vmatpush1.msra.mxu0 %v1739_v26 }
 0x625   : > { %1795 = vmatprep.subr.mxu0 %v1738_v27 }
 0x626   : > { %1796 = vmatpush1.msra.mxu0 %v1737_v28 }
 0x627   : > { %1797 = vmatprep.subr.mxu0 %v1736_v29 }
 0x628   : > { %1798 = vmatpush1.msra.mxu0 %v1735_v18 }
 0x629   : > { %1799 = vmatprep.subr.mxu0 %v1734_v30 }
 0x62a   : > { %1800 = vmatpush1.msra.mxu0 %v1733_v31 }
 0x62b   : > { %1801 = vmatprep.subr.mxu0 %v1732_v32 }
 0x62c   : > { %1802 = vmatpush1.msra.mxu0 %v1731_v33 }
 0x62d   : > { %1803 = vmatprep.subr.mxu0 %v1730_v34 }
 0x62e   : > { %1804 = vmatpush1.msra.mxu0 %v1729_v35 }
 0x6cf   : > { %v2498_v38 = vpop.f32.mrf.mxu0 }
 0x6d0   : > { %v1582_v42 = vmul.f32 %v2498_v38, %v3452_v5  ;;  %v1884_v38 = vld [vmem:[%s3401_s5 + $0xf0] sm:$0xff] }
 0x6d1   : > { %v1562_v39 = vpop.f32.mrf.mxu0 }
 0x6d2   : > { %v1581_v40 = vmul.f32 %v3430_v3, %v1562_v39  ;;  %v2327_v3 = vld [vmem:[%s833_s11] ss:$0 sm:$0xff]  ;;  %v1868_v39 = vld [vmem:[%s3401_s5 + $0x70] sm:$0xff] }
 0x6d3   : > { %v2501_v41 = vpop.f32.mrf.mxu0 }
 0x6d4   : > { %v1585_v44 = vadd.f32 %v1582_v42, %v1581_v40  ;;  %v1584_v46 = vmul.f32 %v2501_v41, %v3433_v4  ;;  %v1883_v40 = vld [vmem:[%s3401_s5 + $0xe8] sm:$0xff]  ;;  %v1882_v42 = vld [vmem:[%s3401_s5 + $0xe0] sm:$0xff] }
 0x6d5   : > { %v1572_v43 = vpop.f32.mrf.mxu0  ;;  %v1867_v41 = vld [vmem:[%s3401_s5 + $0x68] sm:$0xff] }
 0x6d6   : > { %v1583_v45 = vmul.f32 %v3455_v6, %v1572_v43  ;;  %v1866_v43 = vld [vmem:[%s3401_s5 + $0x60] sm:$0xff] }
 0x6d8   : > { %v1586_v47 = vadd.f32 %v1585_v44, %v1583_v45  ;;  %v1881_v44 = vld [vmem:[%s3401_s5 + $0xd8] sm:$0xff] }
 0x6d9   : > { %v1865_v45 = vld [vmem:[%s3401_s5 + $0x58] sm:$0xff] }
 0x6da   : > { %v1587_v48 = vadd.f32 %v1586_v47, %v1584_v46  ;;  %v1880_v46 = vld [vmem:[%s3401_s5 + $0xd0] sm:$0xff] }
 0x6db   : > { %v1864_v47 = vld [vmem:[%s3401_s5 + $0x50] sm:$0xff] }
 0x6dc   : > { %2535 = vmatmul.mubr.f32.vlgmr.msra.gmra.mxu1 %v1587_v48  ;;  %v1879_v48 = vld [vmem:[%s3401_s5 + $0xc8] sm:$0xff] }
 0x6dd   : > { %2398 = vmatpush3.msra.mxu1 %v1869_v37 }
 0x6de   : > { %2399 = vmatprep.subr.mxu1 %v1884_v38 }
 0x6df   : > { %2400 = vmatpush3.msra.mxu1 %v1868_v39 }
 0x6e0   : > { %2401 = vmatprep.subr.mxu1 %v1883_v40 }
 0x6e1   : > { %2402 = vmatpush3.msra.mxu1 %v1867_v41 }
 0x6e2   : > { %2403 = vmatprep.subr.mxu1 %v1882_v42 }
 0x6e3   : > { %2404 = vmatpush3.msra.mxu1 %v1866_v43 }
 0x6e4   : > { %2405 = vmatprep.subr.mxu1 %v1881_v44 }
 0x6e5   : > { %2406 = vmatpush3.msra.mxu1 %v1865_v45 }
 0x6e6   : > { %2407 = vmatprep.subr.mxu1 %v1880_v46 }
 0x6e7   : > { %2408 = vmatpush3.msra.mxu1 %v1864_v47 }
 0x6e8   : > { %2409 = vmatprep.subr.mxu1 %v1879_v48 }
 0x79c   : > { %v2536_v5 = vpop.f32.mrf.mxu1 }
 0x79d   : > { %v1683_v49 = vadd.f32 %v2536_v5, %v2327_v3  ;;  %v1878_v5 = vld [vmem:[%s3401_s5 + $0xc0] sm:$0xff] }
 0x79e   : > { %v1677_v50 = vpop.f32.mrf.mxu1 }
 0x79f   : > { %v1678_v51 = vadd.f32 %v2327_v3, %v1677_v50  ;;  %v1687_v6 = vadd.f32 %v1683_v49, %v3531_v58  ;;  %v1863_v3 = vld [vmem:[%s3401_s5 + $0x48] sm:$0xff]  ;;  %v1862_v49 = vld [vmem:[%s3401_s5 + $0x40] sm:$0xff]  ;;  %v1877_v50 = vld [vmem:[%s3401_s5 + $0xb8] sm:$0xff] }
 0x7a0   : > { %2410 = vmatpush3.msra.mxu1 %v1863_v3 }
 0x7a1   : > { %1692 = vadd.xlane.f32.xlu1 %v1687_v6  ;;  %v1686_v4 = vadd.f32 %v1678_v51, %v3488_v22  ;;  %2411 = vmatprep.subr.mxu1 %v1878_v5  ;;  %v1861_v51 = vld [vmem:[%s3401_s5 + $0x38] sm:$0xff] }
 0x7a2   : > { %2412 = vmatpush3.msra.mxu1 %v1862_v49 }
 0x7a3   : > { %1690 = vadd.xlane.f32.xlu0 %v1686_v4  ;;  %2413 = vmatprep.subr.mxu1 %v1877_v50 }
 0x7a4   : > { %2414 = vmatpush3.msra.mxu1 %v1861_v51 }
 0x82a   : > { %v1693_v58 = vpop.xlane.xlu1 %1692 }
 0x82b   : > { %v1696_v61 = vmul.f32 0.0078125, %v1693_v58 }
 0x82c   : > { %v1691_v22 = vpop.xlane.xlu0 %1690 }
 0x82d   : > { %v3637_v1 = vsub.f32 %v1687_v6, %v1696_v61  ;;  %v1695_v7 = vmul.f32 0.0078125, %v1691_v22  ;;  %v1876_v6 = vld [vmem:[%s3401_s5 + $0xb0] sm:$0xff] }
 0x82e   : > { %2415 = vmatprep.subr.mxu1 %v1876_v6 }
 0x82f   : > { %v3639_v8 = vsub.f32 %v1686_v4, %v1695_v7  ;;  %v1700_v9 = vmul.f32 %v3637_v1, %v3637_v1  ;;  %v1860_v4 = vld [vmem:[%s3401_s5 + $0x30] sm:$0xff] }
 0x830   : > { %2416 = vmatpush3.msra.mxu1 %v1860_v4 }
 0x831   : > { %1703 = vadd.xlane.f32.xlu1 %v1700_v9  ;;  %v1699_v10 = vmul.f32 %v3639_v8, %v3639_v8  ;;  %2417 = vmatprep.subr.mxu1 %v1875_v52 }
 0x832   : > { %2418 = vmatpush3.msra.mxu1 %v1859_v53 }
 0x833   : > { %1701 = vadd.xlane.f32.xlu0 %v1699_v10  ;;  %2419 = vmatprep.subr.mxu1 %v1874_v54 }
 0x834   : > { %2420 = vmatpush3.msra.mxu1 %v1858_v55 }
 0x8ba   : > { %v1704_v56 = vpop.xlane.xlu1 %1703 }
 0x8bb   : > { %v1706_v57 = vmul.f32 0.0078125, %v1704_v56 }
 0x8bc   : > { %v1702_v58 = vpop.xlane.xlu0 %1701 }
 0x8bd   : > { %v1708_v61 = vadd.f32 1e-05, %v1706_v57  ;;  %v1705_v22 = vmul.f32 0.0078125, %v1702_v58  ;;  %v2331_v57 = vld [vmem:[%s717_s24] ss:$0 sm:$0xff] }
 0x8bf   : > { %2670 = vrsqrt.f32 %v1708_v61  ;;  %v1707_v7 = vadd.f32 1e-05, %v1705_v22 }
 0x8c1   : > { %2672 = vrsqrt.f32 %v1707_v7 }
 0x8cc   : > { %v2671_v9 = vpop.eup %2670 }
 0x8cd   : > { %v1712_v11 = vmul.f32 %v2671_v9, %v3637_v1  ;;  %v1857_v1 = vld [vmem:[%s3401_s5 + $0x18] sm:$0xff] }
 0x8ce   : > { %v2673_v10 = vpop.eup %2672 }
 0x8cf   : > { %v1711_v0 = vmul.f32 %v2673_v10, %v3639_v8  ;;  %v1720_v17 = vmul.f32 %v2328_v12, %v1712_v11  ;;  %v1873_v8 = vld [vmem:[%s3401_s5 + $0x98] sm:$0xff]  ;;  %s3836_s5 = scalar_lea.vmem [#allocation12], %s3377_s19 }
 0x8d0   : > { %2421 = vmatprep.subr.mxu1 %v1873_v8  ;;  %v2332_v61 = vld [vmem:[%s3836_s5] ss:$0 sm:$0xff] }
 0x8d1   : > { %v1719_v13 = vmul.f32 %v2328_v12, %v1711_v0  ;;  %v1728_v19 = vadd.f32 %v2329_v14, %v1720_v17  ;;  %2422 = vmatpush3.msra.mxu1 %v1857_v1 }
 0x8d2   : > { %2423 = vmatprep.subr.mxu1 %v1872_v63 }
 0x8d3   : > { %v1727_v15 = vadd.f32 %v2329_v14, %v1719_v13  ;;  %2424 = vmatpush3.msra.mxu1 %v1856_v16 }
 0x8d4   : > { %2425 = vmatprep.subr.mxu1 %v1871_v20 }
 0x8d5   : > { %1838 = vmatmul.mubr.f32.vlgmr.msra.gmra.mxu0 %v1727_v15  ;;  %2426 = vmatpush3.msra.mxu1 %v1855_v21 }
 0x8d6   : > { %1843 = vmatprep.mubr.f32.mxu0 %v2997_v2  ;;  %2427 = vmatprep.subr.mxu1 %v1870_v23  ;;  %v1761_v2 = vld [vmem:[%s3444_s20] sm:$0x3] }
 0x8d7   : > { %2428 = vmatpush3.msra.mxu1 %v1854_v24  ;;  %v1766_v25 = vrot.slane %v1761_v2, %v925_v60  ;;  %v1770_v26 = vrot.slane %v1761_v2, %v929_v62 }
 0x8d9   : > { %1844 = vmatmul.mubr.f32.gmra.mxu0 %v1728_v19 }
 0x995   : > { %v1839_v27 = vpop.f32.mrf.mxu0 }
 0x996   : > { %v1840_v28 = vadd.f32 %v1839_v27, %v1766_v25 }
 0x997   : > { %v1841_v29 = vpop.f32.mrf.mxu0 }
 0x998   : > { %v1842_v18 = vadd.f32 %v1841_v29, %v1770_v26  ;;  %v1850_v32 = vmax.f32 %v1840_v28, 0.0 }
 0x999   : > { %v1845_v30 = vpop.f32.mrf.mxu0 }
 0x99a   : > { %v1851_v31 = vmax.f32 %v1842_v18, 0.0  ;;  %v1846_v33 = vadd.f32 %v1845_v30, %v1766_v25 }
 0x99b   : > { %v1847_v34 = vpop.f32.mrf.mxu0 }
 0x99c   : > { %v1848_v35 = vadd.f32 %v1847_v34, %v1770_v26  ;;  %1957 = vmatprep.mubr.f32.mxu1 %v1851_v31  ;;  %v1852_v37 = vmax.f32 %v1846_v33, 0.0 }
 0x99d   : > { %1958 = vmatmul.mubr.f32.vlgmr.msra.gmra.mxu1 %v1850_v32 }
 0x99e   : > { %v1853_v36 = vmax.f32 %v1848_v35, 0.0 }
 0x9a0   : > { %1962 = vmatprep.mubr.f32.mxu1 %v1853_v36 }
 0x9a1   : > { %1963 = vmatmul.mubr.f32.gmra.mxu1 %v1852_v37 }
 0xa5d   : > { %v2429_v60 = vpop.f32.mrf.mxu1 }
 0xa5f   : > { %v2430_v62 = vpop.f32.mrf.mxu1 }
 0xa60   : > { %v2431_v38 = vadd.f32 %v2430_v62, %v2429_v60 }
 0xa61   : > { %v2432_v39 = vpop.f32.mrf.mxu1 }
 0xa62   : > { %v1960_v40 = vadd.f32 %v2431_v38, %v2330_v59 }
 0xa63   : > { %v2433_v41 = vpop.f32.mrf.mxu1 }
 0xa64   : > { %v2434_v42 = vadd.f32 %v2433_v41, %v2432_v39  ;;  %v1968_v43 = vadd.f32 %v1960_v40, %v1727_v15 }
 0xa66   : > { %v1965_v44 = vadd.f32 %v2434_v42, %v2330_v59  ;;  %1972 = vadd.xlane.f32.xlu0 %v1968_v43 }
 0xa68   : > { %v1969_v45 = vadd.f32 %v1965_v44, %v1728_v19 }
 0xa6a   : > { %1974 = vadd.xlane.f32.xlu1 %v1969_v45 }
 0xaef   : > { %v1973_v46 = vpop.xlane.xlu0 %1972 }
 0xaf0   : > { %v1976_v47 = vmul.f32 0.0078125, %v1973_v46 }
 0xaf2   : > { %v1978_v48 = vsub.f32 %v1968_v43, %v1976_v47 }
 0xaf3   : > { %v1975_v3 = vpop.xlane.xlu1 %1974 }
 0xaf4   : > { %v1977_v5 = vmul.f32 0.0078125, %v1975_v3  ;;  %v1980_v49 = vmul.f32 %v1978_v48, %v1978_v48 }
 0xaf6   : > { %v1979_v50 = vsub.f32 %v1969_v45, %v1977_v5  ;;  %1982 = vadd.xlane.f32.xlu0 %v1980_v49 }
 0xaf8   : > { %v1981_v51 = vmul.f32 %v1979_v50, %v1979_v50 }
 0xafa   : > { %1984 = vadd.xlane.f32.xlu1 %v1981_v51 }
 0xb7f   : > { %v1983_v6 = vpop.xlane.xlu0 %1982 }
 0xb80   : > { %v1986_v4 = vmul.f32 0.0078125, %v1983_v6 }
 0xb82   : > { %v1988_v52 = vadd.f32 1e-05, %v1986_v4 }
 0xb83   : > { %v1985_v53 = vpop.xlane.xlu1 %1984 }
 0xb84   : > { %2674 = vrsqrt.f32 %v1988_v52  ;;  %v1987_v54 = vmul.f32 0.0078125, %v1985_v53 }
 0xb86   : > { %v1989_v55 = vadd.f32 1e-05, %v1987_v54 }
 0xb88   : > { %2676 = vrsqrt.f32 %v1989_v55 }
 0xb91   : > { %v2675_v56 = vpop.eup %2674 }
 0xb92   : > { %v1992_v58 = vmul.f32 %v2675_v56, %v1978_v48 }
 0xb94   : > { %v2000_v22 = vmul.f32 %v2331_v57, %v1992_v58 }
 0xb95   : > { %v2677_v7 = vpop.eup %2676 }
 0xb96   : > { %v2008_v9 = vadd.f32 %v2332_v61, %v2000_v22  ;;  %v1993_v10 = vmul.f32 %v2677_v7, %v1979_v50 }
 0xb98   : > { %2010 = vst [vmem:[%s3832_s0] sm:$0xff] %v2008_v9  ;;  %v2001_v0 = vmul.f32 %v2331_v57, %v1993_v10  ;;  %2015 = sbr.rel (%p2333_p10) target bundleno = 3284 (0xcd4), region = 128 }
 0xb9a   : > { %v2009_v11 = vadd.f32 %v2332_v61, %v2001_v0 }
 0xb9c   : > { %2011 = vst [vmem:[%s3832_s0 + $0x8] sm:$0xff] %v2009_v11 }
 0xb9d   : > { %2018 = vadd.xlane.f32.xlu0 %v2008_v9  ;;  %v2334_v25 = vld [vmem:[#allocation13] ss:$0 sm:$0xff]  ;;  %v2335_v27 = vld [vmem:[#allocation15] ss:$0 sm:$0xff] }
 0xba1   : > { %2020 = vadd.xlane.f32.xlu0 %v2009_v11 }
 0xc26   : > { %v2019_v12 = vpop.xlane.xlu0 %2018 }
 0xc27   : > { %v2022_v13 = vmul.f32 0.0078125, %v2019_v12 }
 0xc29   : > { %v2024_v14 = vsub.f32 %v2008_v9, %v2022_v13 }
 0xc2a   : > { %v2021_v15 = vpop.xlane.xlu0 %2020 }
 0xc2b   : > { %v2023_v17 = vmul.f32 0.0078125, %v2021_v15  ;;  %v2026_v19 = vmul.f32 %v2024_v14, %v2024_v14 }
 0xc2d   : > { %v2025_v8 = vsub.f32 %v2009_v11, %v2023_v17  ;;  %2028 = vadd.xlane.f32.xlu1 %v2026_v19 }
 0xc2f   : > { %v2027_v1 = vmul.f32 %v2025_v8, %v2025_v8 }
 0xc31   : > { %2030 = vadd.xlane.f32.xlu1 %v2027_v1 }
 0xcb6   : > { %v2029_v63 = vpop.xlane.xlu1 %2028 }
 0xcb7   : > { %v2032_v16 = vmul.f32 0.0078125, %v2029_v63 }
 0xcb9   : > { %v2034_v20 = vadd.f32 1e-05, %v2032_v16 }
 0xcba   : > { %v2031_v21 = vpop.xlane.xlu1 %2030 }
 0xcbb   : > { %2678 = vrsqrt.f32 %v2034_v20  ;;  %v2033_v23 = vmul.f32 0.0078125, %v2031_v21 }
 0xcbd   : > { %v2035_v24 = vadd.f32 1e-05, %v2033_v23 }
 0xcbf   : > { %2680 = vrsqrt.f32 %v2035_v24 }
 0xcc8   : > { %v2679_v2 = vpop.eup %2678 }
 0xcc9   : > { %v2038_v26 = vmul.f32 %v2679_v2, %v2024_v14 }
 0xccb   : > { %v2046_v28 = vmul.f32 %v2334_v25, %v2038_v26 }
 0xccc   : > { %v2681_v29 = vpop.eup %2680 }
 0xccd   : > { %v2054_v18 = vadd.f32 %v2335_v27, %v2046_v28  ;;  %v2039_v30 = vmul.f32 %v2681_v29, %v2025_v8 }
 0xccf   : > { %2056 = vst [vmem:[%s3838_s27] sm:$0xff] %v2054_v18  ;;  %v2047_v31 = vmul.f32 %v2334_v25, %v2039_v30 }
 0xcd1   : > { %v2055_v32 = vadd.f32 %v2335_v27, %v2047_v31 }
 0xcd3   : > { %2057 = vst [vmem:[%s3838_s27 + $0x8] sm:$0xff] %v2055_v32 }
 0xcd4 PF: > { %s3839_s24 = sld [smem:[#allocation23_spill]]  ;;  %s3842_s21 = smov %s2972_s22 }
 0xcd5   : > { %s3840_s17 = sld [smem:[#allocation21_spill]] }
 0xcd6   : > { %s3841_s23 = sld [smem:[#allocation24_spill]] }
 0xcda   : > { %p36_p13 = scmp.ge.s32.totalorder %s3839_s24, 4  }
 0xcdb   : > { %s3843_s22 = smov %s3840_s17 }
 0xcdc   :  { %38 = sbr.rel (!%p36_p13) target bundleno = 23 (0x17), region = 224 }
 0xce1   :  { %2069 = vsyncpa [#allocation3], 1 }
 0xce2   :  { %2071 = vsyncpa [#allocation3 + $0x1], 1 }
 0xce3   :  { %2072 = vsyncpa [#allocation5], 1 }
 0xce4   :  { %2074 = vsyncpa [#allocation5 + $0x1], 1 }
 0xce5   :  { %2075 = vsyncpa [#allocation8], 1 }
 0xce6   :  { %2077 = vsyncpa [#allocation8 + $0x1], 1 }
 0xce7   :  { %2078 = vsyncpa [#allocation11], 1 }
 0xce8   :  { %2080 = vsyncpa [#allocation11 + $0x1], 1 }
 0xce9   :  { %2081 = vsyncpa [#allocation14], 1 }

// kernel: transformer_forward.3
= control target key start
LH: loop header
LB: loop body
LE: loop exit
PB: predicated region body
PF: predicated region fallthrough
CT: control target
= control target key end

     0   :  { %s6472_s0 = inlined_call_operand.vmem [shape: f32[2,8,128], index: 0, kind: input, shape index: {}]   ;;  %s6473_s1 = inlined_call_operand.vmem [shape: f32[2,8,128], index: 1, kind: input, shape index: {}]   ;;  %s6474_s2 = inlined_call_operand.vmem [shape: f32[2,1,8], index: 2, kind: input, shape index: {}]   ;;  %s6475_s3 = inlined_call_operand.vmem [shape: f32[2,128,384], index: 3, kind: input, shape index: {}]   ;;  %s6476_s4 = inlined_call_operand.vmem [shape: f32[2,1,384], index: 4, kind: input, shape index: {}]   ;;  %s6477_s5 = inlined_call_operand.hbm [shape: f32[2,128,128], index: 5, kind: input, shape index: {}]   ;;  %s6478_s6 = inlined_call_operand.hbm [shape: f32[2,1,128], index: 6, kind: input, shape index: {}]   ;;  %s6479_s7 = inlined_call_operand.hbm [shape: f32[2,1,128], index: 7, kind: input, shape index: {}]   ;;  %s6480_s8 = inlined_call_operand.hbm [shape: f32[2,1,128], index: 8, kind: input, shape index: {}]   ;;  %s6481_s9 = inlined_call_operand.hbm [shape: f32[2,128,128], index: 9, kind: input, shape index: {}]   ;;  %s6482_s10 = inlined_call_operand.hbm [shape: f32[2,1,128], index: 10, kind: input, shape index: {}]   ;;  %s6483_s11 = inlined_call_operand.vmem [shape: f32[2,128,256], index: 11, kind: input, shape index: {}]   ;;  %s6484_s12 = inlined_call_operand.vmem [shape: f32[2,1,256], index: 12, kind: input, shape index: {}]   ;;  %s6485_s13 = inlined_call_operand.hbm [shape: f32[2,128,128], index: 13, kind: input, shape index: {}]   ;;  %s6486_s14 = inlined_call_operand.hbm [shape: f32[2,1,128], index: 14, kind: input, shape index: {}]   ;;  %s6487_s15 = inlined_call_operand.hbm [shape: f32[2,1,128], index: 15, kind: input, shape index: {}]   ;;  %s6488_s16 = inlined_call_operand.hbm [shape: f32[2,1,128], index: 16, kind: input, shape index: {}]   ;;  %s6489_s17 = inlined_call_operand.vmem [shape: f32[2,128,256], index: 17, kind: input, shape index: {}]   ;;  %s6490_s18 = inlined_call_operand.vmem [shape: f32[2,1,256], index: 18, kind: input, shape index: {}]   ;;  %s6491_s19 = inlined_call_operand.vmem [shape: f32[2,256,128], index: 19, kind: input, shape index: {}]   ;;  %s6492_s20 = inlined_call_operand.hbm [shape: f32[2,1,128], index: 20, kind: input, shape index: {}]   ;;  %s6493_s21 = inlined_call_operand.hbm [shape: f32[2,1,128], index: 21, kind: input, shape index: {}]   ;;  %s6494_s22 = inlined_call_operand.hbm [shape: f32[2,1,128], index: 22, kind: input, shape index: {}]   ;;  %s6495_s23 = inlined_call_operand.hbm [shape: f32[1,128], index: 23, kind: input, shape index: {}]   ;;  %s6496_s24 = inlined_call_operand.hbm [shape: f32[1,128], index: 24, kind: input, shape index: {}]   ;;  %s6497_s25 = inlined_call_operand.hbm [shape: f32[128,128], index: 25, kind: input, shape index: {}]   ;;  %s6498_s26 = inlined_call_operand.hbm [shape: f32[1,128], index: 26, kind: input, shape index: {}]   ;;  %s6499_s27 = inlined_call_operand.hbm [shape: f32[2,8,128], index: 27, kind: output, shape index: {}]  }
   0x1   :  { %6533 = sst [smem:[#allocation47_spill]] %s6472_s0 }
   0x2   :  { %6534 = sst [smem:[#allocation48_spill]] %s6473_s1 }
   0x3   :  { %6535 = sst [smem:[#allocation49_spill]] %s6474_s2 }
   0x4   :  { %6536 = sst [smem:[#allocation50_spill]] %s6475_s3 }
   0x5   :  { %6537 = sst [smem:[#allocation51_spill]] %s6476_s4 }
   0x6   :  { %6538 = sst [smem:[#allocation52_spill]] %s6477_s5 }
   0x7   :  { %6539 = sst [smem:[#allocation53_spill]] %s6478_s6 }
   0x8   :  { %6540 = sst [smem:[#allocation54_spill]] %s6479_s7 }
   0x9   :  { %6541 = sst [smem:[#allocation55_spill]] %s6480_s8 }
   0xa   :  { %6542 = sst [smem:[#allocation56_spill]] %s6481_s9 }
   0xb   :  { %6543 = sst [smem:[#allocation57_spill]] %s6482_s10 }
   0xc   :  { %6544 = sst [smem:[#allocation58_spill]] %s6483_s11 }
   0xd   :  { %6545 = sst [smem:[#allocation59_spill]] %s6484_s12 }
   0xe   :  { %6546 = sst [smem:[#allocation60_spill]] %s6486_s14 }
   0xf   :  { %6547 = sst [smem:[#allocation61_spill]] %s6488_s16 }
  0x10   :  { %6548 = sst [smem:[#allocation62_spill]] %s6489_s17 }
  0x11   :  { %6549 = sst [smem:[#allocation63_spill]] %s6490_s18 }
  0x12   :  { %6550 = sst [smem:[#allocation64_spill]] %s6491_s19 }
  0x13   :  { %6551 = sst [smem:[#allocation65_spill]] %s6493_s21 }
  0x14   :  { %6552 = sst [smem:[#allocation66_spill]] %s6495_s23 }
  0x15   :  { %6553 = sst [smem:[#allocation67_spill]] %s6496_s24 }
  0x16   :  { %6554 = sst [smem:[#allocation68_spill]] %s6497_s25 }
  0x17   :  { %6555 = sst [smem:[#allocation69_spill]] %s6498_s26 }
  0x18   :  { %6556 = sst [smem:[#allocation70_spill]] %s6499_s27 }
  0x19   :  { %32 = vsyncpa [#allocation4], 0 }
  0x1a   :  { %34 = vsyncpa [#allocation4 + $0x1], 0 }
  0x1b   :  { %35 = vsyncpa [#allocation7], 0 }
  0x1c   :  { %37 = vsyncpa [#allocation7 + $0x1], 0 }
  0x1d   :  { %38 = vsyncpa [#allocation10], 0 }
  0x1e   :  { %40 = vsyncpa [#allocation10 + $0x1], 0 }
  0x1f   :  { %41 = vsyncpa [#allocation13], 0 }
  0x20   :  { %43 = vsyncpa [#allocation13 + $0x1], 0 }
  0x21   :  { %44 = vsyncpa [#allocation16], 0 }
  0x22   :  { %46 = vsyncpa [#allocation16 + $0x1], 0 }
  0x23   :  { %47 = vsyncpa [#allocation19], 0 }
  0x24   :  { %49 = vsyncpa [#allocation19 + $0x1], 0 }
  0x25   :  { %50 = vsyncpa [#allocation22], 0 }
  0x26   :  { %52 = vsyncpa [#allocation22 + $0x1], 0 }
  0x27   :  { %53 = vsyncpa [#allocation25], 0 }
  0x28   :  { %54 = vsyncpa [#allocation28], 0 }
  0x29   :  { %55 = vsyncpa [#allocation5], 0  ;;  %s5434_s7 = smov 0   ;;  %s5436_s4 = smov 0  }
  0x2a   :  { %s5438_s8 = smov 0   ;;  %s5440_s30 = smov 0  }
  0x2b LB: > { %6557 = sst [smem:[#allocation41_spill]] %s5261_s4  ;;  %s5453_s9 = sadd.s32 4294967295, %s5269_s30   ;;  %s5269_s30 = sphi %s5440_s30, %s6633_s30   ;;  %s5265_s8 = sphi %s5438_s8, %s6636_s8   ;;  %s5261_s4 = sphi %s5436_s4, %s6635_s4   ;;  %s5257_s7 = sphi %s5434_s7, %s6634_s7  }
  0x2c   : > { %6558 = sst [smem:[#allocation42_spill]] %s5265_s8  ;;  %s5456_s5 = sadd.s32 1, %s5269_s30  }
  0x2d   : > { %6559 = sst [smem:[#allocation43_spill]] %s5453_s9  ;;  %s180_s28 = ssub.s32 %s5269_s30, %s5456_s5 }
  0x2e   : > { %6560 = sst [smem:[#allocation44_spill]] %s5456_s5  ;;  %s183_s0 = sadd.s32 1, %s5265_s8 }
  0x2f   : > { %p181_p0 = scmp.eq.s32.totalorder %s180_s28, 0  ;;  %p190_p1 = scmp.ne.s32.totalorder %s5265_s8, %s5261_s4 }
  0x30   : > { %p191_p2 = scmp.eq.s32.totalorder %s5269_s30, 0  ;;  %p196_p3 = scmp.ne.s32.totalorder %s5261_s4, %s5257_s7 }
  0x31   : > { %s5466_s10 = scalar_select %p181_p0, %s5265_s8, %s183_s0  }
  0x32   : > { %p5468_p4 = por %p191_p2, %p190_p1  ;;  %p6510_p5 = scmp.eq.s32.totalorder %s5453_s9, 0 }
  0x33   : > { %6561 = sst [smem:[#allocation45_spill]] %s5466_s10  ;;  %p3976_p6 = scmp.ge.s32.totalorder %s5269_s30, 1 }
  0x34   : > { %p754_p7 = scmp.lt.s32.totalorder %s5269_s30, 3  ;;  %p5477_p8 = por %p6510_p5, %p196_p3 }
  0x35   : > { %s5271_s11 = smov [#allocation24]   ;;  %p4578_p12 = scmp.lt.s32.totalorder %s5269_s30, 2 }
  0x36   : > { %s6563_s1 = scalar_select %p5477_p8, 1, 0 }
  0x37   : > { %p5482_p10 = pnand %p3976_p6, %p754_p7  ;;  %s776_s2 = sshll.u32 %s5271_s11, 4  ;;  %s777_s2 = int_to_ptr.vmem [resolvable:$true] %s776_s2 }
  0x38   : > { %6564 = sst [smem:[#allocation46_spill]] %s6563_s1  ;;  %s5490_s3 = sand.u32 1, %s5265_s8  }
  0x39   : > { %s6565_s6 = scalar_select %p5482_p10, 1, 0 }
  0x3a   : > { %p4521_p11 = pneg %p5482_p10  ;;  %p5500_p0 = pnand %p4578_p12, %p5468_p4 }
  0x3b   : > { %s5272_s0 = smov [#allocation27]   ;;  %s4718_s10 = scalar_lea.vmem %s777_s2, 16 }
  0x3c   : > { %p5494_p13 = pnand %p4521_p11, %p6510_p5  ;;  %s797_s11 = sshll.u32 %s5272_s0, 4  ;;  %s798_s11 = int_to_ptr.vmem [resolvable:$true] %s797_s11 }
  0x3d   : > { %p4719_p2 = scmp.ne.s32.totalorder %s777_s2, %s4718_s10  ;;  %s4725_s8 = scalar_lea.vmem %s777_s2, 32 }
  0x3e   : > { %s6566_s7 = scalar_select %p5494_p13, 1, 0 }
  0x3f   : > { %p6519_p1 = pneg %p5494_p13  ;;  %p4726_p7 = scmp.lt.s32.totalorder %s777_s2, %s777_s2 }
  0x40   : > { %p4727_p11 = scmp.lt.s32.totalorder %s4725_s8, %s4718_s10 }
  0x41   : > { %p4721_p3 = pnand %p4719_p2, %p6519_p1 }
  0x42   : > { %p4728_p9 = por %p4727_p11, %p4726_p7 }
  0x43   : > { %p4722_p6 = pneg %p4721_p3 }
  0x45   : > { %p4729_p5 = pnand %p4728_p9, %p4722_p6 }
  0x47   : > { %4732 = shalt.err (!%p4729_p5)
}
  0x48   : > { %s6568_s23 = sld [smem:[#allocation66_spill]]  ;;  %s5515_s0 = sand.u32 1, %s5269_s30  }
  0x49   : > { %s4744_s27 = scalar_lea.vmem %s798_s11, 2048  ;;  %p4752_p3 = scmp.lt.s32.totalorder %s798_s11, %s798_s11 }
  0x4a   : > { %p4745_p4 = scmp.ne.s32.totalorder %s798_s11, %s4744_s27  ;;  %p4753_p7 = scmp.lt.s32.totalorder %s4744_s27, %s4744_s27 }
  0x4c   : > { %p4747_p12 = pnand %p4745_p4, %p6519_p1  ;;  %p4754_p9 = por %p4753_p7, %p4752_p3 }
  0x4e   : > { %4524 = dma.hbm_to_vmem [thread:$0]  (!%p5494_p13), %s6568_s23, 16, %s777_s2, [#allocation25]  }
  0x4f   : > { %p4748_p2 = pneg %p4747_p12 }
  0x51   : > { %p4755_p5 = pnand %p4754_p9, %p4748_p2 }
  0x53   : > { %4758 = shalt.err (!%p4755_p5)
}
  0x54   : > { %s6521_s8 = smov 128   ;;  %s6523_s5 = smov 8  }
  0x55   : > { %s6569_s25 = sld [smem:[#allocation68_spill]]  ;;  %s5529_s29 = sshll.u32 %s5269_s30, 4 }
  0x56   : > { %s861_s27 = scalar_lea.vmem [#allocation6], %s5490_s3  ;;  %s6570_s17 = sld [smem:[#allocation53_spill]] }
  0x57   : > { %s868_s23 = sshll.u32 %s861_s27, 4  ;;  %p5539_p11 = pneg %p5500_p0  ;;  %s869_s23 = int_to_ptr.vmem [resolvable:$true] %s868_s23 }
  0x5b   : > { %4530 = dma.hbm_to_vmem [thread:$0]  (!%p5494_p13), %s6569_s25, 2048, %s798_s11, [#allocation28], %s6521_s8, %s6521_s8, %s6523_s5  }
  0x5c   : > { %s866_s12 = scalar_lea.hbm %s6570_s17, %s5529_s29  ;;  %s4764_s2 = scalar_lea.hbm %s6570_s17, 32 }
  0x5d   : > { %s4759_s1 = scalar_lea.hbm %s866_s12, 16  ;;  %p4765_p2 = scmp.lt.s32.totalorder %s866_s12, %s6570_s17 }
  0x5e   : > { %p4760_p6 = scmp.ne.s32.totalorder %s866_s12, %s4759_s1  ;;  %p4766_p3 = scmp.lt.s32.totalorder %s4764_s2, %s4759_s1 }
  0x60   : > { %p4762_p4 = pnand %p5539_p11, %p4760_p6  ;;  %p4767_p7 = por %p4766_p3, %p4765_p2 }
  0x62   : > { %p4763_p12 = pneg %p4762_p4 }
  0x64   : > { %p4768_p9 = pnand %p4767_p7, %p4763_p12 }
  0x66   : > { %4771 = shalt.err (!%p4768_p9)
}
  0x67   : > { %s4772_s19 = scalar_lea.vmem %s869_s23, 16  ;;  %s5275_s8 = smov [#allocation6]  }
  0x68   : > { %p4773_p5 = scmp.ne.s32.totalorder %s869_s23, %s4772_s19  ;;  %s4777_s5 = sshll.u32 %s5275_s8, 4  ;;  %s4778_s5 = int_to_ptr.vmem [resolvable:$false] %s4777_s5 }
  0x69   : > { %s4779_s9 = scalar_lea.vmem %s4778_s5, 32  ;;  %p4780_p6 = scmp.lt.s32.totalorder %s869_s23, %s4778_s5 }
  0x6a   : > { %p4775_p1 = pnand %p4773_p5, %p5539_p11  ;;  %p4781_p4 = scmp.lt.s32.totalorder %s4779_s9, %s4772_s19 }
  0x6c   : > { %p4776_p8 = pneg %p4775_p1  ;;  %p4782_p10 = por %p4781_p4, %p4780_p6 }
  0x6e   : > { %p4783_p13 = pnand %p4782_p10, %p4776_p8 }
  0x70   : > { %4786 = shalt.err (!%p4783_p13)
}
  0x71   : > { %s6572_s1 = scalar_lea.sflag [#allocation7], %s5515_s0  ;;  %s6573_s2 = sld [smem:[#allocation55_spill]] }
  0x72   : > { %4540 = dma.hbm_to_vmem [thread:$0]  (!%p5500_p0), %s866_s12, 16, %s869_s23, %s6572_s1  }
  0x73   : > { %s895_s9 = scalar_lea.vmem [#allocation9], %s5490_s3 }
  0x74   : > { %s902_s5 = sshll.u32 %s895_s9, 4  ;;  %s903_s5 = int_to_ptr.vmem [resolvable:$true] %s902_s5 }
  0x77   : > { %s5561_s8 = scalar_lea.hbm %s6573_s2, %s5529_s29  ;;  %s4792_s12 = scalar_lea.hbm %s6573_s2, 32 }
  0x78   : > { %s4787_s18 = scalar_lea.hbm %s5561_s8, 16  ;;  %p4793_p1 = scmp.lt.s32.totalorder %s5561_s8, %s6573_s2 }
  0x79   : > { %p4788_p8 = scmp.ne.s32.totalorder %s5561_s8, %s4787_s18  ;;  %p4794_p12 = scmp.lt.s32.totalorder %s4792_s12, %s4787_s18 }
  0x7b   : > { %p4790_p10 = pnand %p4788_p8, %p5539_p11  ;;  %p4795_p2 = por %p4794_p12, %p4793_p1 }
  0x7d   : > { %p4791_p13 = pneg %p4790_p10 }
  0x7f   : > { %p4796_p3 = pnand %p4795_p2, %p4791_p13 }
  0x81   : > { %4799 = shalt.err (!%p4796_p3)
}
  0x82   : > { %s4800_s11 = scalar_lea.vmem %s903_s5, 16  ;;  %s5276_s10 = smov [#allocation9]  }
  0x83   : > { %p4801_p7 = scmp.ne.s32.totalorder %s903_s5, %s4800_s11  ;;  %s4805_s9 = sshll.u32 %s5276_s10, 4  ;;  %s4806_s9 = int_to_ptr.vmem [resolvable:$false] %s4805_s9 }
  0x84   : > { %s4807_s27 = scalar_lea.vmem %s4806_s9, 32  ;;  %p4808_p6 = scmp.lt.s32.totalorder %s903_s5, %s4806_s9 }
  0x85   : > { %p4803_p9 = pnand %p4801_p7, %p5539_p11  ;;  %p4809_p4 = scmp.lt.s32.totalorder %s4807_s27, %s4800_s11 }
  0x87   : > { %p4804_p5 = pneg %p4803_p9  ;;  %p4810_p8 = por %p4809_p4, %p4808_p6 }
  0x89   : > { %p4811_p10 = pnand %p4810_p8, %p4804_p5 }
  0x8b   : > { %4814 = shalt.err (!%p4811_p10)
}
  0x8c   : > { %s6574_s17 = scalar_lea.sflag [#allocation10], %s5515_s0  ;;  %s6575_s12 = sld [smem:[#allocation57_spill]] }
  0x8d   : > { %4546 = dma.hbm_to_vmem [thread:$0]  (!%p5500_p0), %s5561_s8, 16, %s903_s5, %s6574_s17  }
  0x8e   : > { %s933_s27 = scalar_lea.vmem [#allocation12], %s5490_s3 }
  0x8f   : > { %s940_s1 = sshll.u32 %s933_s27, 4  ;;  %s941_s1 = int_to_ptr.vmem [resolvable:$true] %s940_s1 }
  0x92   : > { %s5587_s23 = scalar_lea.hbm %s6575_s12, %s5529_s29  ;;  %s4820_s8 = scalar_lea.hbm %s6575_s12, 32 }
  0x93   : > { %s4815_s10 = scalar_lea.hbm %s5587_s23, 16  ;;  %p4821_p2 = scmp.lt.s32.totalorder %s5587_s23, %s6575_s12 }
  0x94   : > { %p4816_p13 = scmp.ne.s32.totalorder %s5587_s23, %s4815_s10  ;;  %p4822_p3 = scmp.lt.s32.totalorder %s4820_s8, %s4815_s10 }
  0x96   : > { %p4818_p1 = pnand %p4816_p13, %p5539_p11  ;;  %p4823_p7 = por %p4822_p3, %p4821_p2 }
  0x98   : > { %p4819_p12 = pneg %p4818_p1 }
  0x9a   : > { %p4824_p9 = pnand %p4823_p7, %p4819_p12 }
  0x9c   : > { %4827 = shalt.err (!%p4824_p9)
}
  0x9d   : > { %s4828_s18 = scalar_lea.vmem %s941_s1, 16  ;;  %s5277_s19 = smov [#allocation12]  }
  0x9e   : > { %p4829_p5 = scmp.ne.s32.totalorder %s941_s1, %s4828_s18  ;;  %s4833_s27 = sshll.u32 %s5277_s19, 4  ;;  %s4834_s27 = int_to_ptr.vmem [resolvable:$false] %s4833_s27 }
  0x9f   : > { %s4835_s11 = scalar_lea.vmem %s4834_s27, 32  ;;  %p4836_p8 = scmp.lt.s32.totalorder %s941_s1, %s4834_s27 }
  0xa0   : > { %p4831_p6 = pnand %p4829_p5, %p5539_p11  ;;  %p4837_p10 = scmp.lt.s32.totalorder %s4835_s11, %s4828_s18 }
  0xa2   : > { %p4832_p4 = pneg %p4831_p6  ;;  %p4838_p13 = por %p4837_p10, %p4836_p8 }
  0xa4   : > { %p4839_p1 = pnand %p4838_p13, %p4832_p4 }
  0xa6   : > { %4842 = shalt.err (!%p4839_p1)
}
  0xa7   : > { %s6576_s2 = scalar_lea.sflag [#allocation13], %s5515_s0  ;;  %s6577_s14 = sld [smem:[#allocation60_spill]] }
  0xa8   : > { %4552 = dma.hbm_to_vmem [thread:$0]  (!%p5500_p0), %s5587_s23, 16, %s941_s1, %s6576_s2  }
  0xa9   : > { %s986_s11 = scalar_lea.vmem [#allocation15], %s5490_s3 }
  0xaa   : > { %s993_s5 = sshll.u32 %s986_s11, 4  ;;  %s994_s5 = int_to_ptr.vmem [resolvable:$true] %s993_s5 }
  0xad   : > { %s5613_s8 = scalar_lea.hbm %s6577_s14, %s5529_s29  ;;  %s4848_s23 = scalar_lea.hbm %s6577_s14, 32 }
  0xae   : > { %s4843_s18 = scalar_lea.hbm %s5613_s8, 16  ;;  %p4849_p7 = scmp.lt.s32.totalorder %s5613_s8, %s6577_s14 }
  0xaf   : > { %p4844_p12 = scmp.ne.s32.totalorder %s5613_s8, %s4843_s18  ;;  %p4850_p9 = scmp.lt.s32.totalorder %s4848_s23, %s4843_s18 }
  0xb1   : > { %p4846_p2 = pnand %p4844_p12, %p5539_p11  ;;  %p4851_p5 = por %p4850_p9, %p4849_p7 }
  0xb3   : > { %p4847_p3 = pneg %p4846_p2 }
  0xb5   : > { %p4852_p6 = pnand %p4851_p5, %p4847_p3 }
  0xb7   : > { %4855 = shalt.err (!%p4852_p6)
}
  0xb8   : > { %s4856_s10 = scalar_lea.vmem %s994_s5, 16  ;;  %s5278_s9 = smov [#allocation15]  }
  0xb9   : > { %p4857_p4 = scmp.ne.s32.totalorder %s994_s5, %s4856_s10  ;;  %s4861_s11 = sshll.u32 %s5278_s9, 4  ;;  %s4862_s11 = int_to_ptr.vmem [resolvable:$false] %s4861_s11 }
  0xba   : > { %s4863_s17 = scalar_lea.vmem %s4862_s11, 32  ;;  %p4864_p13 = scmp.lt.s32.totalorder %s994_s5, %s4862_s11 }
  0xbb   : > { %p4859_p8 = pnand %p4857_p4, %p5539_p11  ;;  %p4865_p1 = scmp.lt.s32.totalorder %s4863_s17, %s4856_s10 }
  0xbd   : > { %p4860_p10 = pneg %p4859_p8  ;;  %p4866_p12 = por %p4865_p1, %p4864_p13 }
  0xbf   : > { %p4867_p2 = pnand %p4866_p12, %p4860_p10 }
  0xc1   : > { %4870 = shalt.err (!%p4867_p2)
}
  0xc2   : > { %s6578_s18 = scalar_lea.sflag [#allocation16], %s5515_s0  ;;  %s6579_s16 = sld [smem:[#allocation61_spill]] }
  0xc3   : > { %4558 = dma.hbm_to_vmem [thread:$0]  (!%p5500_p0), %s5613_s8, 16, %s994_s5, %s6578_s18  }
  0xc4   : > { %s1020_s17 = scalar_lea.vmem [#allocation18], %s5490_s3 }
  0xc5   : > { %s1027_s1 = sshll.u32 %s1020_s17, 4  ;;  %s1028_s1 = int_to_ptr.vmem [resolvable:$true] %s1027_s1 }
  0xc8   : > { %s5639_s23 = scalar_lea.hbm %s6579_s16, %s5529_s29  ;;  %s4876_s8 = scalar_lea.hbm %s6579_s16, 32 }
  0xc9   : > { %s4871_s10 = scalar_lea.hbm %s5639_s23, 16  ;;  %p4877_p5 = scmp.lt.s32.totalorder %s5639_s23, %s6579_s16 }
  0xca   : > { %p4872_p3 = scmp.ne.s32.totalorder %s5639_s23, %s4871_s10  ;;  %p4878_p6 = scmp.lt.s32.totalorder %s4876_s8, %s4871_s10 }
  0xcc   : > { %p4874_p7 = pnand %p4872_p3, %p5539_p11  ;;  %p4879_p4 = por %p4878_p6, %p4877_p5 }
  0xce   : > { %p4875_p9 = pneg %p4874_p7 }
  0xd0   : > { %p4880_p8 = pnand %p4879_p4, %p4875_p9 }
  0xd2   : > { %4883 = shalt.err (!%p4880_p8)
}
  0xd3   : > { %s4884_s19 = scalar_lea.vmem %s1028_s1, 16  ;;  %s5279_s27 = smov [#allocation18]  }
  0xd4   : > { %p4885_p10 = scmp.ne.s32.totalorder %s1028_s1, %s4884_s19  ;;  %s4889_s17 = sshll.u32 %s5279_s27, 4  ;;  %s4890_s17 = int_to_ptr.vmem [resolvable:$false] %s4889_s17 }
  0xd5   : > { %s4891_s2 = scalar_lea.vmem %s4890_s17, 32  ;;  %p4892_p12 = scmp.lt.s32.totalorder %s1028_s1, %s4890_s17 }
  0xd6   : > { %p4887_p13 = pnand %p4885_p10, %p5539_p11  ;;  %p4893_p2 = scmp.lt.s32.totalorder %s4891_s2, %s4884_s19 }
  0xd8   : > { %p4888_p1 = pneg %p4887_p13  ;;  %p4894_p3 = por %p4893_p2, %p4892_p12 }
  0xda   : > { %p4895_p7 = pnand %p4894_p3, %p4888_p1 }
  0xdc   : > { %4898 = shalt.err (!%p4895_p7)
}
  0xdd   : > { %s6580_s10 = scalar_lea.sflag [#allocation19], %s5515_s0  ;;  %s6581_s21 = sld [smem:[#allocation65_spill]] }
  0xde   : > { %4564 = dma.hbm_to_vmem [thread:$0]  (!%p5500_p0), %s5639_s23, 16, %s1028_s1, %s6580_s10  }
  0xdf   : > { %s1077_s2 = scalar_lea.vmem [#allocation21], %s5490_s3 }
  0xe0   : > { %s1084_s5 = sshll.u32 %s1077_s2, 4  ;;  %s1085_s5 = int_to_ptr.vmem [resolvable:$true] %s1084_s5 }
  0xe3   : > { %s5665_s8 = scalar_lea.hbm %s6581_s21, %s5529_s29  ;;  %s4904_s23 = scalar_lea.hbm %s6581_s21, 32 }
  0xe4   : > { %s4899_s19 = scalar_lea.hbm %s5665_s8, 16  ;;  %p4905_p4 = scmp.lt.s32.totalorder %s5665_s8, %s6581_s21 }
  0xe5   : > { %p4900_p9 = scmp.ne.s32.totalorder %s5665_s8, %s4899_s19  ;;  %p4906_p8 = scmp.lt.s32.totalorder %s4904_s23, %s4899_s19 }
  0xe7   : > { %p4902_p5 = pnand %p4900_p9, %p5539_p11  ;;  %p4907_p10 = por %p4906_p8, %p4905_p4 }
  0xe9   : > { %p4903_p6 = pneg %p4902_p5 }
  0xeb   : > { %p4908_p13 = pnand %p4907_p10, %p4903_p6 }
  0xed   : > { %4911 = shalt.err (!%p4908_p13)
}
  0xee   : > { %s4912_s9 = scalar_lea.vmem %s1085_s5, 16  ;;  %s5280_s11 = smov [#allocation21]  }
  0xef   : > { %p4913_p1 = scmp.ne.s32.totalorder %s1085_s5, %s4912_s9  ;;  %s4917_s2 = sshll.u32 %s5280_s11, 4  ;;  %s4918_s2 = int_to_ptr.vmem [resolvable:$false] %s4917_s2 }
  0xf0   : > { %s4919_s18 = scalar_lea.vmem %s4918_s2, 32  ;;  %p4920_p3 = scmp.lt.s32.totalorder %s1085_s5, %s4918_s2 }
  0xf1   : > { %p4915_p12 = pnand %p4913_p1, %p5539_p11  ;;  %p4921_p7 = scmp.lt.s32.totalorder %s4919_s18, %s4912_s9 }
  0xf3   : > { %p4916_p2 = pneg %p4915_p12  ;;  %p4922_p9 = por %p4921_p7, %p4920_p3 }
  0xf5   : > { %p4923_p5 = pnand %p4922_p9, %p4916_p2 }
  0xf7   : > { %4926 = shalt.err (!%p4923_p5)
}
  0xf8   : > { %s6582_s19 = scalar_lea.sflag [#allocation22], %s5515_s0  ;;  %s5281_s27 = smov [#allocation26]  }
  0xf9   : > { %4570 = dma.hbm_to_vmem [thread:$0]  (!%p5500_p0), %s5665_s8, 16, %s1085_s5, %s6582_s19  }
  0xfa   : > { %s787_s17 = sshll.u32 %s5281_s27, 4  ;;  %s5282_s23 = smov [#allocation29]   ;;  %s788_s17 = int_to_ptr.vmem [resolvable:$true] %s787_s17 }
  0xfb   : > { %s811_s1 = sshll.u32 %s5282_s23, 4  ;;  %s4938_s10 = scalar_lea.vmem %s788_s17, 16  ;;  %s812_s1 = int_to_ptr.vmem [resolvable:$true] %s811_s1 }
  0xfc   : > { %p4939_p6 = scmp.ne.s32.totalorder %s788_s17, %s4938_s10  ;;  %p6583_p4 = scmp.ne.s32.totalorder %s6566_s7, 0 }
  0xfd   : > { %s4945_s18 = scalar_lea.vmem %s788_s17, 32  ;;  %p4946_p1 = scmp.lt.s32.totalorder %s788_s17, %s788_s17 }
  0xfe   : > { %p6584_p8 = pneg %p6583_p4  ;;  %p4947_p12 = scmp.lt.s32.totalorder %s4945_s18, %s4938_s10 }
 0x100   : > { %p4941_p10 = pnand %p4939_p6, %p6584_p8  ;;  %p4948_p2 = por %p4947_p12, %p4946_p1 }
 0x102   : > { %p4942_p13 = pneg %p4941_p10 }
 0x104   : > { %p4949_p3 = pnand %p4948_p2, %p4942_p13 }
 0x106   : > { %4952 = shalt.err (!%p4949_p3)
}
 0x107   : > { %s6585_s24 = sld [smem:[#allocation67_spill]]  ;;  %s4964_s9 = scalar_lea.vmem %s812_s1, 16 }
 0x108   : > { %p4965_p7 = scmp.ne.s32.totalorder %s812_s1, %s4964_s9  ;;  %p6586_p9 = pmov %p6584_p8 }
 0x109   : > { %s4971_s11 = scalar_lea.vmem %s812_s1, 32  ;;  %p4972_p8 = scmp.lt.s32.totalorder %s812_s1, %s812_s1 }
 0x10a   : > { %p4967_p5 = pnand %p4965_p7, %p6586_p9  ;;  %p4973_p10 = scmp.lt.s32.totalorder %s4971_s11, %s4964_s9 }
 0x10c   : > { %p4968_p6 = pneg %p4967_p5  ;;  %p4974_p1 = por %p4973_p10, %p4972_p8 }
 0x10d   : > { %4527 = dma.hbm_to_vmem [thread:$0]  (!%p6583_p4), %s6585_s24, 16, %s788_s17, [#allocation25]  }
 0x10e   : > { %p4975_p13 = pnand %p4974_p1, %p4968_p6 }
 0x110   : > { %4978 = shalt.err (!%p4975_p13)
}
 0x111   : > { %s6587_s26 = sld [smem:[#allocation69_spill]]  ;;  %s5704_s27 = sshll.u32 %s5490_s3, 7 }
 0x112   : > { %s5707_s17 = sshll.u32 %s5269_s30, 11  ;;  %s6588_s18 = sld [smem:[#allocation52_spill]] }
 0x113   : > { %s841_s7 = scalar_lea.vmem [#allocation3], %s5704_s27  ;;  %s6589_s11 = sld [smem:[#allocation54_spill]] }
 0x114   : > { %s848_s5 = sshll.u32 %s841_s7, 4  ;;  %s838_s30 = scalar_lea.sflag [#allocation4], %s5490_s3  ;;  %s5716_s5 = int_to_ptr.vmem [resolvable:$true] %s848_s5 }
 0x117   : > { %4533 = dma.hbm_to_vmem [thread:$0]  (!%p6583_p4), %s6587_s26, 16, %s812_s1, [#allocation28]  }
 0x118   : > { %s5713_s8 = scalar_lea.hbm %s6588_s18, %s5707_s17  ;;  %s4984_s12 = scalar_lea.hbm %s6588_s18, 4096 }
 0x119   : > { %s5722_s2 = scalar_lea.hbm %s6589_s11, %s5529_s29  ;;  %s4979_s19 = scalar_lea.hbm %s5713_s8, 2048 }
 0x11a   : > { %p4980_p4 = scmp.ne.s32.totalorder %s5713_s8, %s4979_s19  ;;  %p4985_p3 = scmp.lt.s32.totalorder %s5713_s8, %s6588_s18 }
 0x11b   : > { %p4986_p7 = scmp.lt.s32.totalorder %s4984_s12, %s4979_s19 }
 0x11c   : > { %p4982_p12 = pnand %p4980_p4, %p5539_p11 }
 0x11d   : > { %p4987_p9 = por %p4986_p7, %p4985_p3 }
 0x11e   : > { %p4983_p2 = pneg %p4982_p12 }
 0x120   : > { %p4988_p5 = pnand %p4987_p9, %p4983_p2 }
 0x122   : > { %4991 = shalt.err (!%p4988_p5)
}
 0x123   : > { %s4992_s7 = scalar_lea.vmem %s5716_s5, 2048  ;;  %s5283_s9 = smov [#allocation3]  }
 0x124   : > { %p4993_p6 = scmp.ne.s32.totalorder %s5716_s5, %s4992_s7  ;;  %s4997_s1 = sshll.u32 %s5283_s9, 4  ;;  %s4998_s1 = int_to_ptr.vmem [resolvable:$false] %s4997_s1 }
 0x125   : > { %s4999_s23 = scalar_lea.vmem %s4998_s1, 4096  ;;  %p5000_p1 = scmp.lt.s32.totalorder %s5716_s5, %s4998_s1 }
 0x126   : > { %p4995_p8 = pnand %p4993_p6, %p5539_p11  ;;  %p5001_p13 = scmp.lt.s32.totalorder %s4999_s23, %s4992_s7 }
 0x128   : > { %p4996_p10 = pneg %p4995_p8  ;;  %p5002_p4 = por %p5001_p13, %p5000_p1 }
 0x12a   : > { %p5003_p12 = pnand %p5002_p4, %p4996_p10 }
 0x12c   : > { %5006 = shalt.err (!%p5003_p12)
}
 0x12d   : > { %s6590_s14 = smov 8   ;;  %s6591_s16 = smov 128  }
 0x12e   : > { %4537 = dma.hbm_to_vmem [thread:$0]  (!%p5500_p0), %s5713_s8, 2048, %s5716_s5, %s838_s30, %s6591_s16, %s6591_s16, %s6590_s14  }
 0x12f   : > { %s878_s12 = scalar_lea.vmem [#allocation8], %s5490_s3  ;;  %s6592_s9 = sld [smem:[#allocation56_spill]] }
 0x130   : > { %s885_s19 = sshll.u32 %s878_s12, 4  ;;  %s5007_s23 = scalar_lea.hbm %s5722_s2, 16  ;;  %s886_s19 = int_to_ptr.vmem [resolvable:$true] %s885_s19 }
 0x131   : > { %p5008_p2 = scmp.ne.s32.totalorder %s5722_s2, %s5007_s23  ;;  %s5012_s24 = scalar_lea.hbm %s6589_s11, 32 }
 0x132   : > { %p5013_p9 = scmp.lt.s32.totalorder %s5722_s2, %s6589_s11  ;;  %p5014_p5 = scmp.lt.s32.totalorder %s5012_s24, %s5007_s23 }
 0x133   : > { %p5010_p3 = pnand %p5008_p2, %p5539_p11 }
 0x134   : > { %p5015_p6 = por %p5014_p5, %p5013_p9 }
 0x135   : > { %s5753_s1 = scalar_lea.hbm %s6592_s9, %s5707_s17  ;;  %p5011_p7 = pneg %p5010_p3 }
 0x137   : > { %p5016_p8 = pnand %p5015_p6, %p5011_p7 }
 0x139   : > { %5019 = shalt.err (!%p5016_p8)
}
 0x13a   : > { %s5020_s8 = scalar_lea.vmem %s886_s19, 16  ;;  %s5284_s5 = smov [#allocation8]  }
 0x13b   : > { %p5021_p10 = scmp.ne.s32.totalorder %s886_s19, %s5020_s8  ;;  %s5025_s30 = sshll.u32 %s5284_s5, 4  ;;  %s5026_s30 = int_to_ptr.vmem [resolvable:$false] %s5025_s30 }
 0x13c   : > { %s5027_s12 = scalar_lea.vmem %s5026_s30, 32  ;;  %p5028_p4 = scmp.lt.s32.totalorder %s886_s19, %s5026_s30 }
 0x13d   : > { %p5023_p1 = pnand %p5021_p10, %p5539_p11  ;;  %p5029_p12 = scmp.lt.s32.totalorder %s5027_s12, %s5020_s8 }
 0x13f   : > { %p5024_p13 = pneg %p5023_p1  ;;  %p5030_p2 = por %p5029_p12, %p5028_p4 }
 0x141   : > { %p5031_p3 = pnand %p5030_p2, %p5024_p13 }
 0x143   : > { %5034 = shalt.err (!%p5031_p3)
}
 0x144   : > { %s6593_s21 = scalar_lea.sflag [#allocation7], %s5515_s0  ;;  %s913_s24 = scalar_lea.vmem [#allocation11], %s5704_s27 }
 0x145   : > { %4543 = dma.hbm_to_vmem [thread:$0]  (!%p5500_p0), %s5722_s2, 16, %s886_s19, %s6593_s21  }
 0x146   : > { %s920_s25 = sshll.u32 %s913_s24, 4  ;;  %s5780_s10 = scalar_lea.hbm %s6485_s13, %s5707_s17  ;;  %s5774_s25 = int_to_ptr.vmem [resolvable:$true] %s920_s25 }
 0x147   : > { %s5035_s7 = scalar_lea.hbm %s5753_s1, 2048  ;;  %s5040_s5 = scalar_lea.hbm %s6592_s9, 4096 }
 0x148   : > { %p5036_p7 = scmp.ne.s32.totalorder %s5753_s1, %s5035_s7  ;;  %p5041_p6 = scmp.lt.s32.totalorder %s5753_s1, %s6592_s9 }
 0x149   : > { %p5042_p8 = scmp.lt.s32.totalorder %s5040_s5, %s5035_s7 }
 0x14a   : > { %p5038_p9 = pnand %p5036_p7, %p5539_p11 }
 0x14b   : > { %p5043_p10 = por %p5042_p8, %p5041_p6 }
 0x14c   : > { %p5039_p5 = pneg %p5038_p9 }
 0x14e   : > { %p5044_p1 = pnand %p5043_p10, %p5039_p5 }
 0x150   : > { %5047 = shalt.err (!%p5044_p1)
}
 0x151   : > { %s5048_s17 = scalar_lea.vmem %s5774_s25, 2048  ;;  %s5285_s19 = smov [#allocation11]  }
 0x152   : > { %p5049_p13 = scmp.ne.s32.totalorder %s5774_s25, %s5048_s17  ;;  %s5053_s12 = sshll.u32 %s5285_s19, 4  ;;  %s5054_s12 = int_to_ptr.vmem [resolvable:$false] %s5053_s12 }
 0x153   : > { %s5055_s21 = scalar_lea.vmem %s5054_s12, 4096  ;;  %p5056_p2 = scmp.lt.s32.totalorder %s5774_s25, %s5054_s12 }
 0x154   : > { %p5051_p4 = pnand %p5049_p13, %p5539_p11  ;;  %p5057_p3 = scmp.lt.s32.totalorder %s5055_s21, %s5048_s17 }
 0x156   : > { %p5052_p12 = pneg %p5051_p4  ;;  %p5058_p7 = por %p5057_p3, %p5056_p2 }
 0x158   : > { %p5059_p9 = pnand %p5058_p7, %p5052_p12 }
 0x15a   : > { %5062 = shalt.err (!%p5059_p9)
}
 0x15b   : > { %s6594_s24 = scalar_lea.sflag [#allocation10], %s5515_s0  ;;  %s966_s26 = scalar_lea.vmem [#allocation14], %s5704_s27 }
 0x15c   : > { %4549 = dma.hbm_to_vmem [thread:$0]  (!%p5500_p0), %s5753_s1, 2048, %s5774_s25, %s6594_s24, %s6591_s16, %s6591_s16, %s6590_s14  }
 0x15d   : > { %s973_s18 = sshll.u32 %s966_s26, 4  ;;  %s5814_s8 = scalar_lea.hbm %s6487_s15, %s5529_s29  ;;  %s5808_s18 = int_to_ptr.vmem [resolvable:$true] %s973_s18 }
 0x15e   : > { %s5063_s5 = scalar_lea.hbm %s5780_s10, 2048  ;;  %s5068_s17 = scalar_lea.hbm %s6485_s13, 4096 }
 0x15f   : > { %p5064_p5 = scmp.ne.s32.totalorder %s5780_s10, %s5063_s5  ;;  %p5069_p10 = scmp.lt.s32.totalorder %s5780_s10, %s6485_s13 }
 0x160   : > { %p5070_p1 = scmp.lt.s32.totalorder %s5068_s17, %s5063_s5 }
 0x161   : > { %p5066_p6 = pnand %p5064_p5, %p5539_p11 }
 0x162   : > { %p5071_p13 = por %p5070_p1, %p5069_p10 }
 0x163   : > { %p5067_p8 = pneg %p5066_p6 }
 0x165   : > { %p5072_p4 = pnand %p5071_p13, %p5067_p8 }
 0x167   : > { %5075 = shalt.err (!%p5072_p4)
}
 0x168   : > { %s5076_s27 = scalar_lea.vmem %s5808_s18, 2048  ;;  %s5286_s25 = smov [#allocation14]  }
 0x169   : > { %p5077_p12 = scmp.ne.s32.totalorder %s5808_s18, %s5076_s27  ;;  %s5081_s12 = sshll.u32 %s5286_s25, 4  ;;  %s5082_s12 = int_to_ptr.vmem [resolvable:$false] %s5081_s12 }
 0x16a   : > { %s5083_s21 = scalar_lea.vmem %s5082_s12, 4096  ;;  %p5084_p7 = scmp.lt.s32.totalorder %s5808_s18, %s5082_s12 }
 0x16b   : > { %p5079_p2 = pnand %p5077_p12, %p5539_p11  ;;  %p5085_p9 = scmp.lt.s32.totalorder %s5083_s21, %s5076_s27 }
 0x16d   : > { %p5080_p3 = pneg %p5079_p2  ;;  %p5086_p5 = por %p5085_p9, %p5084_p7 }
 0x16f   : > { %p5087_p6 = pnand %p5086_p5, %p5080_p3 }
 0x171   : > { %5090 = shalt.err (!%p5087_p6)
}
 0x172   : > { %s6595_s24 = scalar_lea.sflag [#allocation13], %s5515_s0  ;;  %s1003_s26 = scalar_lea.vmem [#allocation17], %s5490_s3 }
 0x173   : > { %4555 = dma.hbm_to_vmem [thread:$0]  (!%p5500_p0), %s5780_s10, 2048, %s5808_s18, %s6595_s24, %s6591_s16, %s6591_s16, %s6590_s14  }
 0x174   : > { %s1010_s7 = sshll.u32 %s1003_s26, 4  ;;  %s5846_s30 = scalar_lea.hbm %s6492_s20, %s5529_s29  ;;  %s1011_s7 = int_to_ptr.vmem [resolvable:$true] %s1010_s7 }
 0x175   : > { %s5091_s2 = scalar_lea.hbm %s5814_s8, 16  ;;  %s5096_s1 = scalar_lea.hbm %s6487_s15, 32 }
 0x176   : > { %p5092_p8 = scmp.ne.s32.totalorder %s5814_s8, %s5091_s2  ;;  %p5097_p13 = scmp.lt.s32.totalorder %s5814_s8, %s6487_s15 }
 0x177   : > { %p5098_p4 = scmp.lt.s32.totalorder %s5096_s1, %s5091_s2 }
 0x178   : > { %p5094_p10 = pnand %p5092_p8, %p5539_p11 }
 0x179   : > { %p5099_p12 = por %p5098_p4, %p5097_p13 }
 0x17a   : > { %p5095_p1 = pneg %p5094_p10 }
 0x17c   : > { %p5100_p2 = pnand %p5099_p12, %p5095_p1 }
 0x17e   : > { %5103 = shalt.err (!%p5100_p2)
}
 0x17f   : > { %s5104_s14 = scalar_lea.vmem %s1011_s7, 16  ;;  %s5287_s16 = smov [#allocation17]  }
 0x180   : > { %p5105_p3 = scmp.ne.s32.totalorder %s1011_s7, %s5104_s14  ;;  %s5109_s10 = sshll.u32 %s5287_s16, 4  ;;  %s5110_s10 = int_to_ptr.vmem [resolvable:$false] %s5109_s10 }
 0x181   : > { %s5111_s18 = scalar_lea.vmem %s5110_s10, 32  ;;  %p5112_p5 = scmp.lt.s32.totalorder %s1011_s7, %s5110_s10 }
 0x182   : > { %p5107_p7 = pnand %p5105_p3, %p5539_p11  ;;  %p5113_p6 = scmp.lt.s32.totalorder %s5111_s18, %s5104_s14 }
 0x184   : > { %p5108_p9 = pneg %p5107_p7  ;;  %p5114_p8 = por %p5113_p6, %p5112_p5 }
 0x186   : > { %p5115_p10 = pnand %p5114_p8, %p5108_p9 }
 0x188   : > { %5118 = shalt.err (!%p5115_p10)
}
 0x189   : > { %s6596_s12 = scalar_lea.sflag [#allocation16], %s5515_s0  ;;  %s1060_s21 = scalar_lea.vmem [#allocation20], %s5490_s3 }
 0x18a   : > { %4561 = dma.hbm_to_vmem [thread:$0]  (!%p5500_p0), %s5814_s8, 16, %s1011_s7, %s6596_s12  }
 0x18b   : > { %s1067_s24 = sshll.u32 %s1060_s21, 4  ;;  %s5871_s5 = scalar_lea.hbm %s6494_s22, %s5529_s29  ;;  %s1068_s24 = int_to_ptr.vmem [resolvable:$true] %s1067_s24 }
 0x18c   : > { %s5119_s2 = scalar_lea.hbm %s5846_s30, 16  ;;  %s5124_s1 = scalar_lea.hbm %s6492_s20, 32 }
 0x18d   : > { %p5120_p1 = scmp.ne.s32.totalorder %s5846_s30, %s5119_s2  ;;  %p5125_p12 = scmp.lt.s32.totalorder %s5846_s30, %s6492_s20 }
 0x18e   : > { %p5126_p2 = scmp.lt.s32.totalorder %s5124_s1, %s5119_s2 }
 0x18f   : > { %p5122_p13 = pnand %p5120_p1, %p5539_p11 }
 0x190   : > { %p5127_p3 = por %p5126_p2, %p5125_p12 }
 0x191   : > { %p5123_p4 = pneg %p5122_p13 }
 0x193   : > { %p5128_p7 = pnand %p5127_p3, %p5123_p4 }
 0x195   : > { %5131 = shalt.err (!%p5128_p7)
}
 0x196   : > { %s5132_s8 = scalar_lea.vmem %s1068_s24, 16  ;;  %s5288_s29 = smov [#allocation20]  }
 0x197   : > { %p5133_p9 = scmp.ne.s32.totalorder %s1068_s24, %s5132_s8  ;;  %s5137_s7 = sshll.u32 %s5288_s29, 4  ;;  %s5138_s7 = int_to_ptr.vmem [resolvable:$false] %s5137_s7 }
 0x198   : > { %s5139_s14 = scalar_lea.vmem %s5138_s7, 32  ;;  %p5140_p8 = scmp.lt.s32.totalorder %s1068_s24, %s5138_s7 }
 0x199   : > { %p5135_p5 = pnand %p5133_p9, %p5539_p11  ;;  %p5141_p10 = scmp.lt.s32.totalorder %s5139_s14, %s5132_s8 }
 0x19b   : > { %p5136_p6 = pneg %p5135_p5  ;;  %p5142_p1 = por %p5141_p10, %p5140_p8 }
 0x19d   : > { %p5143_p13 = pnand %p5142_p1, %p5136_p6 }
 0x19f   : > { %5146 = shalt.err (!%p5143_p13)
}
 0x1a0   : > { %s6597_s16 = scalar_lea.sflag [#allocation19], %s5515_s0  ;;  %s1094_s10 = scalar_lea.vmem [#allocation23], %s5490_s3 }
 0x1a1   : > { %4567 = dma.hbm_to_vmem [thread:$0]  (!%p5500_p0), %s5846_s30, 16, %s1068_s24, %s6597_s16  }
 0x1a2   : > { %s1101_s18 = sshll.u32 %s1094_s10, 4  ;;  %s5147_s12 = scalar_lea.hbm %s5871_s5, 16  ;;  %s1102_s18 = int_to_ptr.vmem [resolvable:$true] %s1101_s18 }
 0x1a3   : > { %p5148_p4 = scmp.ne.s32.totalorder %s5871_s5, %s5147_s12  ;;  %s5152_s23 = scalar_lea.hbm %s6494_s22, 32 }
 0x1a4   : > { %p5153_p3 = scmp.lt.s32.totalorder %s5871_s5, %s6494_s22  ;;  %p5154_p7 = scmp.lt.s32.totalorder %s5152_s23, %s5147_s12 }
 0x1a5   : > { %p5150_p12 = pnand %p5148_p4, %p5539_p11 }
 0x1a6   : > { %p5155_p9 = por %p5154_p7, %p5153_p3 }
 0x1a7   : > { %p5151_p2 = pneg %p5150_p12 }
 0x1a9   : > { %p5156_p5 = pnand %p5155_p9, %p5151_p2 }
 0x1ab   : > { %5159 = shalt.err (!%p5156_p5)
}
 0x1ac   : > { %s5160_s3 = scalar_lea.vmem %s1102_s18, 16  ;;  %s5289_s30 = smov [#allocation23]  }
 0x1ad   : > { %p5161_p6 = scmp.ne.s32.totalorder %s1102_s18, %s5160_s3  ;;  %s5165_s24 = sshll.u32 %s5289_s30, 4  ;;  %s5166_s24 = int_to_ptr.vmem [resolvable:$false] %s5165_s24 }
 0x1ae   : > { %s5167_s19 = scalar_lea.vmem %s5166_s24, 32  ;;  %p5168_p1 = scmp.lt.s32.totalorder %s1102_s18, %s5166_s24 }
 0x1af   : > { %p5163_p8 = pnand %p5161_p6, %p5539_p11  ;;  %p5169_p13 = scmp.lt.s32.totalorder %s5167_s19, %s5160_s3 }
 0x1b1   : > { %p5164_p10 = pneg %p5163_p8  ;;  %p5170_p4 = por %p5169_p13, %p5168_p1 }
 0x1b3   : > { %p5171_p12 = pnand %p5170_p4, %p5164_p10 }
 0x1b5   : > { %5174 = shalt.err (!%p5171_p12)
}
 0x1b6   : > { %s6598_s1 = scalar_lea.sflag [#allocation22], %s5515_s0  ;;  %p6599_p2 = scmp.ne.s32.totalorder %s6565_s6, 0 }
 0x1b7   : > { %4573 = dma.hbm_to_vmem [thread:$0]  (!%p5500_p0), %s5871_s5, 16, %s1102_s18, %s6598_s1  }
 0x1b8   : > { %1110 = sbr.rel (%p6599_p2) target bundleno = 5652 (0x1614), region = 128  ;;  %s6600_s4 = sld [smem:[#allocation41_spill]] (!%p6599_p2) }
 0x1b9   : > { %s6601_s27 = sld [smem:[#allocation46_spill]] (!%p6599_p2) }
 0x1be   : > { %s5913_s25 = sand.u32 1, %s6600_s4  }
 0x1bf   : > { %s4002_s8 = sshll.u32 %s5913_s25, 7  ;;  %s1113_s29 = scalar_lea.sflag [#allocation4], %s5913_s25 }
 0x1c0   : > { %s5917_s7 = scalar_lea.vmem [#allocation3], %s4002_s8  ;;  %p6602_p11 = scmp.ne.s32.totalorder %s6601_s27, 0 }
 0x1c2   : > { %5216 = dma.done.wait (%p6602_p11), %s1113_s29, 2048  }
 0x1c3   : > { %5218 = vsyncadd (%p6602_p11), %s1113_s29, 4294965248  ;;  %s6603_s28 = sld [smem:[#allocation43_spill]] }
 0x1c9   : > { %s5924_s6 = sand.u32 1, %s6603_s28  }
 0x1ca   : > { %s1122_s0 = scalar_lea.sflag [#allocation7], %s5924_s6 }
 0x1cb   : > { %5220 = dma.done.wait (%p6602_p11), %s1122_s0, 32  }
 0x1cc   : > { %5222 = vsyncadd (%p6602_p11), %s1122_s0, 4294967264  ;;  %s1138_s16 = scalar_lea.sflag [#allocation10], %s5924_s6 }
 0x1cd   : > { %5224 = dma.done.wait (%p6602_p11), %s1138_s16, 2064  }
 0x1ce   : > { %5226 = vsyncadd (%p6602_p11), %s1138_s16, 4294965232  ;;  %s5939_s18 = scalar_lea.vmem [#allocation11], %s4002_s8  ;;  %s1155_s12 = scalar_lea.sflag [#allocation13], %s5924_s6 }
 0x1cf   : > { %5228 = dma.done.wait (%p6602_p11), %s1155_s12, 2064  }
 0x1d0   : > { %5230 = vsyncadd (%p6602_p11), %s1155_s12, 4294965232  ;;  %s5947_s26 = scalar_lea.vmem [#allocation14], %s4002_s8  ;;  %s1172_s23 = scalar_lea.sflag [#allocation16], %s5924_s6 }
 0x1d1   : > { %5232 = dma.done.wait (%p6602_p11), %s1172_s23, 32  }
 0x1d2   : > { %5234 = vsyncadd (%p6602_p11), %s1172_s23, 4294967264  ;;  %s1188_s3 = scalar_lea.sflag [#allocation19], %s5924_s6 }
 0x1d3   : > { %5236 = dma.done.wait (%p6602_p11), %s1188_s3, 32  }
 0x1d4   : > { %5238 = vsyncadd (%p6602_p11), %s1188_s3, 4294967264  ;;  %s1204_s19 = scalar_lea.sflag [#allocation22], %s5924_s6 }
 0x1d5   : > { %5240 = dma.done.wait (%p6602_p11), %s1204_s19, 32  }
 0x1d6   : > { %5242 = vsyncadd (%p6602_p11), %s1204_s19, 4294967264  ;;  %p6604_p0 = scmp.eq.s32.totalorder %s6603_s28, 0 }
 0x1d8   : > { %5244 = dma.done.wait (%p6604_p0), [#allocation25], 32   ;;  %p6605_p3 = pmov %p6604_p0 }
 0x1d9   : > { %p6606_p7 = pmov %p6604_p0 }
 0x1da   : > { %5246 = vsyncadd (%p6605_p3), [#allocation25], 4294967264 }
 0x1db   : > { %5248 = dma.done.wait (%p6606_p7), [#allocation28], 2064   ;;  %p6607_p9 = pmov %p6604_p0 }
 0x1dc   : > { %p1378_p5 = scmp.lt.s32.totalorder %s6603_s28, 1  ;;  %v1410_v0 = vlaneseq  ;;  %s6608_s12 = sld [smem:[#allocation58_spill]]  ;;  %v5290_v2 = vmov 0.0  }
 0x1dd   : > { %5250 = vsyncadd (%p6607_p9), [#allocation28], 4294965232  ;;  %s6609_s4 = sld [smem:[#allocation50_spill]]  ;;  %p6615_p6 = scmp.ne.s32.totalorder %s6603_s28, 0 }
 0x1de   : > { %s1379_s27 = scalar_select %p1378_p5, %s6603_s28, 1  ;;  %v5981_v1 = vand.u32 127, %v1410_v0 }
 0x1df   : > { %s6611_s21 = sld [smem:[#allocation59_spill]] }
 0x1e0   : > { %s4473_s8 = smul.u32 384, %s1379_s27  ;;  %s4063_s29 = sshll.u32 %s1379_s27, 8  ;;  %vm1413_vm0 = vcmp.ge.s32.totalorder %v5981_v1, 32  ;;  %vm1414_vm1 = vcmp.ge.s32.totalorder %v5981_v1, 64  ;;  %vm1415_vm2 = vcmp.ge.s32.totalorder %v5981_v1, 96  ;;  %vm1416_vm3 = vcmp.lt.s32.totalorder %v5981_v1, 32 }
 0x1e1   : > { %s4474_s6 = smul.u32 3, %s1379_s27  ;;  %vm1417_vm4 = vcmp.lt.s32.totalorder %v5981_v1, 64  ;;  %vm1418_vm5 = vcmp.lt.s32.totalorder %v5981_v1, 96  ;;  %v5995_v3 = vsel %vm1416_vm3, 1.0, %v5290_v2  ;;  %v5998_v4 = vsel %vm1415_vm2, 1.0, %v5290_v2  ;;  %s4012_s24 = sshll.u32 %s1379_s27, 1 }
 0x1e2   : > { %s5990_s23 = scalar_lea.vmem %s6608_s12, %s4063_s29  ;;  %vm1421_vm6 = vmand %vm1413_vm0, %vm1417_vm4  ;;  %s6610_s12 = sld [smem:[#allocation51_spill]] }
 0x1e3   : > { %s6003_s1 = scalar_lea.vmem %s6609_s4, %s4473_s8  ;;  %vm1422_vm7 = vmand %vm1414_vm1, %vm1418_vm5  ;;  %v6018_v5 = vsel %vm1421_vm6, 1.0, %v5290_v2  ;;  %s6612_s27 = sld [smem:[#allocation62_spill]] }
 0x1e4   : > { %v6031_v6 = vsel %vm1422_vm7, 1.0, %v5290_v2  ;;  %s6614_s17 = sld [smem:[#allocation64_spill]] }
 0x1e5   : > { %s6013_s10 = scalar_lea.vmem %s6611_s21, %s4012_s24  ;;  %s6616_s8 = sld [smem:[#allocation47_spill]] (!%p6615_p6) }
 0x1e8   : > { %s6008_s30 = scalar_lea.vmem %s6610_s12, %s4474_s6  ;;  %s6613_s6 = sld [smem:[#allocation63_spill]] }
 0x1e9   : > { %s6023_s3 = scalar_lea.vmem %s6612_s27, %s4063_s29 }
 0x1ea   : > { %s6036_s12 = scalar_lea.vmem %s6614_s17, %s4063_s29  ;;  %1435 = sbr.rel (%p6615_p6) target bundleno = 497 (0x1f1), region = 200 }
 0x1eb   : > { %s6617_s27 = smov (!%p6615_p6), %s6616_s8 }
 0x1ee   : > { %s6028_s16 = scalar_lea.vmem %s6613_s6, %s4012_s24 }
 0x1ef   : > { %v1436_v7 = vld [vmem:[%s6616_s8] sm:$0xff]  ;;  %v1437_v8 = vld [vmem:[%s6617_s27 + $0x8] sm:$0xff] }
 0x1f0   : > { %1438 = vst [vmem:[#allocation2] sm:$0xff] %v1436_v7  ;;  %1439 = vst [vmem:[#allocation2 + $0x8] sm:$0xff] %v1437_v8 }
 0x1f1 PF: > { %v1494_v9 = vld [vmem:[%s6003_s1 + $0x170] sm:$0xff]  ;;  %v1493_v10 = vld [vmem:[%s6003_s1 + $0x168] sm:$0xff]  ;;  %v1491_v11 = vld [vmem:[%s6003_s1 + $0x158] sm:$0xff]  ;;  %1577 = vmatprep.mubr.f32.mxu0 %v5290_v2  ;;  %v1445_v59 = vshrl.u32 %v1410_v0, 7  ;;  %s6618_s5 = sld [smem:[#allocation49_spill]]  ;;  %vm1766_vm9 = vcmask 64512  }
 0x1f2   : > { %1513 = vmatprep.subr.mxu0 %v1494_v9  ;;  %v1490_v12 = vld [vmem:[%s6003_s1 + $0x150] sm:$0xff]  ;;  %v1488_v13 = vld [vmem:[%s6003_s1 + $0x140] sm:$0xff]  ;;  %v1487_v14 = vld [vmem:[%s6003_s1 + $0x138] sm:$0xff]  ;;  %s6620_s29 = sld [smem:[#allocation48_spill]]  ;;  %s6623_s19 = scalar_lea.vmem [#allocation12], %s5913_s25 }
 0x1f3   : > { %1514 = vmatpush1.msra.mxu0 %v1493_v10  ;;  %v1485_v15 = vld [vmem:[%s6003_s1 + $0x128] sm:$0xff]  ;;  %v1484_v16 = vld [vmem:[%s6003_s1 + $0x120] sm:$0xff]  ;;  %v1482_v17 = vld [vmem:[%s6003_s1 + $0x110] sm:$0xff]  ;;  %v6105_v60 = vsub.s32 0, %v1445_v59  ;;  %v6108_v62 = vsub.s32 1, %v1445_v59  ;;  %vm1446_vm8 = vcmp.gt.s32.totalorder %v5981_v1, %v1445_v59  ;;  %s6626_s6 = scalar_lea.vmem [#allocation18], %s5913_s25 }
 0x1f4   : > { %1515 = vmatprep.subr.mxu0 %v1491_v11  ;;  %v1481_v18 = vld [vmem:[%s6003_s1 + $0x108] sm:$0xff]  ;;  %v1479_v19 = vld [vmem:[%s6003_s1 + $0xf8] sm:$0xff]  ;;  %v1478_v20 = vld [vmem:[%s6003_s1 + $0xf0] sm:$0xff]  ;;  %s6628_s21 = scalar_lea.vmem [#allocation21], %s5913_s25  ;;  %s6629_s2 = scalar_lea.vmem [#allocation23], %s5913_s25 }
 0x1f5   : > { %1516 = vmatpush1.msra.mxu0 %v1490_v12  ;;  %v1476_v21 = vld [vmem:[%s6003_s1 + $0xe0] sm:$0xff]  ;;  %v1475_v23 = vld [vmem:[%s6003_s1 + $0xd8] sm:$0xff]  ;;  %v1473_v26 = vld [vmem:[%s6003_s1 + $0xc8] sm:$0xff]  ;;  %s6630_s17 = sld [smem:[#allocation43_spill]] }
 0x1f6   : > { %1517 = vmatprep.subr.mxu0 %v1488_v13  ;;  %v1495_v24 = vld [vmem:[%s6003_s1 + $0x178] sm:$0xff]  ;;  %v1492_v25 = vld [vmem:[%s6003_s1 + $0x160] sm:$0xff]  ;;  %v1489_v28 = vld [vmem:[%s6003_s1 + $0x148] sm:$0xff] }
 0x1f7   : > { %1518 = vmatpush1.msra.mxu0 %v1487_v14  ;;  %v6060_v22 = vld [vmem:[#allocation2] sm:$0xff]  ;;  %4234 = vmatprep.subr.mxu1 %v1495_v24  ;;  %v1470_v29 = vld [vmem:[%s6003_s1 + $0xb0] sm:$0xff]  ;;  %v1469_v30 = vld [vmem:[%s6003_s1 + $0xa8] sm:$0xff] }
 0x1f8   : > { %1519 = vmatprep.subr.mxu0 %v1485_v15  ;;  %4266 = vmatprep.mubr.f32.mxu1 %v6060_v22  ;;  %v1472_v27 = vld [vmem:[%s6003_s1 + $0xc0] sm:$0xff]  ;;  %v1486_v31 = vld [vmem:[%s6003_s1 + $0x130] sm:$0xff]  ;;  %v1467_v32 = vld [vmem:[%s6003_s1 + $0x98] sm:$0xff]  ;;  %v1508_v15 = vsub.s32 2, %v1445_v59 }
 0x1f9   : > { %1520 = vmatpush1.msra.mxu0 %v1484_v16  ;;  %4235 = vmatpush3.msra.mxu1 %v1495_v24  ;;  %v1466_v33 = vld [vmem:[%s6003_s1 + $0x90] sm:$0xff]  ;;  %v1483_v34 = vld [vmem:[%s6003_s1 + $0x118] sm:$0xff]  ;;  %v1464_v35 = vld [vmem:[%s6003_s1 + $0x80] sm:$0xff] }
 0x1fa   : > { %1521 = vmatprep.subr.mxu0 %v1482_v17  ;;  %4236 = vmatprep.subr.mxu1 %v1492_v25  ;;  %v1463_v36 = vld [vmem:[%s6003_s1 + $0x78] sm:$0xff]  ;;  %v1480_v37 = vld [vmem:[%s6003_s1 + $0x100] sm:$0xff]  ;;  %v1461_v38 = vld [vmem:[%s6003_s1 + $0x68] sm:$0xff] }
 0x1fb   : > { %1522 = vmatpush1.msra.mxu0 %v1481_v18  ;;  %4237 = vmatpush3.msra.mxu1 %v1492_v25  ;;  %v1460_v39 = vld [vmem:[%s6003_s1 + $0x60] sm:$0xff]  ;;  %v1477_v40 = vld [vmem:[%s6003_s1 + $0xe8] sm:$0xff]  ;;  %v1458_v41 = vld [vmem:[%s6003_s1 + $0x50] sm:$0xff]  ;;  %p4052_p8 = scmp.ne.s32.totalorder %s6630_s17, 1 }
 0x1fc   : > { %1523 = vmatprep.subr.mxu0 %v1479_v19  ;;  %4238 = vmatprep.subr.mxu1 %v1489_v28  ;;  %v1457_v42 = vld [vmem:[%s6003_s1 + $0x48] sm:$0xff]  ;;  %v1474_v43 = vld [vmem:[%s6003_s1 + $0xd0] sm:$0xff]  ;;  %v1455_v44 = vld [vmem:[%s6003_s1 + $0x38] sm:$0xff] }
 0x1fd   : > { %1524 = vmatpush1.msra.mxu0 %v1478_v20  ;;  %4239 = vmatpush3.msra.mxu1 %v1489_v28  ;;  %v1454_v45 = vld [vmem:[%s6003_s1 + $0x30] sm:$0xff]  ;;  %v1471_v46 = vld [vmem:[%s6003_s1 + $0xb8] sm:$0xff]  ;;  %v1452_v47 = vld [vmem:[%s6003_s1 + $0x20] sm:$0xff] }
 0x1fe   : > { %1525 = vmatprep.subr.mxu0 %v1476_v21  ;;  %4240 = vmatprep.subr.mxu1 %v1486_v31  ;;  %v1451_v48 = vld [vmem:[%s6003_s1 + $0x18] sm:$0xff]  ;;  %v1468_v49 = vld [vmem:[%s6003_s1 + $0xa0] sm:$0xff]  ;;  %v1449_v50 = vld [vmem:[%s6003_s1 + $0x8] sm:$0xff]  ;;  %v6126_v21 = vsel %vm1446_vm8, -1e+09, %v5290_v2 }
 0x1ff   : > { %1526 = vmatpush1.msra.mxu0 %v1475_v23  ;;  %4241 = vmatpush3.msra.mxu1 %v1486_v31  ;;  %v1448_v51 = vld [vmem:[%s6003_s1] sm:$0xff]  ;;  %v1465_v52 = vld [vmem:[%s6003_s1 + $0x88] sm:$0xff]  ;;  %v1462_v53 = vld [vmem:[%s6003_s1 + $0x70] sm:$0xff] }
 0x200   : > { %1527 = vmatprep.subr.mxu0 %v1473_v26  ;;  %4242 = vmatprep.subr.mxu1 %v1483_v34  ;;  %v1459_v54 = vld [vmem:[%s6003_s1 + $0x58] sm:$0xff]  ;;  %v1456_v55 = vld [vmem:[%s6003_s1 + $0x40] sm:$0xff]  ;;  %v1453_v56 = vld [vmem:[%s6003_s1 + $0x28] sm:$0xff] }
 0x201   : > { %1528 = vmatpush1.msra.mxu0 %v1472_v27  ;;  %4243 = vmatpush3.msra.mxu1 %v1483_v34  ;;  %v1450_v57 = vld [vmem:[%s6003_s1 + $0x10] sm:$0xff]  ;;  %v6100_v58 = vld [vmem:[#allocation2 + $0x8] sm:$0xff]  ;;  %v1496_v61 = vld [vmem:[%s6008_s30] sm:$0x7] }
 0x202   : > { %1529 = vmatprep.subr.mxu0 %v1470_v29  ;;  %4244 = vmatprep.subr.mxu1 %v1480_v37  ;;  %v6111_v63 = vrot.slane %v1496_v61, %v6105_v60  ;;  %v6114_v7 = vrot.slane %v1496_v61, %v6108_v62  ;;  %v1509_v16 = vrot.slane %v1496_v61, %v1508_v15  ;;  %v4023_v23 = vld [vmem:[%s6618_s5] ss:$0 sm:$0xff] }
 0x203   : > { %1530 = vmatpush1.msra.mxu0 %v1469_v30  ;;  %4245 = vmatpush3.msra.mxu1 %v1480_v37  ;;  %v1672_v25 = vadd.f32 %v4023_v23, %v6126_v21 }
 0x204   : > { %1531 = vmatprep.subr.mxu0 %v1467_v32  ;;  %4246 = vmatprep.subr.mxu1 %v1477_v40 }
 0x205   : > { %1532 = vmatpush1.msra.mxu0 %v1466_v33  ;;  %4247 = vmatpush3.msra.mxu1 %v1477_v40 }
 0x206   : > { %1533 = vmatprep.subr.mxu0 %v1464_v35  ;;  %4248 = vmatprep.subr.mxu1 %v1474_v43 }
 0x207   : > { %1534 = vmatpush1.msra.mxu0 %v1463_v36  ;;  %4249 = vmatpush3.msra.mxu1 %v1474_v43 }
 0x208   : > { %1535 = vmatprep.subr.mxu0 %v1461_v38  ;;  %4250 = vmatprep.subr.mxu1 %v1471_v46 }
 0x209   : > { %1536 = vmatpush1.msra.mxu0 %v1460_v39  ;;  %4251 = vmatpush3.msra.mxu1 %v1471_v46 }
 0x20a   : > { %1537 = vmatprep.subr.mxu0 %v1458_v41  ;;  %4252 = vmatprep.subr.mxu1 %v1468_v49 }
 0x20b   : > { %1538 = vmatpush1.msra.mxu0 %v1457_v42  ;;  %4253 = vmatpush3.msra.mxu1 %v1468_v49 }
 0x20c   : > { %1539 = vmatprep.subr.mxu0 %v1455_v44  ;;  %4254 = vmatprep.subr.mxu1 %v1465_v52 }
 0x20d   : > { %1540 = vmatpush1.msra.mxu0 %v1454_v45  ;;  %4255 = vmatpush3.msra.mxu1 %v1465_v52 }
 0x20e   : > { %1541 = vmatprep.subr.mxu0 %v1452_v47  ;;  %4256 = vmatprep.subr.mxu1 %v1462_v53 }
 0x20f   : > { %1542 = vmatpush1.msra.mxu0 %v1451_v48  ;;  %4257 = vmatpush3.msra.mxu1 %v1462_v53 }
 0x210   : > { %1543 = vmatprep.subr.mxu0 %v1449_v50  ;;  %4258 = vmatprep.subr.mxu1 %v1459_v54 }
 0x211   : > { %1544 = vmatpush1.msra.mxu0 %v1448_v51  ;;  %4259 = vmatpush3.msra.mxu1 %v1459_v54 }
 0x212   : > { %1578 = vmatmul.mubr.f32.vlgmr.msra.gmra.mxu0 %v6060_v22  ;;  %4260 = vmatprep.subr.mxu1 %v1456_v55 }
 0x213   : > { %1583 = vmatprep.mubr.f32.mxu0 %v5290_v2  ;;  %4261 = vmatpush3.msra.mxu1 %v1456_v55 }
 0x214   : > { %4262 = vmatprep.subr.mxu1 %v1453_v56 }
 0x215   : > { %4263 = vmatpush3.msra.mxu1 %v1453_v56 }
 0x216   : > { %4264 = vmatprep.subr.mxu1 %v1450_v57  ;;  %1584 = vmatmul.mubr.f32.gmra.mxu0 %v6100_v58 }
 0x217   : > { %4265 = vmatpush3.msra.mxu1 %v1450_v57 }
 0x218   : > { %4267 = vmatmul.mubr.f32.vlgmr.msra.gmra.mxu1 %v6100_v58 }
 0x2d2   : > { %v1579_v8 = vpop.f32.mrf.mxu0 }
 0x2d3   : > { %v1580_v9 = vadd.f32 %v1579_v8, %v6111_v63 }
 0x2d4   : > { %v1581_v10 = vpop.f32.mrf.mxu0 }
 0x2d5   : > { %v1582_v11 = vadd.f32 %v1581_v10, %v6114_v7  ;;  %v1673_v12 = vmul.f32 %v5995_v3, %v1580_v9  ;;  %v1674_v0 = vmul.f32 %v6018_v5, %v1580_v9  ;;  %v1675_v13 = vmul.f32 %v6031_v6, %v1580_v9 }
 0x2d6   : > { %v1676_v14 = vmul.f32 %v5998_v4, %v1580_v9  ;;  %v1585_v56 = vpop.f32.mrf.mxu0 }
 0x2d7   : > { %4269 = vmatprep.subr.mxu1 %v1582_v11  ;;  %4271 = vmatprep.mubr.f32.mxu1 %v1673_v12 }
 0x2d8   : > { %4270 = vmatpush3.xpose.msra.mxu1 %v1582_v11  ;;  %v4268_v17 = vpop.f32.mrf.mxu1  ;;  %v1587_v57 = vpop.f32.mrf.mxu0 }
 0x2d9   : > { %v6122_v18 = vadd.f32 %v4268_v17, %v1509_v16  ;;  %v1588_v59 = vadd.f32 %v1587_v57, %v6114_v7 }
 0x2da   : > { %v1656_v19 = vpop.f32.mrf.mxu1 }
 0x2db   : > { %4272 = vmatmul.mubr.f32.vlgmr.msra.gmra.mxu1 %v1674_v0  ;;  %v1657_v20 = vadd.f32 %v1656_v19, %v1509_v16 }
 0x2dc   : > { %4274 = vmatprep.mubr.f32.mxu1 %v1675_v13  ;;  %v1586_v13 = vadd.f32 %v1585_v56, %v6111_v63 }
 0x2dd   : > { %4277 = vmatprep.subr.mxu1 %v1657_v20 }
 0x2de   : > { %4278 = vmatpush3.msra.mxu1 %v1657_v20  ;;  %v1924_v17 = vmul.f32 %v5995_v3, %v1586_v13  ;;  %v1925_v20 = vmul.f32 %v6018_v5, %v1586_v13  ;;  %v1926_v63 = vmul.f32 %v6031_v6, %v1586_v13  ;;  %v1927_v23 = vmul.f32 %v5998_v4, %v1586_v13  ;;  %v2180_v13 = vld [vmem:[%s5917_s7 + $0x78] sm:$0xff] }
 0x2df   : > { %4275 = vmatmul.mubr.f32.gmra.mxu1 %v1676_v14  ;;  %4285 = vmatprep.subr.mxu1 %v1588_v59 }
 0x39b   : > { %v4273_v24 = vpop.f32.mrf.mxu1 }
 0x39c   : > { %v1763_v29 = vadd.f32 %v4273_v24, %v1672_v25 }
 0x39d   : > { %v1743_v26 = vpop.f32.mrf.mxu1 }
 0x39e   : > { %v1762_v27 = vadd.f32 %v1743_v26, %v1672_v25  ;;  %v1770_v33 = vsel %vm1766_vm9, %v1763_v29, -inf  ;;  %v4029_v26 = vld [vmem:[%s6618_s5 + $0x1] ss:$0 sm:$0xff] }
 0x39f   : > { %v4276_v28 = vpop.f32.mrf.mxu1 }
 0x3a0   : > { %v1767_v30 = vsel %vm1766_vm9, %v1762_v27, -inf  ;;  %v1765_v32 = vadd.f32 %v4276_v28, %v1672_v25 }
 0x3a1   : > { %1768 = vmax.xlane.f32.xlu0 %v1767_v30  ;;  %v1753_v31 = vpop.f32.mrf.mxu1 }
 0x3a2   : > { %v1764_v1 = vadd.f32 %v1753_v31, %v1672_v25  ;;  %v1776_v35 = vsel %vm1766_vm9, %v1765_v32, -inf  ;;  %v1923_v31 = vadd.f32 %v4029_v26, %v6126_v21 }
 0x3a4   : > { %v1773_v34 = vsel %vm1766_vm9, %v1764_v1, -inf }
 0x3a5   : > { %1771 = vmax.xlane.f32.xlu0 %v1770_v33  ;;  %1774 = vmax.xlane.f32.xlu1 %v1773_v34 }
 0x3a9   : > { %1777 = vmax.xlane.f32.xlu1 %v1776_v35 }
 0x42a   : > { %v1769_v36 = vpop.xlane.xlu0 %1768 }
 0x42b   : > { %v1779_v37 = vsub.f32 %v1762_v27, %v1769_v36 }
 0x42d   : > { %v1783_v38 = vmul.f32 1.442695, %v1779_v37 }
 0x42e   : > { %v1772_v39 = vpop.xlane.xlu0 %1771  ;;  %v1775_v40 = vpop.xlane.xlu1 %1774 }
 0x42f   : > { %4627 = vpow2.f32 %v1783_v38  ;;  %v1780_v41 = vsub.f32 %v1763_v29, %v1772_v39  ;;  %v1781_v42 = vsub.f32 %v1764_v1, %v1775_v40 }
 0x431   : > { %v1785_v43 = vmul.f32 1.442695, %v1780_v41  ;;  %v1787_v44 = vmul.f32 1.442695, %v1781_v42 }
 0x432   : > { %v1778_v45 = vpop.xlane.xlu1 %1777 }
 0x433   : > { %4629 = vpow2.f32 %v1785_v43  ;;  %v1782_v46 = vsub.f32 %v1765_v32, %v1778_v45 }
 0x434   : > { %4631 = vpow2.f32 %v1787_v44 }
 0x435   : > { %v1789_v47 = vmul.f32 1.442695, %v1782_v46 }
 0x437   : > { %4633 = vpow2.f32 %v1789_v47 }
 0x43c   : > { %v4628_v48 = vpop.eup %4627 }
 0x43d   : > { %v1791_v49 = vsel %vm1766_vm9, %v4628_v48, 0.0 }
 0x43e   : > { %1792 = vadd.xlane.f32.xlu0 %v1791_v49 }
 0x440   : > { %v4630_v50 = vpop.eup %4629 }
 0x441   : > { %v4632_v51 = vpop.eup %4631  ;;  %v1794_v52 = vsel %vm1766_vm9, %v4630_v50, 0.0 }
 0x442   : > { %1795 = vadd.xlane.f32.xlu1 %v1794_v52  ;;  %v1797_v53 = vsel %vm1766_vm9, %v4632_v51, 0.0 }
 0x443   : > { %1798 = vadd.xlane.f32.xlu0 %v1797_v53 }
 0x444   : > { %v4634_v54 = vpop.eup %4633 }
 0x445   : > { %v1800_v55 = vsel %vm1766_vm9, %v4634_v54, 0.0 }
 0x446   : > { %1801 = vadd.xlane.f32.xlu1 %v1800_v55 }
 0x4c7   : > { %v1793_v61 = vpop.xlane.xlu0 %1792 }
 0x4c8   : > { %4635 = vrcp.f32 %v1793_v61 }
 0x4cb   : > { %v1796_v8 = vpop.xlane.xlu1 %1795 }
 0x4cc   : > { %v1799_v9 = vpop.xlane.xlu0 %1798  ;;  %4637 = vrcp.f32 %v1796_v8 }
 0x4cd   : > { %4639 = vrcp.f32 %v1799_v9 }
 0x4cf   : > { %v1802_v10 = vpop.xlane.xlu1 %1801 }
 0x4d0   : > { %4641 = vrcp.f32 %v1802_v10 }
 0x4d5   : > { %v4636_v11 = vpop.eup %4635 }
 0x4d6   : > { %v1804_v12 = vmul.f32 %v4636_v11, %v4628_v48 }
 0x4d8   : > { %4279 = vmatprep.mubr.msk.f32.mxu1 %vm1766_vm9, %v1804_v12 }
 0x4d9   : > { %v4638_v0 = vpop.eup %4637 }
 0x4da   : > { %v4640_v14 = vpop.eup %4639  ;;  %v1806_v15 = vmul.f32 %v4638_v0, %v4630_v50 }
 0x4db   : > { %v1808_v16 = vmul.f32 %v4640_v14, %v4632_v51 }
 0x4dc   : > { %4280 = vmatmul.mubr.msk.f32.vlgmr.msra.gmra.mxu1 %vm1766_vm9, %v1806_v15 }
 0x4dd   : > { %v4642_v7 = vpop.eup %4641  ;;  %4286 = vmatpush3.xpose.msra.mxu1 %v1588_v59  ;;  %4282 = vmatprep.mubr.msk.f32.mxu1 %vm1766_vm9, %v1808_v16 }
 0x4de   : > { %4293 = vmatprep.subr.mxu1 %v6122_v18  ;;  %v1810_v19 = vmul.f32 %v4642_v7, %v4634_v54 }
 0x4e0   : > { %4283 = vmatmul.mubr.msk.f32.gmra.mxu1 %vm1766_vm9, %v1810_v19 }
 0x4e1   : > { %4287 = vmatprep.mubr.f32.mxu1 %v1924_v17 }
 0x4e4   : > { %4288 = vmatmul.mubr.f32.vlgmr.msra.gmra.mxu1 %v1925_v20 }
 0x4e5   : > { %4294 = vmatpush3.msra.mxu1 %v6122_v18  ;;  %4290 = vmatprep.mubr.f32.mxu1 %v1926_v63 }
 0x4e6   : > { %4301 = vmatprep.subr.mxu1 %v2180_v13 }
 0x4e8   : > { %4291 = vmatmul.mubr.f32.gmra.mxu1 %v1927_v23 }
 0x59c   : > { %v4281_v24 = vpop.f32.mrf.mxu1 }
 0x59d   : > { %v1909_v27 = vmul.f32 %v4281_v24, %v6018_v5  ;;  %v2179_v24 = vld [vmem:[%s5917_s7 + $0x70] sm:$0xff] }
 0x59e   : > { %v1889_v25 = vpop.f32.mrf.mxu1 }
 0x59f   : > { %v1908_v28 = vmul.f32 %v5995_v3, %v1889_v25 }
 0x5a0   : > { %v4284_v29 = vpop.f32.mrf.mxu1 }
 0x5a1   : > { %v1912_v30 = vadd.f32 %v1909_v27, %v1908_v28  ;;  %v1911_v33 = vmul.f32 %v4284_v29, %v5998_v4  ;;  %v2178_v27 = vld [vmem:[%s5917_s7 + $0x68] sm:$0xff]  ;;  %v2177_v29 = vld [vmem:[%s5917_s7 + $0x60] sm:$0xff] }
 0x5a2   : > { %v1899_v1 = vpop.f32.mrf.mxu1 }
 0x5a3   : > { %v1910_v18 = vmul.f32 %v6031_v6, %v1899_v1  ;;  %v2174_v1 = vld [vmem:[%s5917_s7 + $0x48] sm:$0xff] }
 0x5a4   : > { %v4289_v32 = vpop.f32.mrf.mxu1 }
 0x5a5   : > { %v1913_v34 = vadd.f32 %v1912_v30, %v1910_v18  ;;  %v2014_v35 = vadd.f32 %v4289_v32, %v1923_v31  ;;  %v2176_v30 = vld [vmem:[%s5917_s7 + $0x58] sm:$0xff]  ;;  %v2173_v18 = vld [vmem:[%s5917_s7 + $0x40] sm:$0xff] }
 0x5a6   : > { %v1994_v36 = vpop.f32.mrf.mxu1  ;;  %v2172_v32 = vld [vmem:[%s5917_s7 + $0x38] sm:$0xff] }
 0x5a7   : > { %v2013_v37 = vadd.f32 %v1994_v36, %v1923_v31  ;;  %v2020_v38 = vsel %vm1766_vm9, %v2014_v35, -inf  ;;  %v6161_v39 = vadd.f32 %v1913_v34, %v1911_v33  ;;  %v2171_v33 = vld [vmem:[%s5917_s7 + $0x30] sm:$0xff]  ;;  %v2170_v34 = vld [vmem:[%s5917_s7 + $0x28] sm:$0xff]  ;;  %v2168_v36 = vld [vmem:[%s5917_s7 + $0x18] sm:$0xff] }
 0x5a8   : > { %2021 = vmax.xlane.f32.xlu1 %v2020_v38  ;;  %v4292_v40 = vpop.f32.mrf.mxu1  ;;  %v2166_v38 = vld [vmem:[%s5917_s7 + $0x8] sm:$0xff] }
 0x5a9   : > { %v2016_v41 = vadd.f32 %v4292_v40, %v1923_v31  ;;  %v2017_v42 = vsel %vm1766_vm9, %v2013_v37, -inf }
 0x5aa   : > { %2018 = vmax.xlane.f32.xlu0 %v2017_v42  ;;  %v2004_v21 = vpop.f32.mrf.mxu1 }
 0x5ab   : > { %v2015_v43 = vadd.f32 %v2004_v21, %v1923_v31  ;;  %v2026_v44 = vsel %vm1766_vm9, %v2016_v41, -inf  ;;  %v2175_v31 = vld [vmem:[%s5917_s7 + $0x50] sm:$0xff] }
 0x5ac   : > { %2027 = vmax.xlane.f32.xlu1 %v2026_v44 }
 0x5ad   : > { %v2023_v45 = vsel %vm1766_vm9, %v2015_v43, -inf }
 0x5ae   : > { %2024 = vmax.xlane.f32.xlu0 %v2023_v45 }
 0x631   : > { %v2022_v46 = vpop.xlane.xlu1 %2021 }
 0x632   : > { %v2030_v47 = vsub.f32 %v2014_v35, %v2022_v46  ;;  %v2169_v35 = vld [vmem:[%s5917_s7 + $0x20] sm:$0xff] }
 0x633   : > { %v2019_v48 = vpop.xlane.xlu0 %2018 }
 0x634   : > { %v2035_v49 = vmul.f32 1.442695, %v2030_v47  ;;  %v2029_v50 = vsub.f32 %v2013_v37, %v2019_v48  ;;  %v2167_v37 = vld [vmem:[%s5917_s7 + $0x10] sm:$0xff] }
 0x635   : > { %v2028_v51 = vpop.xlane.xlu1 %2027 }
 0x636   : > { %4643 = vpow2.f32 %v2035_v49  ;;  %v2033_v52 = vmul.f32 1.442695, %v2029_v50  ;;  %v2032_v53 = vsub.f32 %v2016_v41, %v2028_v51 }
 0x637   : > { %v2025_v54 = vpop.xlane.xlu0 %2024 }
 0x638   : > { %4645 = vpow2.f32 %v2033_v52  ;;  %v2039_v55 = vmul.f32 1.442695, %v2032_v53  ;;  %v2031_v56 = vsub.f32 %v2015_v43, %v2025_v54 }
 0x63a   : > { %4647 = vpow2.f32 %v2039_v55  ;;  %v2037_v57 = vmul.f32 1.442695, %v2031_v56 }
 0x63c   : > { %4649 = vpow2.f32 %v2037_v57  ;;  %v2435_v57 = vld [vmem:[%s5990_s23 + $0xf8] sm:$0xff] }
 0x643   : > { %v4644_v59 = vpop.eup %4643 }
 0x644   : > { %v2044_v61 = vsel %vm1766_vm9, %v4644_v59, 0.0 }
 0x645   : > { %v4646_v8 = vpop.eup %4645  ;;  %2045 = vadd.xlane.f32.xlu1 %v2044_v61  ;;  %v2434_v61 = vld [vmem:[%s5990_s23 + $0xf0] sm:$0xff] }
 0x646   : > { %v2041_v9 = vsel %vm1766_vm9, %v4646_v8, 0.0 }
 0x647   : > { %v4648_v10 = vpop.eup %4647  ;;  %2042 = vadd.xlane.f32.xlu0 %v2041_v9  ;;  %v2320_v9 = vld [vmem:[%s5939_s18 + $0x70] sm:$0xff] }
 0x648   : > { %v2050_v11 = vsel %vm1766_vm9, %v4648_v10, 0.0 }
 0x649   : > { %v4650_v12 = vpop.eup %4649  ;;  %2051 = vadd.xlane.f32.xlu1 %v2050_v11  ;;  %v2431_v11 = vld [vmem:[%s5990_s23 + $0xd8] sm:$0xff] }
 0x64a   : > { %v2047_v0 = vsel %vm1766_vm9, %v4650_v12, 0.0 }
 0x64b   : > { %2048 = vadd.xlane.f32.xlu0 %v2047_v0 }
 0x6ce   : > { %v2046_v14 = vpop.xlane.xlu1 %2045 }
 0x6cf   : > { %4651 = vrcp.f32 %v2046_v14 }
 0x6d0   : > { %v2043_v15 = vpop.xlane.xlu0 %2042 }
 0x6d1   : > { %4653 = vrcp.f32 %v2043_v15 }
 0x6d2   : > { %v2052_v16 = vpop.xlane.xlu1 %2051 }
 0x6d3   : > { %4655 = vrcp.f32 %v2052_v16 }
 0x6d4   : > { %v2049_v7 = vpop.xlane.xlu0 %2048 }
 0x6d5   : > { %4657 = vrcp.f32 %v2049_v7 }
 0x6dc   : > { %v4652_v17 = vpop.eup %4651 }
 0x6dd   : > { %v2056_v63 = vmul.f32 %v4652_v17, %v4644_v59  ;;  %v2321_v59 = vld [vmem:[%s5939_s18 + $0x78] sm:$0xff] }
 0x6de   : > { %v4654_v19 = vpop.eup %4653  ;;  %4336 = vmatprep.subr.mxu0 %v2321_v59 }
 0x6df   : > { %v2054_v20 = vmul.f32 %v4654_v19, %v4646_v8  ;;  %v2433_v8 = vld [vmem:[%s5990_s23 + $0xe8] sm:$0xff]  ;;  %4337 = vmatpush3.msra.mxu0 %v2321_v59 }
 0x6e0   : > { %v4656_v23 = vpop.eup %4655  ;;  %4338 = vmatprep.subr.mxu0 %v2320_v9  ;;  %v2429_v19 = vld [vmem:[%s5990_s23 + $0xc8] sm:$0xff] }
 0x6e1   : > { %4295 = vmatprep.mubr.msk.f32.mxu1 %vm1766_vm9, %v2054_v20  ;;  %v2060_v28 = vmul.f32 %v4656_v23, %v4648_v10  ;;  %v2432_v10 = vld [vmem:[%s5990_s23 + $0xe0] sm:$0xff]  ;;  %4339 = vmatpush3.msra.mxu0 %v2320_v9  ;;  %v2318_v20 = vld [vmem:[%s5939_s18 + $0x60] sm:$0xff] }
 0x6e2   : > { %v4658_v25 = vpop.eup %4657  ;;  %4296 = vmatmul.mubr.msk.f32.vlgmr.msra.gmra.mxu1 %vm1766_vm9, %v2056_v63  ;;  %v2428_v63 = vld [vmem:[%s5990_s23 + $0xc0] sm:$0xff]  ;;  %v2427_v23 = vld [vmem:[%s5990_s23 + $0xb8] sm:$0xff] }
 0x6e3   : > { %v2058_v26 = vmul.f32 %v4658_v25, %v4650_v12  ;;  %4302 = vmatpush3.msra.mxu1 %v2180_v13  ;;  %v2319_v12 = vld [vmem:[%s5939_s18 + $0x68] sm:$0xff]  ;;  %v2426_v25 = vld [vmem:[%s5990_s23 + $0xb0] sm:$0xff] }
 0x6e4   : > { %4303 = vmatprep.subr.mxu1 %v2179_v24  ;;  %4340 = vmatprep.subr.mxu0 %v2319_v12 }
 0x6e5   : > { %4298 = vmatprep.mubr.msk.f32.mxu1 %vm1766_vm9, %v2058_v26  ;;  %4304 = vmatpush3.msra.mxu1 %v2179_v24  ;;  %v2317_v24 = vld [vmem:[%s5939_s18 + $0x58] sm:$0xff] }
 0x6e6   : > { %4299 = vmatmul.mubr.msk.f32.gmra.mxu1 %vm1766_vm9, %v2060_v28  ;;  %4305 = vmatprep.subr.mxu1 %v2178_v27  ;;  %v2425_v26 = vld [vmem:[%s5990_s23 + $0xa8] sm:$0xff]  ;;  %v2424_v28 = vld [vmem:[%s5990_s23 + $0xa0] sm:$0xff] }
 0x6e7   : > { %4333 = vmatprep.mubr.f32.mxu1 %v6161_v39  ;;  %4306 = vmatpush3.msra.mxu1 %v2178_v27  ;;  %v2165_v39 = vld [vmem:[%s5917_s7] sm:$0xff]  ;;  %s6619_s7 = scalar_lea.vmem [#allocation6], %s5913_s25  ;;  %v2316_v27 = vld [vmem:[%s5939_s18 + $0x50] sm:$0xff] }
 0x6e8   : > { %4307 = vmatprep.subr.mxu1 %v2177_v29  ;;  %v4034_v50 = vld [vmem:[%s6619_s7] ss:$0 sm:$0xff]  ;;  %4341 = vmatpush3.msra.mxu0 %v2319_v12 }
 0x6e9   : > { %4308 = vmatpush3.msra.mxu1 %v2177_v29  ;;  %4342 = vmatprep.subr.mxu0 %v2318_v20  ;;  %v2423_v29 = vld [vmem:[%s5990_s23 + $0x98] sm:$0xff] }
 0x6ea   : > { %4309 = vmatprep.subr.mxu1 %v2176_v30  ;;  %4343 = vmatpush3.msra.mxu0 %v2318_v20  ;;  %v2436_v20 = vld [vmem:[%s6013_s10] sm:$0x3] }
 0x6eb   : > { %4310 = vmatpush3.msra.mxu1 %v2176_v30  ;;  %4344 = vmatprep.subr.mxu0 %v2317_v24  ;;  %v2315_v30 = vld [vmem:[%s5939_s18 + $0x48] sm:$0xff] }
 0x6ec   : > { %4311 = vmatprep.subr.mxu1 %v2175_v31  ;;  %4345 = vmatpush3.msra.mxu0 %v2317_v24 }
 0x6ed   : > { %4312 = vmatpush3.msra.mxu1 %v2175_v31  ;;  %4346 = vmatprep.subr.mxu0 %v2316_v27  ;;  %v2422_v31 = vld [vmem:[%s5990_s23 + $0x90] sm:$0xff] }
 0x6ee   : > { %4313 = vmatprep.subr.mxu1 %v2174_v1  ;;  %4347 = vmatpush3.msra.mxu0 %v2316_v27 }
 0x6ef   : > { %4314 = vmatpush3.msra.mxu1 %v2174_v1  ;;  %v2421_v1 = vld [vmem:[%s5990_s23 + $0x88] sm:$0xff]  ;;  %4348 = vmatprep.subr.mxu0 %v2315_v30 }
 0x6f0   : > { %4315 = vmatprep.subr.mxu1 %v2173_v18  ;;  %4349 = vmatpush3.msra.mxu0 %v2315_v30 }
 0x6f1   : > { %4316 = vmatpush3.msra.mxu1 %v2173_v18  ;;  %v2314_v18 = vld [vmem:[%s5939_s18 + $0x40] sm:$0xff] }
 0x6f2   : > { %4317 = vmatprep.subr.mxu1 %v2172_v32  ;;  %4350 = vmatprep.subr.mxu0 %v2314_v18 }
 0x6f3   : > { %4318 = vmatpush3.msra.mxu1 %v2172_v32  ;;  %v2420_v32 = vld [vmem:[%s5990_s23 + $0x80] sm:$0xff]  ;;  %4351 = vmatpush3.msra.mxu0 %v2314_v18 }
 0x6f4   : > { %4319 = vmatprep.subr.mxu1 %v2171_v33 }
 0x6f5   : > { %4320 = vmatpush3.msra.mxu1 %v2171_v33  ;;  %v2419_v33 = vld [vmem:[%s5990_s23 + $0x78] sm:$0xff] }
 0x6f6   : > { %4321 = vmatprep.subr.mxu1 %v2170_v34 }
 0x6f7   : > { %4322 = vmatpush3.msra.mxu1 %v2170_v34  ;;  %v2313_v34 = vld [vmem:[%s5939_s18 + $0x38] sm:$0xff] }
 0x6f8   : > { %4323 = vmatprep.subr.mxu1 %v2169_v35  ;;  %4352 = vmatprep.subr.mxu0 %v2313_v34 }
 0x6f9   : > { %4324 = vmatpush3.msra.mxu1 %v2169_v35  ;;  %v2418_v35 = vld [vmem:[%s5990_s23 + $0x70] sm:$0xff]  ;;  %4353 = vmatpush3.msra.mxu0 %v2313_v34 }
 0x6fa   : > { %4325 = vmatprep.subr.mxu1 %v2168_v36 }
 0x6fb   : > { %4326 = vmatpush3.msra.mxu1 %v2168_v36  ;;  %v2417_v36 = vld [vmem:[%s5990_s23 + $0x68] sm:$0xff] }
 0x6fc   : > { %4327 = vmatprep.subr.mxu1 %v2167_v37 }
 0x6fd   : > { %4328 = vmatpush3.msra.mxu1 %v2167_v37  ;;  %v2312_v37 = vld [vmem:[%s5939_s18 + $0x30] sm:$0xff] }
 0x6fe   : > { %4329 = vmatprep.subr.mxu1 %v2166_v38  ;;  %4354 = vmatprep.subr.mxu0 %v2312_v37 }
 0x6ff   : > { %4330 = vmatpush3.msra.mxu1 %v2166_v38  ;;  %v2416_v38 = vld [vmem:[%s5990_s23 + $0x60] sm:$0xff]  ;;  %4355 = vmatpush3.msra.mxu0 %v2312_v37 }
 0x700   : > { %4331 = vmatprep.subr.mxu1 %v2165_v39 }
 0x701   : > { %4332 = vmatpush3.msra.mxu1 %v2165_v39  ;;  %v2415_v39 = vld [vmem:[%s5990_s23 + $0x58] sm:$0xff] }
 0x702   : > { %2448 = vmatprep.subr.mxu1 %v2435_v57 }
 0x7a2   : > { %v4297_v40 = vpop.f32.mrf.mxu1 }
 0x7a3   : > { %v2159_v43 = vmul.f32 %v4297_v40, %v6018_v5  ;;  %v2311_v40 = vld [vmem:[%s5939_s18 + $0x28] sm:$0xff] }
 0x7a4   : > { %v2139_v41 = vpop.f32.mrf.mxu1  ;;  %4356 = vmatprep.subr.mxu0 %v2311_v40 }
 0x7a5   : > { %v2158_v42 = vmul.f32 %v5995_v3, %v2139_v41  ;;  %v2414_v41 = vld [vmem:[%s5990_s23 + $0x50] sm:$0xff]  ;;  %4357 = vmatpush3.msra.mxu0 %v2311_v40 }
 0x7a6   : > { %v4300_v21 = vpop.f32.mrf.mxu1 }
 0x7a7   : > { %v2162_v45 = vadd.f32 %v2159_v43, %v2158_v42  ;;  %v2161_v47 = vmul.f32 %v4300_v21, %v5998_v4  ;;  %v2413_v42 = vld [vmem:[%s5990_s23 + $0x48] sm:$0xff]  ;;  %v2310_v21 = vld [vmem:[%s5939_s18 + $0x20] sm:$0xff]  ;;  %v2412_v43 = vld [vmem:[%s5990_s23 + $0x40] sm:$0xff] }
 0x7a8   : > { %v2149_v44 = vpop.f32.mrf.mxu1  ;;  %4358 = vmatprep.subr.mxu0 %v2310_v21 }
 0x7a9   : > { %v2160_v46 = vmul.f32 %v6031_v6, %v2149_v44  ;;  %v2411_v44 = vld [vmem:[%s5990_s23 + $0x38] sm:$0xff]  ;;  %4359 = vmatpush3.msra.mxu0 %v2310_v21 }
 0x7ab   : > { %v2163_v48 = vadd.f32 %v2162_v45, %v2160_v46  ;;  %v2309_v45 = vld [vmem:[%s5939_s18 + $0x18] sm:$0xff] }
 0x7ac   : > { %v2410_v46 = vld [vmem:[%s5990_s23 + $0x30] sm:$0xff]  ;;  %4360 = vmatprep.subr.mxu0 %v2309_v45 }
 0x7ad   : > { %v2164_v49 = vadd.f32 %v2163_v48, %v2161_v47  ;;  %v2409_v47 = vld [vmem:[%s5990_s23 + $0x28] sm:$0xff]  ;;  %4361 = vmatpush3.msra.mxu0 %v2309_v45 }
 0x7ae   : > { %v2308_v48 = vld [vmem:[%s5939_s18 + $0x10] sm:$0xff] }
 0x7af   : > { %4334 = vmatmul.mubr.f32.vlgmr.msra.gmra.mxu1 %v2164_v49  ;;  %v2408_v49 = vld [vmem:[%s5990_s23 + $0x20] sm:$0xff]  ;;  %4362 = vmatprep.subr.mxu0 %v2308_v48 }
 0x7b0   : > { %2512 = vmatprep.mubr.f32.mxu1 %v5290_v2  ;;  %2449 = vmatpush1.msra.mxu1 %v2434_v61 }
 0x7b1   : > { %2450 = vmatprep.subr.mxu1 %v2433_v8  ;;  %4363 = vmatpush3.msra.mxu0 %v2308_v48 }
 0x7b2   : > { %2451 = vmatpush1.msra.mxu1 %v2432_v10 }
 0x7b3   : > { %2452 = vmatprep.subr.mxu1 %v2431_v11 }
 0x86f   : > { %v4335_v51 = vpop.f32.mrf.mxu1 }
 0x870   : > { %v2260_v52 = vadd.f32 %v4335_v51, %v4034_v50  ;;  %v2307_v51 = vld [vmem:[%s5939_s18 + $0x8] sm:$0xff] }
 0x871   : > { %v2254_v53 = vpop.f32.mrf.mxu1  ;;  %4364 = vmatprep.subr.mxu0 %v2307_v51 }
 0x872   : > { %v2255_v54 = vadd.f32 %v4034_v50, %v2254_v53  ;;  %v2264_v55 = vadd.f32 %v2260_v52, %v6100_v58  ;;  %v2430_v58 = vld [vmem:[%s5990_s23 + $0xd0] sm:$0xff]  ;;  %v2407_v50 = vld [vmem:[%s5990_s23 + $0x18] sm:$0xff]  ;;  %v2405_v53 = vld [vmem:[%s5990_s23 + $0x8] sm:$0xff]  ;;  %4365 = vmatpush3.msra.mxu0 %v2307_v51 }
 0x873   : > { %2453 = vmatpush1.msra.mxu1 %v2430_v58  ;;  %v2406_v52 = vld [vmem:[%s5990_s23 + $0x10] sm:$0xff] }
 0x874   : > { %2269 = vadd.xlane.f32.xlu1 %v2264_v55  ;;  %v2263_v56 = vadd.f32 %v2255_v54, %v6060_v22  ;;  %2454 = vmatprep.subr.mxu1 %v2429_v19  ;;  %v2306_v54 = vld [vmem:[%s5939_s18] sm:$0xff]  ;;  %s6621_s18 = scalar_lea.vmem [#allocation8], %s5913_s25 }
 0x875   : > { %2455 = vmatpush1.msra.mxu1 %v2428_v63  ;;  %4366 = vmatprep.subr.mxu0 %v2306_v54  ;;  %v4035_v12 = vld [vmem:[%s6621_s18] ss:$0 sm:$0xff]  ;;  %v6274_v63 = vrot.slane %v2436_v20, %v6105_v60 }
 0x876   : > { %2267 = vadd.xlane.f32.xlu0 %v2263_v56  ;;  %2456 = vmatprep.subr.mxu1 %v2427_v23  ;;  %v6278_v23 = vrot.slane %v2436_v20, %v6108_v62 }
 0x877   : > { %2457 = vmatpush1.msra.mxu1 %v2426_v25  ;;  %4367 = vmatpush3.msra.mxu0 %v2306_v54 }
 0x878   : > { %2458 = vmatprep.subr.mxu1 %v2425_v26  ;;  %v4037_v26 = vld [vmem:[%s6623_s19] ss:$0 sm:$0xff] }
 0x879   : > { %2459 = vmatpush1.msra.mxu1 %v2424_v28 }
 0x87a   : > { %2460 = vmatprep.subr.mxu1 %v2423_v29 }
 0x87b   : > { %2461 = vmatpush1.msra.mxu1 %v2422_v31 }
 0x87c   : > { %2462 = vmatprep.subr.mxu1 %v2421_v1 }
 0x87d   : > { %2463 = vmatpush1.msra.mxu1 %v2420_v32 }
 0x87e   : > { %2464 = vmatprep.subr.mxu1 %v2419_v33  ;;  %v1443_v33 = vld [vmem:[%s6620_s29 + $0x8] sm:$0xff] }
 0x87f   : > { %2465 = vmatpush1.msra.mxu1 %v2418_v35 }
 0x880   : > { %2466 = vmatprep.subr.mxu1 %v2417_v36 }
 0x881   : > { %2467 = vmatpush1.msra.mxu1 %v2416_v38 }
 0x882   : > { %2468 = vmatprep.subr.mxu1 %v2415_v39 }
 0x883   : > { %2469 = vmatpush1.msra.mxu1 %v2414_v41 }
 0x884   : > { %2470 = vmatprep.subr.mxu1 %v2413_v42 }
 0x885   : > { %2471 = vmatpush1.msra.mxu1 %v2412_v43 }
 0x886   : > { %2472 = vmatprep.subr.mxu1 %v2411_v44 }
 0x887   : > { %2473 = vmatpush1.msra.mxu1 %v2410_v46 }
 0x888   : > { %2474 = vmatprep.subr.mxu1 %v2409_v47 }
 0x889   : > { %2475 = vmatpush1.msra.mxu1 %v2408_v49 }
 0x88a   : > { %2476 = vmatprep.subr.mxu1 %v2407_v50 }
 0x88b   : > { %2477 = vmatpush1.msra.mxu1 %v2406_v52 }
 0x88c   : > { %2478 = vmatprep.subr.mxu1 %v2405_v53 }
 0x8fd   : > { %v2270_v22 = vpop.xlane.xlu1 %2269 }
 0x8fe   : > { %v2273_v0 = vmul.f32 0.0078125, %v2270_v22 }
 0x8ff   : > { %v2268_v13 = vpop.xlane.xlu0 %2267 }
 0x900   : > { %v6209_v14 = vsub.f32 %v2264_v55, %v2273_v0  ;;  %v2272_v15 = vmul.f32 0.0078125, %v2268_v13  ;;  %v2404_v55 = vld [vmem:[%s5990_s23] sm:$0xff]  ;;  %s6622_s23 = scalar_lea.vmem [#allocation9], %s5913_s25 }
 0x901   : > { %2479 = vmatpush1.msra.mxu1 %v2404_v55 }
 0x902   : > { %v6211_v16 = vsub.f32 %v2263_v56, %v2272_v15  ;;  %v2277_v7 = vmul.f32 %v6209_v14, %v6209_v14  ;;  %v1442_v56 = vld [vmem:[%s6620_s29] sm:$0xff] }
 0x903   : > { %2513 = vmatmul.mubr.f32.vlgmr.msra.gmra.mxu1 %v1442_v56  ;;  %v4036_v15 = vld [vmem:[%s6622_s23] ss:$0 sm:$0xff] }
 0x904   : > { %2280 = vadd.xlane.f32.xlu1 %v2277_v7  ;;  %v2276_v17 = vmul.f32 %v6211_v16, %v6211_v16  ;;  %2518 = vmatprep.mubr.f32.mxu1 %v5290_v2 }
 0x906   : > { %2278 = vadd.xlane.f32.xlu0 %v2276_v17 }
 0x907   : > { %2519 = vmatmul.mubr.f32.gmra.mxu1 %v1443_v33 }
 0x908   : > { %3247 = vmatprep.mubr.f32.mxu1 %v5290_v2 }
 0x98d   : > { %v2281_v57 = vpop.xlane.xlu1 %2280 }
 0x98e   : > { %v2283_v59 = vmul.f32 0.0078125, %v2281_v57 }
 0x98f   : > { %v2279_v61 = vpop.xlane.xlu0 %2278 }
 0x990   : > { %v2285_v8 = vadd.f32 1e-05, %v2283_v59  ;;  %v2282_v9 = vmul.f32 0.0078125, %v2279_v61 }
 0x992   : > { %4659 = vrsqrt.f32 %v2285_v8  ;;  %v2284_v10 = vadd.f32 1e-05, %v2282_v9 }
 0x994   : > { %4661 = vrsqrt.f32 %v2284_v10 }
 0x99f   : > { %v4660_v11 = vpop.eup %4659 }
 0x9a0   : > { %v2289_v58 = vmul.f32 %v4660_v11, %v6209_v14 }
 0x9a1   : > { %v4662_v22 = vpop.eup %4661 }
 0x9a2   : > { %v2288_v0 = vmul.f32 %v4662_v22, %v6211_v16  ;;  %v2297_v13 = vmul.f32 %v4035_v12, %v2289_v58 }
 0x9a4   : > { %v2296_v7 = vmul.f32 %v4035_v12, %v2288_v0  ;;  %v6268_v19 = vadd.f32 %v4036_v15, %v2297_v13 }
 0x9a6   : > { %v6266_v17 = vadd.f32 %v4036_v15, %v2296_v7 }
 0x9a8   : > { %4368 = vmatprep.mubr.f32.mxu0 %v6266_v17 }
 0x9a9   : > { %4369 = vmatmul.mubr.f32.vlgmr.msra.gmra.mxu0 %v6268_v19 }
 0x9c3   : > { %v2514_v14 = vpop.f32.mrf.mxu1 }
 0x9c4   : > { %v2515_v16 = vadd.f32 %v2514_v14, %v6274_v63 }
 0x9c5   : > { %v2516_v24 = vpop.f32.mrf.mxu1 }
 0x9c6   : > { %v2517_v25 = vadd.f32 %v2516_v24, %v6278_v23  ;;  %4371 = vmatprep.subr.mxu0 %v2515_v16 }
 0x9c7   : > { %4372 = vmatpush3.xpose.msra.mxu0 %v2515_v16  ;;  %v2520_v9 = vpop.f32.mrf.mxu1 }
 0x9c8   : > { %4379 = vmatprep.subr.mxu0 %v2517_v25  ;;  %v2521_v10 = vadd.f32 %v2520_v9, %v6274_v63 }
 0x9c9   : > { %v2522_v13 = vpop.f32.mrf.mxu1 }
 0x9ca   : > { %v2523_v14 = vadd.f32 %v2522_v13, %v6278_v23 }
 0xa69   : > { %v4370_v27 = vpop.f32.mrf.mxu0 }
 0xa6a   : > { %v6283_v28 = vadd.f32 %v4370_v27, %v4037_v26 }
 0xa6b   : > { %v2395_v29 = vpop.f32.mrf.mxu0 }
 0xa6c   : > { %v2396_v30 = vadd.f32 %v4037_v26, %v2395_v29  ;;  %v2762_v26 = vmul.f32 %v5995_v3, %v6283_v28  ;;  %v2763_v23 = vmul.f32 %v6018_v5, %v6283_v28  ;;  %v2764_v27 = vmul.f32 %v6031_v6, %v6283_v28 }
 0xa6d   : > { %v2765_v29 = vmul.f32 %v5998_v4, %v6283_v28 }
 0xa6e   : > { %v2525_v31 = vmul.f32 %v5995_v3, %v2396_v30  ;;  %v2526_v1 = vmul.f32 %v6018_v5, %v2396_v30  ;;  %v2527_v18 = vmul.f32 %v6031_v6, %v2396_v30  ;;  %v2528_v32 = vmul.f32 %v5998_v4, %v2396_v30 }
 0xa70   : > { %4373 = vmatprep.mubr.f32.mxu0 %v2525_v31 }
 0xa71   : > { %4374 = vmatmul.mubr.f32.vlgmr.msra.gmra.mxu0 %v2526_v1 }
 0xa72   : > { %4380 = vmatpush3.msra.mxu0 %v2517_v25  ;;  %4376 = vmatprep.mubr.f32.mxu0 %v2527_v18 }
 0xa73   : > { %4387 = vmatprep.subr.mxu0 %v2521_v10 }
 0xa75   : > { %4377 = vmatmul.mubr.f32.gmra.mxu0 %v2528_v32 }
 0xb31   : > { %v4375_v34 = vpop.f32.mrf.mxu0 }
 0xb32   : > { %v2617_v35 = vsel %vm1766_vm9, %v4375_v34, -inf }
 0xb33   : > { %2618 = vmax.xlane.f32.xlu1 %v2617_v35  ;;  %v2595_v36 = vpop.f32.mrf.mxu0 }
 0xb34   : > { %v2614_v37 = vsel %vm1766_vm9, %v2595_v36, -inf }
 0xb35   : > { %2615 = vmax.xlane.f32.xlu0 %v2614_v37  ;;  %v4378_v38 = vpop.f32.mrf.mxu0 }
 0xb36   : > { %v2623_v39 = vsel %vm1766_vm9, %v4378_v38, -inf }
 0xb37   : > { %2624 = vmax.xlane.f32.xlu1 %v2623_v39  ;;  %v2605_v40 = vpop.f32.mrf.mxu0 }
 0xb38   : > { %v2620_v41 = vsel %vm1766_vm9, %v2605_v40, -inf }
 0xb39   : > { %2621 = vmax.xlane.f32.xlu0 %v2620_v41 }
 0xbbc   : > { %v2619_v42 = vpop.xlane.xlu1 %2618 }
 0xbbd   : > { %v2627_v21 = vsub.f32 %v4375_v34, %v2619_v42 }
 0xbbe   : > { %v2616_v43 = vpop.xlane.xlu0 %2615 }
 0xbbf   : > { %v2632_v44 = vmul.f32 1.442695, %v2627_v21  ;;  %v2626_v45 = vsub.f32 %v2595_v36, %v2616_v43 }
 0xbc0   : > { %v2625_v46 = vpop.xlane.xlu1 %2624 }
 0xbc1   : > { %4663 = vpow2.f32 %v2632_v44  ;;  %v2630_v47 = vmul.f32 1.442695, %v2626_v45  ;;  %v2629_v48 = vsub.f32 %v4378_v38, %v2625_v46 }
 0xbc2   : > { %v2622_v49 = vpop.xlane.xlu0 %2621 }
 0xbc3   : > { %4665 = vpow2.f32 %v2630_v47  ;;  %v2636_v50 = vmul.f32 1.442695, %v2629_v48  ;;  %v2628_v51 = vsub.f32 %v2605_v40, %v2622_v49 }
 0xbc5   : > { %4667 = vpow2.f32 %v2636_v50  ;;  %v2634_v52 = vmul.f32 1.442695, %v2628_v51 }
 0xbc7   : > { %4669 = vpow2.f32 %v2634_v52 }
 0xbce   : > { %v4664_v53 = vpop.eup %4663 }
 0xbcf   : > { %v2641_v54 = vsel %vm1766_vm9, %v4664_v53, 0.0 }
 0xbd0   : > { %v4666_v55 = vpop.eup %4665  ;;  %2642 = vadd.xlane.f32.xlu1 %v2641_v54 }
 0xbd1   : > { %v2638_v56 = vsel %vm1766_vm9, %v4666_v55, 0.0 }
 0xbd2   : > { %v4668_v57 = vpop.eup %4667  ;;  %2639 = vadd.xlane.f32.xlu0 %v2638_v56 }
 0xbd3   : > { %v2647_v59 = vsel %vm1766_vm9, %v4668_v57, 0.0 }
 0xbd4   : > { %v4670_v61 = vpop.eup %4669  ;;  %2648 = vadd.xlane.f32.xlu1 %v2647_v59 }
 0xbd5   : > { %v2644_v8 = vsel %vm1766_vm9, %v4670_v61, 0.0 }
 0xbd6   : > { %2645 = vadd.xlane.f32.xlu0 %v2644_v8 }
 0xc59   : > { %v2643_v11 = vpop.xlane.xlu1 %2642 }
 0xc5a   : > { %4671 = vrcp.f32 %v2643_v11 }
 0xc5b   : > { %v2640_v12 = vpop.xlane.xlu0 %2639 }
 0xc5c   : > { %4673 = vrcp.f32 %v2640_v12 }
 0xc5d   : > { %v2649_v58 = vpop.xlane.xlu1 %2648 }
 0xc5e   : > { %4675 = vrcp.f32 %v2649_v58  ;;  %v3014_v58 = vld [vmem:[%s5947_s26 + $0x78] sm:$0xff] }
 0xc5f   : > { %v2646_v22 = vpop.xlane.xlu0 %2645 }
 0xc60   : > { %4677 = vrcp.f32 %v2646_v22 }
 0xc67   : > { %v4672_v0 = vpop.eup %4671 }
 0xc68   : > { %v2653_v20 = vmul.f32 %v4672_v0, %v4664_v53 }
 0xc69   : > { %v4674_v15 = vpop.eup %4673 }
 0xc6a   : > { %v2651_v7 = vmul.f32 %v4674_v15, %v4666_v55 }
 0xc6b   : > { %v4676_v16 = vpop.eup %4675 }
 0xc6c   : > { %4381 = vmatprep.mubr.msk.f32.mxu0 %vm1766_vm9, %v2651_v7  ;;  %v2657_v25 = vmul.f32 %v4676_v16, %v4668_v57 }
 0xc6d   : > { %v4678_v63 = vpop.eup %4677  ;;  %4382 = vmatmul.mubr.msk.f32.vlgmr.msra.gmra.mxu0 %vm1766_vm9, %v2653_v20 }
 0xc6e   : > { %4388 = vmatpush3.xpose.msra.mxu0 %v2521_v10  ;;  %v2655_v24 = vmul.f32 %v4678_v63, %v4670_v61 }
 0xc6f   : > { %4395 = vmatprep.subr.mxu0 %v2523_v14 }
 0xc70   : > { %4384 = vmatprep.mubr.msk.f32.mxu0 %vm1766_vm9, %v2655_v24  ;;  %v3013_v24 = vld [vmem:[%s5947_s26 + $0x70] sm:$0xff] }
 0xc71   : > { %4385 = vmatmul.mubr.msk.f32.gmra.mxu0 %vm1766_vm9, %v2657_v25 }
 0xc72   : > { %4389 = vmatprep.mubr.f32.mxu0 %v2762_v26 }
 0xc75   : > { %4390 = vmatmul.mubr.f32.vlgmr.msra.gmra.mxu0 %v2763_v23  ;;  %v3012_v23 = vld [vmem:[%s5947_s26 + $0x68] sm:$0xff] }
 0xc76   : > { %4396 = vmatpush3.msra.mxu0 %v2523_v14  ;;  %4392 = vmatprep.mubr.f32.mxu0 %v2764_v27 }
 0xc77   : > { %4403 = vmatprep.subr.mxu0 %v3014_v58 }
 0xc79   : > { %4393 = vmatmul.mubr.f32.gmra.mxu0 %v2765_v29  ;;  %v3011_v29 = vld [vmem:[%s5947_s26 + $0x60] sm:$0xff] }
 0xd2d   : > { %v4383_v30 = vpop.f32.mrf.mxu0 }
 0xd2e   : > { %v2756_v1 = vmul.f32 %v4383_v30, %v6018_v5  ;;  %v3010_v30 = vld [vmem:[%s5947_s26 + $0x58] sm:$0xff] }
 0xd2f   : > { %v2736_v31 = vpop.f32.mrf.mxu0 }
 0xd30   : > { %v2755_v18 = vmul.f32 %v5995_v3, %v2736_v31  ;;  %v3009_v31 = vld [vmem:[%s5947_s26 + $0x50] sm:$0xff] }
 0xd31   : > { %v4386_v32 = vpop.f32.mrf.mxu0 }
 0xd32   : > { %v2759_v33 = vadd.f32 %v2756_v1, %v2755_v18  ;;  %v2758_v37 = vmul.f32 %v4386_v32, %v5998_v4  ;;  %v3008_v1 = vld [vmem:[%s5947_s26 + $0x48] sm:$0xff]  ;;  %v3007_v18 = vld [vmem:[%s5947_s26 + $0x40] sm:$0xff]  ;;  %v3006_v32 = vld [vmem:[%s5947_s26 + $0x38] sm:$0xff] }
 0xd33   : > { %v2746_v34 = vpop.f32.mrf.mxu0 }
 0xd34   : > { %v2757_v35 = vmul.f32 %v6031_v6, %v2746_v34  ;;  %v3004_v34 = vld [vmem:[%s5947_s26 + $0x28] sm:$0xff] }
 0xd35   : > { %v4391_v36 = vpop.f32.mrf.mxu0 }
 0xd36   : > { %v2760_v38 = vadd.f32 %v2759_v33, %v2757_v35  ;;  %v2854_v39 = vsel %vm1766_vm9, %v4391_v36, -inf  ;;  %v3005_v33 = vld [vmem:[%s5947_s26 + $0x30] sm:$0xff]  ;;  %v3003_v35 = vld [vmem:[%s5947_s26 + $0x20] sm:$0xff] }
 0xd37   : > { %2855 = vmax.xlane.f32.xlu1 %v2854_v39  ;;  %v2832_v28 = vpop.f32.mrf.mxu0  ;;  %v2999_v39 = vld [vmem:[%s5947_s26] sm:$0xff] }
 0xd38   : > { %v2851_v40 = vsel %vm1766_vm9, %v2832_v28, -inf  ;;  %v6321_v41 = vadd.f32 %v2760_v38, %v2758_v37  ;;  %v3001_v37 = vld [vmem:[%s5947_s26 + $0x10] sm:$0xff]  ;;  %v3000_v38 = vld [vmem:[%s5947_s26 + $0x8] sm:$0xff] }
 0xd39   : > { %2852 = vmax.xlane.f32.xlu0 %v2851_v40  ;;  %v4394_v42 = vpop.f32.mrf.mxu0 }
 0xd3a   : > { %v2860_v21 = vsel %vm1766_vm9, %v4394_v42, -inf }
 0xd3b   : > { %2861 = vmax.xlane.f32.xlu1 %v2860_v21  ;;  %v2842_v43 = vpop.f32.mrf.mxu0 }
 0xd3c   : > { %v2857_v44 = vsel %vm1766_vm9, %v2842_v43, -inf }
 0xd3d   : > { %2858 = vmax.xlane.f32.xlu0 %v2857_v44 }
 0xdc0   : > { %v2856_v45 = vpop.xlane.xlu1 %2855 }
 0xdc1   : > { %v2864_v46 = vsub.f32 %v4391_v36, %v2856_v45  ;;  %v3002_v36 = vld [vmem:[%s5947_s26 + $0x18] sm:$0xff]  ;;  %s6624_s26 = scalar_lea.vmem [#allocation15], %s5913_s25 }
 0xdc2   : > { %v2853_v47 = vpop.xlane.xlu0 %2852 }
 0xdc3   : > { %v2869_v48 = vmul.f32 1.442695, %v2864_v46  ;;  %v2863_v49 = vsub.f32 %v2832_v28, %v2853_v47 }
 0xdc4   : > { %v2862_v50 = vpop.xlane.xlu1 %2861 }
 0xdc5   : > { %4679 = vpow2.f32 %v2869_v48  ;;  %v2867_v51 = vmul.f32 1.442695, %v2863_v49  ;;  %v2866_v52 = vsub.f32 %v4394_v42, %v2862_v50  ;;  %v4046_v49 = vld [vmem:[%s6624_s26] ss:$0 sm:$0xff] }
 0xdc6   : > { %v2859_v53 = vpop.xlane.xlu0 %2858 }
 0xdc7   : > { %4681 = vpow2.f32 %v2867_v51  ;;  %v2873_v54 = vmul.f32 1.442695, %v2866_v52  ;;  %v2865_v55 = vsub.f32 %v2842_v43, %v2859_v53  ;;  %v3170_v53 = vld [vmem:[%s6023_s3 + $0xf8] sm:$0xff] }
 0xdc8   : > { %3183 = vmatprep.subr.mxu1 %v3170_v53  ;;  %v3269_v53 = vld [vmem:[%s6036_s12 + $0x28] sm:$0xff] }
 0xdc9   : > { %4683 = vpow2.f32 %v2873_v54  ;;  %v2871_v56 = vmul.f32 1.442695, %v2865_v55  ;;  %v3168_v54 = vld [vmem:[%s6023_s3 + $0xe8] sm:$0xff]  ;;  %v3167_v55 = vld [vmem:[%s6023_s3 + $0xe0] sm:$0xff] }
 0xdcb   : > { %4685 = vpow2.f32 %v2871_v56  ;;  %v3166_v56 = vld [vmem:[%s6023_s3 + $0xd8] sm:$0xff] }
 0xdd2   : > { %v4680_v57 = vpop.eup %4679 }
 0xdd3   : > { %v2878_v59 = vsel %vm1766_vm9, %v4680_v57, 0.0 }
 0xdd4   : > { %v4682_v61 = vpop.eup %4681  ;;  %2879 = vadd.xlane.f32.xlu1 %v2878_v59 }
 0xdd5   : > { %v2875_v8 = vsel %vm1766_vm9, %v4682_v61, 0.0 }
 0xdd6   : > { %v4684_v9 = vpop.eup %4683  ;;  %2876 = vadd.xlane.f32.xlu0 %v2875_v8 }
 0xdd7   : > { %v2884_v10 = vsel %vm1766_vm9, %v4684_v9, 0.0 }
 0xdd8   : > { %v4686_v11 = vpop.eup %4685  ;;  %2885 = vadd.xlane.f32.xlu1 %v2884_v10 }
 0xdd9   : > { %v2881_v12 = vsel %vm1766_vm9, %v4686_v11, 0.0 }
 0xdda   : > { %2882 = vadd.xlane.f32.xlu0 %v2881_v12  ;;  %v3164_v12 = vld [vmem:[%s6023_s3 + $0xc8] sm:$0xff] }
 0xe5d   : > { %v2880_v22 = vpop.xlane.xlu1 %2879 }
 0xe5e   : > { %4687 = vrcp.f32 %v2880_v22  ;;  %v3162_v22 = vld [vmem:[%s6023_s3 + $0xb8] sm:$0xff] }
 0xe5f   : > { %v2877_v0 = vpop.xlane.xlu0 %2876 }
 0xe60   : > { %4689 = vrcp.f32 %v2877_v0  ;;  %v3161_v0 = vld [vmem:[%s6023_s3 + $0xb0] sm:$0xff] }
 0xe61   : > { %v2886_v13 = vpop.xlane.xlu1 %2885 }
 0xe62   : > { %4691 = vrcp.f32 %v2886_v13  ;;  %v3160_v13 = vld [vmem:[%s6023_s3 + $0xa8] sm:$0xff] }
 0xe63   : > { %v2883_v15 = vpop.xlane.xlu0 %2882 }
 0xe64   : > { %4693 = vrcp.f32 %v2883_v15  ;;  %v3159_v15 = vld [vmem:[%s6023_s3 + $0xa0] sm:$0xff] }
 0xe6b   : > { %v4688_v7 = vpop.eup %4687 }
 0xe6c   : > { %v2890_v16 = vmul.f32 %v4688_v7, %v4680_v57  ;;  %v3165_v57 = vld [vmem:[%s6023_s3 + $0xd0] sm:$0xff]  ;;  %v3158_v7 = vld [vmem:[%s6023_s3 + $0x98] sm:$0xff] }
 0xe6d   : > { %v4690_v20 = vpop.eup %4689 }
 0xe6e   : > { %v2888_v14 = vmul.f32 %v4690_v20, %v4682_v61  ;;  %v3157_v20 = vld [vmem:[%s6023_s3 + $0x90] sm:$0xff] }
 0xe6f   : > { %v4692_v63 = vpop.eup %4691 }
 0xe70   : > { %4397 = vmatprep.mubr.msk.f32.mxu0 %vm1766_vm9, %v2888_v14  ;;  %v2894_v27 = vmul.f32 %v4692_v63, %v4684_v9  ;;  %v3156_v14 = vld [vmem:[%s6023_s3 + $0x88] sm:$0xff]  ;;  %v3154_v63 = vld [vmem:[%s6023_s3 + $0x78] sm:$0xff] }
 0xe71   : > { %v4694_v25 = vpop.eup %4693  ;;  %4398 = vmatmul.mubr.msk.f32.vlgmr.msra.gmra.mxu0 %vm1766_vm9, %v2890_v16  ;;  %v3155_v16 = vld [vmem:[%s6023_s3 + $0x80] sm:$0xff] }
 0xe72   : > { %v2892_v26 = vmul.f32 %v4694_v25, %v4686_v11  ;;  %4404 = vmatpush3.msra.mxu0 %v3014_v58  ;;  %v3163_v58 = vld [vmem:[%s6023_s3 + $0xc0] sm:$0xff]  ;;  %v3152_v25 = vld [vmem:[%s6023_s3 + $0x68] sm:$0xff] }
 0xe73   : > { %4405 = vmatprep.subr.mxu0 %v3013_v24 }
 0xe74   : > { %4400 = vmatprep.mubr.msk.f32.mxu0 %vm1766_vm9, %v2892_v26  ;;  %4406 = vmatpush3.msra.mxu0 %v3013_v24  ;;  %v3153_v24 = vld [vmem:[%s6023_s3 + $0x70] sm:$0xff]  ;;  %v3151_v26 = vld [vmem:[%s6023_s3 + $0x60] sm:$0xff] }
 0xe75   : > { %4401 = vmatmul.mubr.msk.f32.gmra.mxu0 %vm1766_vm9, %v2894_v27  ;;  %4407 = vmatprep.subr.mxu0 %v3012_v23  ;;  %v3149_v27 = vld [vmem:[%s6023_s3 + $0x50] sm:$0xff] }
 0xe76   : > { %4435 = vmatprep.mubr.f32.mxu0 %v6321_v41  ;;  %4408 = vmatpush3.msra.mxu0 %v3012_v23  ;;  %v3150_v23 = vld [vmem:[%s6023_s3 + $0x58] sm:$0xff] }
 0xe77   : > { %4409 = vmatprep.subr.mxu0 %v3011_v29 }
 0xe78   : > { %4410 = vmatpush3.msra.mxu0 %v3011_v29  ;;  %v3148_v29 = vld [vmem:[%s6023_s3 + $0x48] sm:$0xff] }
 0xe79   : > { %4411 = vmatprep.subr.mxu0 %v3010_v30 }
 0xe7a   : > { %4412 = vmatpush3.msra.mxu0 %v3010_v30  ;;  %v3147_v30 = vld [vmem:[%s6023_s3 + $0x40] sm:$0xff] }
 0xe7b   : > { %4413 = vmatprep.subr.mxu0 %v3009_v31 }
 0xe7c   : > { %4414 = vmatpush3.msra.mxu0 %v3009_v31  ;;  %v3146_v31 = vld [vmem:[%s6023_s3 + $0x38] sm:$0xff] }
 0xe7d   : > { %4415 = vmatprep.subr.mxu0 %v3008_v1 }
 0xe7e   : > { %4416 = vmatpush3.msra.mxu0 %v3008_v1  ;;  %v3145_v1 = vld [vmem:[%s6023_s3 + $0x30] sm:$0xff] }
 0xe7f   : > { %4417 = vmatprep.subr.mxu0 %v3007_v18 }
 0xe80   : > { %4418 = vmatpush3.msra.mxu0 %v3007_v18  ;;  %v3144_v18 = vld [vmem:[%s6023_s3 + $0x28] sm:$0xff] }
 0xe81   : > { %4419 = vmatprep.subr.mxu0 %v3006_v32 }
 0xe82   : > { %4420 = vmatpush3.msra.mxu0 %v3006_v32  ;;  %v3143_v32 = vld [vmem:[%s6023_s3 + $0x20] sm:$0xff] }
 0xe83   : > { %4421 = vmatprep.subr.mxu0 %v3005_v33 }
 0xe84   : > { %4422 = vmatpush3.msra.mxu0 %v3005_v33  ;;  %v3142_v33 = vld [vmem:[%s6023_s3 + $0x18] sm:$0xff] }
 0xe85   : > { %4423 = vmatprep.subr.mxu0 %v3004_v34 }
 0xe86   : > { %4424 = vmatpush3.msra.mxu0 %v3004_v34  ;;  %v3141_v34 = vld [vmem:[%s6023_s3 + $0x10] sm:$0xff] }
 0xe87   : > { %4425 = vmatprep.subr.mxu0 %v3003_v35 }
 0xe88   : > { %4426 = vmatpush3.msra.mxu0 %v3003_v35  ;;  %v3140_v35 = vld [vmem:[%s6023_s3 + $0x8] sm:$0xff] }
 0xe89   : > { %4427 = vmatprep.subr.mxu0 %v3002_v36 }
 0xe8a   : > { %4428 = vmatpush3.msra.mxu0 %v3002_v36  ;;  %v3139_v36 = vld [vmem:[%s6023_s3] sm:$0xff] }
 0xe8b   : > { %4429 = vmatprep.subr.mxu0 %v3001_v37 }
 0xe8c   : > { %4430 = vmatpush3.msra.mxu0 %v3001_v37  ;;  %v3295_v37 = vld [vmem:[%s6036_s12 + $0xf8] sm:$0xff] }
 0xe8d   : > { %4431 = vmatprep.subr.mxu0 %v3000_v38 }
 0xe8e   : > { %4432 = vmatpush3.msra.mxu0 %v3000_v38  ;;  %v3279_v38 = vld [vmem:[%s6036_s12 + $0x78] sm:$0xff] }
 0xe8f   : > { %4433 = vmatprep.subr.mxu0 %v2999_v39 }
 0xe90   : > { %4434 = vmatpush3.msra.mxu0 %v2999_v39  ;;  %v3294_v39 = vld [vmem:[%s6036_s12 + $0xf0] sm:$0xff] }
 0xe91   : > { %4178 = vmatprep.subr.mxu0 %v3295_v37 }
 0xf31   : > { %v4399_v28 = vpop.f32.mrf.mxu0 }
 0xf32   : > { %v2993_v21 = vmul.f32 %v4399_v28, %v6018_v5  ;;  %v3278_v28 = vld [vmem:[%s6036_s12 + $0x70] sm:$0xff] }
 0xf33   : > { %v2973_v40 = vpop.f32.mrf.mxu0 }
 0xf34   : > { %v2992_v41 = vmul.f32 %v5995_v3, %v2973_v40  ;;  %v3293_v40 = vld [vmem:[%s6036_s12 + $0xe8] sm:$0xff] }
 0xf35   : > { %v4402_v42 = vpop.f32.mrf.mxu0 }
 0xf36   : > { %v2996_v44 = vadd.f32 %v2993_v21, %v2992_v41  ;;  %v2995_v46 = vmul.f32 %v4402_v42, %v5998_v4  ;;  %v3169_v4 = vld [vmem:[%s6023_s3 + $0xf0] sm:$0xff]  ;;  %v3277_v41 = vld [vmem:[%s6036_s12 + $0x68] sm:$0xff]  ;;  %v3292_v42 = vld [vmem:[%s6036_s12 + $0xe0] sm:$0xff]  ;;  %s6625_s3 = scalar_lea.vmem [#allocation17], %s5913_s25 }
 0xf37   : > { %v2983_v43 = vpop.f32.mrf.mxu0  ;;  %3184 = vmatpush1.msra.mxu1 %v3169_v4  ;;  %v3276_v21 = vld [vmem:[%s6036_s12 + $0x60] sm:$0xff] }
 0xf38   : > { %v2994_v45 = vmul.f32 %v6031_v6, %v2983_v43  ;;  %3185 = vmatprep.subr.mxu1 %v3168_v54  ;;  %v3291_v43 = vld [vmem:[%s6036_s12 + $0xd8] sm:$0xff]  ;;  %v3284_v4 = vld [vmem:[%s6036_s12 + $0xa0] sm:$0xff] }
 0xf39   : > { %3186 = vmatpush1.msra.mxu1 %v3167_v55  ;;  %v3268_v54 = vld [vmem:[%s6036_s12 + $0x20] sm:$0xff] }
 0xf3a   : > { %v2997_v47 = vadd.f32 %v2996_v44, %v2994_v45  ;;  %3187 = vmatprep.subr.mxu1 %v3166_v56  ;;  %v3275_v44 = vld [vmem:[%s6036_s12 + $0x58] sm:$0xff]  ;;  %v3290_v45 = vld [vmem:[%s6036_s12 + $0xd0] sm:$0xff] }
 0xf3b   : > { %3188 = vmatpush1.msra.mxu1 %v3165_v57 }
 0xf3c   : > { %v2998_v48 = vadd.f32 %v2997_v47, %v2995_v46  ;;  %3189 = vmatprep.subr.mxu1 %v3164_v12  ;;  %v3274_v46 = vld [vmem:[%s6036_s12 + $0x50] sm:$0xff]  ;;  %v3289_v47 = vld [vmem:[%s6036_s12 + $0xc8] sm:$0xff] }
 0xf3d   : > { %3190 = vmatpush1.msra.mxu1 %v3163_v58  ;;  %v4047_v58 = vld [vmem:[%s6625_s3] ss:$0 sm:$0xff] }
 0xf3e   : > { %4436 = vmatmul.mubr.f32.vlgmr.msra.gmra.mxu0 %v2998_v48  ;;  %3191 = vmatprep.subr.mxu1 %v3162_v22  ;;  %v3273_v48 = vld [vmem:[%s6036_s12 + $0x48] sm:$0xff] }
 0xf3f   : > { %3192 = vmatpush1.msra.mxu1 %v3161_v0  ;;  %4179 = vmatpush3.msra.mxu0 %v3279_v38  ;;  %v4048_v0 = vld [vmem:[%s6626_s6] ss:$0 sm:$0xff] }
 0xf40   : > { %3193 = vmatprep.subr.mxu1 %v3160_v13  ;;  %4180 = vmatprep.subr.mxu0 %v3294_v39 }
 0xf41   : > { %3194 = vmatpush1.msra.mxu1 %v3159_v15  ;;  %4181 = vmatpush3.msra.mxu0 %v3278_v28 }
 0xf42   : > { %3195 = vmatprep.subr.mxu1 %v3158_v7  ;;  %4182 = vmatprep.subr.mxu0 %v3293_v40 }
 0xf43   : > { %3196 = vmatpush1.msra.mxu1 %v3157_v20  ;;  %4183 = vmatpush3.msra.mxu0 %v3277_v41  ;;  %v3282_v20 = vld [vmem:[%s6036_s12 + $0x90] sm:$0xff] }
 0xf44   : > { %3197 = vmatprep.subr.mxu1 %v3156_v14  ;;  %4184 = vmatprep.subr.mxu0 %v3292_v42  ;;  %v3266_v14 = vld [vmem:[%s6036_s12 + $0x10] sm:$0xff] }
 0xf45   : > { %3198 = vmatpush1.msra.mxu1 %v3155_v16  ;;  %4185 = vmatpush3.msra.mxu0 %v3276_v21  ;;  %v3281_v16 = vld [vmem:[%s6036_s12 + $0x88] sm:$0xff] }
 0xf46   : > { %3199 = vmatprep.subr.mxu1 %v3154_v63  ;;  %4186 = vmatprep.subr.mxu0 %v3291_v43  ;;  %v3265_v63 = vld [vmem:[%s6036_s12 + $0x8] sm:$0xff] }
 0xf47   : > { %3200 = vmatpush1.msra.mxu1 %v3153_v24  ;;  %4187 = vmatpush3.msra.mxu0 %v3275_v44  ;;  %v3280_v24 = vld [vmem:[%s6036_s12 + $0x80] sm:$0xff] }
 0xf48   : > { %3201 = vmatprep.subr.mxu1 %v3152_v25  ;;  %4188 = vmatprep.subr.mxu0 %v3290_v45  ;;  %v3264_v25 = vld [vmem:[%s6036_s12] sm:$0xff] }
 0xf49   : > { %3202 = vmatpush1.msra.mxu1 %v3151_v26  ;;  %4189 = vmatpush3.msra.mxu0 %v3274_v46 }
 0xf4a   : > { %3203 = vmatprep.subr.mxu1 %v3150_v23  ;;  %4190 = vmatprep.subr.mxu0 %v3289_v47 }
 0xf4b   : > { %3204 = vmatpush1.msra.mxu1 %v3149_v27  ;;  %4191 = vmatpush3.msra.mxu0 %v3273_v48 }
 0xf4c   : > { %3205 = vmatprep.subr.mxu1 %v3148_v29 }
 0xf4d   : > { %3206 = vmatpush1.msra.mxu1 %v3147_v30 }
 0xf4e   : > { %3207 = vmatprep.subr.mxu1 %v3146_v31 }
 0xf4f   : > { %3208 = vmatpush1.msra.mxu1 %v3145_v1 }
 0xf50   : > { %3209 = vmatprep.subr.mxu1 %v3144_v18 }
 0xf51   : > { %3210 = vmatpush1.msra.mxu1 %v3143_v32 }
 0xf52   : > { %3211 = vmatprep.subr.mxu1 %v3142_v33 }
 0xf53   : > { %3212 = vmatpush1.msra.mxu1 %v3141_v34 }
 0xf54   : > { %3213 = vmatprep.subr.mxu1 %v3140_v35 }
 0xf55   : > { %3214 = vmatpush1.msra.mxu1 %v3139_v36 }
 0xffe   : > { %v4437_v3 = vpop.f32.mrf.mxu0 }
 0xfff   : > { %v3094_v50 = vadd.f32 %v4437_v3, %v4046_v49  ;;  %v3272_v3 = vld [vmem:[%s6036_s12 + $0x40] sm:$0xff] }
0x1000   : > { %v3088_v5 = vpop.f32.mrf.mxu0 }
0x1001   : > { %v3089_v51 = vadd.f32 %v4046_v49, %v3088_v5  ;;  %v3098_v52 = vadd.f32 %v3094_v50, %v6268_v19  ;;  %v3288_v49 = vld [vmem:[%s6036_s12 + $0xc0] sm:$0xff]  ;;  %v3287_v50 = vld [vmem:[%s6036_s12 + $0xb8] sm:$0xff] }
0x1002   : > { %4192 = vmatprep.subr.mxu0 %v3288_v49  ;;  %v3271_v5 = vld [vmem:[%s6036_s12 + $0x38] sm:$0xff] }
0x1003   : > { %3103 = vadd.xlane.f32.xlu1 %v3098_v52  ;;  %v3097_v6 = vadd.f32 %v3089_v51, %v6266_v17  ;;  %4193 = vmatpush3.msra.mxu0 %v3272_v3  ;;  %v3286_v51 = vld [vmem:[%s6036_s12 + $0xb0] sm:$0xff] }
0x1004   : > { %4194 = vmatprep.subr.mxu0 %v3287_v50 }
0x1005   : > { %3101 = vadd.xlane.f32.xlu0 %v3097_v6  ;;  %4195 = vmatpush3.msra.mxu0 %v3271_v5 }
0x1006   : > { %4196 = vmatprep.subr.mxu0 %v3286_v51 }
0x108c   : > { %v3104_v19 = vpop.xlane.xlu1 %3103 }
0x108d   : > { %v3106_v59 = vmul.f32 0.0078125, %v3104_v19 }
0x108e   : > { %v3102_v17 = vpop.xlane.xlu0 %3101 }
0x108f   : > { %v6364_v61 = vsub.f32 %v3098_v52, %v3106_v59  ;;  %v3105_v8 = vmul.f32 0.0078125, %v3102_v17  ;;  %v3270_v52 = vld [vmem:[%s6036_s12 + $0x30] sm:$0xff] }
0x1090   : > { %4197 = vmatpush3.msra.mxu0 %v3270_v52 }
0x1091   : > { %v6366_v9 = vsub.f32 %v3097_v6, %v3105_v8  ;;  %v3110_v10 = vmul.f32 %v6364_v61, %v6364_v61  ;;  %v3285_v6 = vld [vmem:[%s6036_s12 + $0xa8] sm:$0xff] }
0x1092   : > { %4198 = vmatprep.subr.mxu0 %v3285_v6 }
0x1093   : > { %3113 = vadd.xlane.f32.xlu1 %v3110_v10  ;;  %v3109_v11 = vmul.f32 %v6366_v9, %v6366_v9  ;;  %4199 = vmatpush3.msra.mxu0 %v3269_v53 }
0x1094   : > { %4200 = vmatprep.subr.mxu0 %v3284_v4 }
0x1095   : > { %3111 = vadd.xlane.f32.xlu0 %v3109_v11  ;;  %4201 = vmatpush3.msra.mxu0 %v3268_v54 }
0x111c   : > { %v3114_v55 = vpop.xlane.xlu1 %3113 }
0x111d   : > { %v3116_v56 = vmul.f32 0.0078125, %v3114_v55 }
0x111e   : > { %v3112_v57 = vpop.xlane.xlu0 %3111 }
0x111f   : > { %v3118_v19 = vadd.f32 1e-05, %v3116_v56  ;;  %v3115_v59 = vmul.f32 0.0078125, %v3112_v57  ;;  %v4050_v56 = vld [vmem:[%s6628_s21] ss:$0 sm:$0xff] }
0x1121   : > { %4695 = vrsqrt.f32 %v3118_v19  ;;  %v3117_v17 = vadd.f32 1e-05, %v3115_v59  ;;  %v4051_v19 = vld [vmem:[%s6629_s2] ss:$0 sm:$0xff] }
0x1123   : > { %4697 = vrsqrt.f32 %v3117_v17 }
0x112e   : > { %v4696_v8 = vpop.eup %4695 }
0x112f   : > { %v3122_v12 = vmul.f32 %v4696_v8, %v6364_v61  ;;  %v3267_v61 = vld [vmem:[%s6036_s12 + $0x18] sm:$0xff] }
0x1130   : > { %v4698_v10 = vpop.eup %4697 }
0x1131   : > { %v3121_v11 = vmul.f32 %v4698_v10, %v6366_v9  ;;  %v3130_v15 = vmul.f32 %v4047_v58, %v3122_v12  ;;  %v3283_v9 = vld [vmem:[%s6036_s12 + $0x98] sm:$0xff] }
0x1132   : > { %4202 = vmatprep.subr.mxu0 %v3283_v9 }
0x1133   : > { %v3129_v22 = vmul.f32 %v4047_v58, %v3121_v11  ;;  %v3138_v7 = vadd.f32 %v4048_v0, %v3130_v15  ;;  %4203 = vmatpush3.msra.mxu0 %v3267_v61 }
0x1134   : > { %4204 = vmatprep.subr.mxu0 %v3282_v20 }
0x1135   : > { %v3137_v13 = vadd.f32 %v4048_v0, %v3129_v22  ;;  %4205 = vmatpush3.msra.mxu0 %v3266_v14 }
0x1136   : > { %4206 = vmatprep.subr.mxu0 %v3281_v16 }
0x1137   : > { %3248 = vmatmul.mubr.f32.vlgmr.msra.gmra.mxu1 %v3137_v13  ;;  %4207 = vmatpush3.msra.mxu0 %v3265_v63 }
0x1138   : > { %3253 = vmatprep.mubr.f32.mxu1 %v5290_v2  ;;  %4208 = vmatprep.subr.mxu0 %v3280_v24  ;;  %v3171_v2 = vld [vmem:[%s6028_s16] sm:$0x3]  ;;  %s6627_s16 = scalar_lea.vmem [#allocation20], %s5913_s25 }
0x1139   : > { %4209 = vmatpush3.msra.mxu0 %v3264_v25  ;;  %v3176_v26 = vrot.slane %v3171_v2, %v6105_v60  ;;  %v3180_v23 = vrot.slane %v3171_v2, %v6108_v62  ;;  %v4049_v62 = vld [vmem:[%s6627_s16] ss:$0 sm:$0xff] }
0x113b   : > { %3254 = vmatmul.mubr.f32.gmra.mxu1 %v3138_v7 }
0x11f7   : > { %v3249_v27 = vpop.f32.mrf.mxu1 }
0x11f8   : > { %v3250_v29 = vadd.f32 %v3249_v27, %v3176_v26 }
0x11f9   : > { %v3251_v30 = vpop.f32.mrf.mxu1 }
0x11fa   : > { %v3252_v31 = vadd.f32 %v3251_v30, %v3180_v23  ;;  %v3260_v32 = vmax.f32 %v3250_v29, 0.0 }
0x11fb   : > { %v3255_v1 = vpop.f32.mrf.mxu1 }
0x11fc   : > { %v3261_v18 = vmax.f32 %v3252_v31, 0.0  ;;  %v3256_v33 = vadd.f32 %v3255_v1, %v3176_v26 }
0x11fd   : > { %v3257_v34 = vpop.f32.mrf.mxu1 }
0x11fe   : > { %v3258_v35 = vadd.f32 %v3257_v34, %v3180_v23  ;;  %3367 = vmatprep.mubr.f32.mxu0 %v3261_v18  ;;  %v3262_v37 = vmax.f32 %v3256_v33, 0.0 }
0x11ff   : > { %3368 = vmatmul.mubr.f32.vlgmr.msra.gmra.mxu0 %v3260_v32 }
0x1200   : > { %v3263_v36 = vmax.f32 %v3258_v35, 0.0 }
0x1202   : > { %3372 = vmatprep.mubr.f32.mxu0 %v3263_v36 }
0x1203   : > { %3373 = vmatmul.mubr.f32.gmra.mxu0 %v3262_v37 }
0x12bf   : > { %v4210_v60 = vpop.f32.mrf.mxu0 }
0x12c1   : > { %v4211_v38 = vpop.f32.mrf.mxu0 }
0x12c2   : > { %v4212_v39 = vadd.f32 %v4211_v38, %v4210_v60 }
0x12c3   : > { %v4213_v28 = vpop.f32.mrf.mxu0 }
0x12c4   : > { %v3370_v40 = vadd.f32 %v4212_v39, %v4049_v62 }
0x12c5   : > { %v4214_v41 = vpop.f32.mrf.mxu0 }
0x12c6   : > { %v4215_v42 = vadd.f32 %v4214_v41, %v4213_v28  ;;  %v3378_v21 = vadd.f32 %v3370_v40, %v3137_v13 }
0x12c8   : > { %v3375_v43 = vadd.f32 %v4215_v42, %v4049_v62  ;;  %3382 = vadd.xlane.f32.xlu0 %v3378_v21 }
0x12ca   : > { %v3379_v44 = vadd.f32 %v3375_v43, %v3138_v7 }
0x12cc   : > { %3384 = vadd.xlane.f32.xlu1 %v3379_v44 }
0x1351   : > { %v3383_v45 = vpop.xlane.xlu0 %3382 }
0x1352   : > { %v3386_v46 = vmul.f32 0.0078125, %v3383_v45 }
0x1354   : > { %v3388_v47 = vsub.f32 %v3378_v21, %v3386_v46 }
0x1355   : > { %v3385_v48 = vpop.xlane.xlu1 %3384 }
0x1356   : > { %v3387_v49 = vmul.f32 0.0078125, %v3385_v48  ;;  %v3390_v3 = vmul.f32 %v3388_v47, %v3388_v47 }
0x1358   : > { %v3389_v50 = vsub.f32 %v3379_v44, %v3387_v49  ;;  %3392 = vadd.xlane.f32.xlu0 %v3390_v3 }
0x135a   : > { %v3391_v5 = vmul.f32 %v3389_v50, %v3389_v50 }
0x135c   : > { %3394 = vadd.xlane.f32.xlu1 %v3391_v5 }
0x13e1   : > { %v3393_v51 = vpop.xlane.xlu0 %3392 }
0x13e2   : > { %v3396_v52 = vmul.f32 0.0078125, %v3393_v51 }
0x13e4   : > { %v3398_v6 = vadd.f32 1e-05, %v3396_v52 }
0x13e5   : > { %v3395_v53 = vpop.xlane.xlu1 %3394 }
0x13e6   : > { %4699 = vrsqrt.f32 %v3398_v6  ;;  %v3397_v4 = vmul.f32 0.0078125, %v3395_v53 }
0x13e8   : > { %v3399_v54 = vadd.f32 1e-05, %v3397_v4 }
0x13ea   : > { %4701 = vrsqrt.f32 %v3399_v54 }
0x13f3   : > { %v4700_v55 = vpop.eup %4699 }
0x13f4   : > { %v3402_v57 = vmul.f32 %v4700_v55, %v3388_v47 }
0x13f6   : > { %v3410_v59 = vmul.f32 %v4050_v56, %v3402_v57 }
0x13f7   : > { %v4702_v17 = vpop.eup %4701 }
0x13f8   : > { %v3418_v8 = vadd.f32 %v4051_v19, %v3410_v59  ;;  %v3403_v10 = vmul.f32 %v4702_v17, %v3389_v50 }
0x13fa   : > { %3420 = vst [vmem:[#allocation2] sm:$0xff] %v3418_v8  ;;  %v3411_v11 = vmul.f32 %v4050_v56, %v3403_v10  ;;  %3425 = sbr.rel (%p4052_p8) target bundleno = 5627 (0x15fb), region = 204 }
0x13fc   : > { %v3419_v12 = vadd.f32 %v4051_v19, %v3411_v11 }
0x13fe   : > { %3421 = vst [vmem:[#allocation2 + $0x8] sm:$0xff] %v3419_v12 }
0x13ff   : > { %3428 = vadd.xlane.f32.xlu0 %v3418_v8  ;;  %v3481_v58 = vld [vmem:[#allocation27 + $0x78] sm:$0xff]  ;;  %v3480_v22 = vld [vmem:[#allocation27 + $0x70] sm:$0xff]  ;;  %v3479_v16 = vld [vmem:[#allocation27 + $0x68] sm:$0xff] }
0x1400   : > { %4438 = vmatprep.subr.mxu0 %v3481_v58  ;;  %v3478_v63 = vld [vmem:[#allocation27 + $0x60] sm:$0xff]  ;;  %v3477_v24 = vld [vmem:[#allocation27 + $0x58] sm:$0xff]  ;;  %v3476_v25 = vld [vmem:[#allocation27 + $0x50] sm:$0xff] }
0x1401   : > { %4439 = vmatpush3.msra.mxu0 %v3481_v58  ;;  %v3475_v2 = vld [vmem:[#allocation27 + $0x48] sm:$0xff]  ;;  %v3474_v26 = vld [vmem:[#allocation27 + $0x40] sm:$0xff]  ;;  %v3473_v23 = vld [vmem:[#allocation27 + $0x38] sm:$0xff] }
0x1402   : > { %4440 = vmatprep.subr.mxu0 %v3480_v22  ;;  %v3472_v27 = vld [vmem:[#allocation27 + $0x30] sm:$0xff]  ;;  %v3471_v29 = vld [vmem:[#allocation27 + $0x28] sm:$0xff]  ;;  %v3470_v30 = vld [vmem:[#allocation27 + $0x20] sm:$0xff] }
0x1403   : > { %3430 = vadd.xlane.f32.xlu0 %v3419_v12  ;;  %4441 = vmatpush3.msra.mxu0 %v3480_v22  ;;  %v3469_v31 = vld [vmem:[#allocation27 + $0x18] sm:$0xff]  ;;  %v3468_v1 = vld [vmem:[#allocation27 + $0x10] sm:$0xff]  ;;  %v3467_v18 = vld [vmem:[#allocation27 + $0x8] sm:$0xff] }
0x1404   : > { %4442 = vmatprep.subr.mxu0 %v3479_v16  ;;  %v3466_v32 = vld [vmem:[#allocation27] sm:$0xff]  ;;  %v4053_v38 = vld [vmem:[#allocation24] ss:$0 sm:$0xff]  ;;  %v4054_v28 = vld [vmem:[#allocation26] ss:$0 sm:$0xff] }
0x1405   : > { %4443 = vmatpush3.msra.mxu0 %v3479_v16  ;;  %v4055_v45 = vld [vmem:[#allocation29] ss:$0 sm:$0xff] }
0x1406   : > { %4444 = vmatprep.subr.mxu0 %v3478_v63 }
0x1407   : > { %4445 = vmatpush3.msra.mxu0 %v3478_v63 }
0x1408   : > { %4446 = vmatprep.subr.mxu0 %v3477_v24 }
0x1409   : > { %4447 = vmatpush3.msra.mxu0 %v3477_v24 }
0x140a   : > { %4448 = vmatprep.subr.mxu0 %v3476_v25 }
0x140b   : > { %4449 = vmatpush3.msra.mxu0 %v3476_v25 }
0x140c   : > { %4450 = vmatprep.subr.mxu0 %v3475_v2 }
0x140d   : > { %4451 = vmatpush3.msra.mxu0 %v3475_v2 }
0x140e   : > { %4452 = vmatprep.subr.mxu0 %v3474_v26 }
0x140f   : > { %4453 = vmatpush3.msra.mxu0 %v3474_v26 }
0x1410   : > { %4454 = vmatprep.subr.mxu0 %v3473_v23 }
0x1411   : > { %4455 = vmatpush3.msra.mxu0 %v3473_v23 }
0x1412   : > { %4456 = vmatprep.subr.mxu0 %v3472_v27 }
0x1413   : > { %4457 = vmatpush3.msra.mxu0 %v3472_v27 }
0x1414   : > { %4458 = vmatprep.subr.mxu0 %v3471_v29 }
0x1415   : > { %4459 = vmatpush3.msra.mxu0 %v3471_v29 }
0x1416   : > { %4460 = vmatprep.subr.mxu0 %v3470_v30 }
0x1417   : > { %4461 = vmatpush3.msra.mxu0 %v3470_v30 }
0x1418   : > { %4462 = vmatprep.subr.mxu0 %v3469_v31 }
0x1419   : > { %4463 = vmatpush3.msra.mxu0 %v3469_v31 }
0x141a   : > { %4464 = vmatprep.subr.mxu0 %v3468_v1 }
0x141b   : > { %4465 = vmatpush3.msra.mxu0 %v3468_v1 }
0x141c   : > { %4466 = vmatprep.subr.mxu0 %v3467_v18 }
0x141d   : > { %4467 = vmatpush3.msra.mxu0 %v3467_v18 }
0x141e   : > { %4468 = vmatprep.subr.mxu0 %v3466_v32 }
0x141f   : > { %4469 = vmatpush3.msra.mxu0 %v3466_v32 }
0x1488   : > { %v3429_v0 = vpop.xlane.xlu0 %3428 }
0x1489   : > { %v3432_v13 = vmul.f32 0.0078125, %v3429_v0 }
0x148b   : > { %v3434_v15 = vsub.f32 %v3418_v8, %v3432_v13 }
0x148c   : > { %v3431_v7 = vpop.xlane.xlu0 %3430 }
0x148d   : > { %v3433_v9 = vmul.f32 0.0078125, %v3431_v7  ;;  %v3436_v61 = vmul.f32 %v3434_v15, %v3434_v15 }
0x148f   : > { %v3435_v20 = vsub.f32 %v3419_v12, %v3433_v9  ;;  %3438 = vadd.xlane.f32.xlu1 %v3436_v61 }
0x1491   : > { %v3437_v14 = vmul.f32 %v3435_v20, %v3435_v20 }
0x1493   : > { %3440 = vadd.xlane.f32.xlu1 %v3437_v14 }
0x1518   : > { %v3439_v33 = vpop.xlane.xlu1 %3438 }
0x1519   : > { %v3442_v34 = vmul.f32 0.0078125, %v3439_v33 }
0x151b   : > { %v3444_v35 = vadd.f32 1e-05, %v3442_v34 }
0x151c   : > { %v3441_v36 = vpop.xlane.xlu1 %3440 }
0x151d   : > { %4703 = vrsqrt.f32 %v3444_v35  ;;  %v3443_v37 = vmul.f32 0.0078125, %v3441_v36 }
0x151f   : > { %v3445_v60 = vadd.f32 1e-05, %v3443_v37 }
0x1521   : > { %4705 = vrsqrt.f32 %v3445_v60 }
0x152a   : > { %v4704_v62 = vpop.eup %4703 }
0x152b   : > { %v3448_v39 = vmul.f32 %v4704_v62, %v3434_v15 }
0x152d   : > { %v3456_v40 = vmul.f32 %v4053_v38, %v3448_v39 }
0x152e   : > { %v4706_v41 = vpop.eup %4705 }
0x152f   : > { %v3449_v42 = vmul.f32 %v4706_v41, %v3435_v20  ;;  %v3464_v21 = vadd.f32 %v4054_v28, %v3456_v40 }
0x1531   : > { %v3457_v43 = vmul.f32 %v4053_v38, %v3449_v42  ;;  %4470 = vmatprep.mubr.f32.mxu0 %v3464_v21 }
0x1533   : > { %v3465_v44 = vadd.f32 %v4054_v28, %v3457_v43 }
0x1535   : > { %4471 = vmatmul.mubr.f32.vlgmr.msra.gmra.mxu0 %v3465_v44 }
0x15f5   : > { %v4472_v46 = vpop.f32.mrf.mxu0 }
0x15f6   : > { %v3561_v47 = vadd.f32 %v4472_v46, %v4055_v45 }
0x15f7   : > { %v3555_v48 = vpop.f32.mrf.mxu0 }
0x15f8   : > { %3565 = vst [vmem:[#allocation30 + $0x8] sm:$0xff] %v3561_v47  ;;  %v3556_v49 = vadd.f32 %v4055_v45, %v3555_v48 }
0x15fa   : > { %3564 = vst [vmem:[#allocation30] sm:$0xff] %v3556_v49 }
0x15fb PF: > { %s6631_s25 = sld [smem:[#allocation43_spill]]  ;;  %s5291_s12 = smov [#allocation30]  }
0x15fc   : > { %s3572_s4 = sshll.u32 %s5291_s12, 4  ;;  %s3573_s4 = int_to_ptr.vmem [resolvable:$true] %s3572_s4 }
0x15fd   : > { %s5175_s8 = scalar_lea.vmem %s3573_s4, 256  ;;  %p5182_p12 = scmp.lt.s32.totalorder %s3573_s4, %s3573_s4 }
0x15fe   : > { %p5176_p1 = scmp.ne.s32.totalorder %s3573_s4, %s5175_s8  ;;  %p5183_p2 = scmp.lt.s32.totalorder %s5175_s8, %s5175_s8 }
0x1600   : > { %p5184_p11 = por %p5183_p2, %p5182_p12 }
0x1601   : > { %p4583_p10 = scmp.eq.s32.totalorder %s6631_s25, 1 }
0x1603   : > { %p5177_p13 = pnand %p5176_p1, %p4583_p10 }
0x1605   : > { %p5178_p4 = pneg %p5177_p13 }
0x1607   : > { %p5185_p0 = pnand %p5184_p11, %p5178_p4 }
0x1609   : > { %5188 = shalt.err (!%p5185_p0)
}
0x160a   : > { %s5292_s9 = smov 128   ;;  %s5293_s28 = smov 8  }
0x160b   : > { %s6632_s7 = sld [smem:[#allocation70_spill]] }
0x1611   : > { %4518 = dma.vmem_to_hbm [thread:$0]  (%p4583_p10), %s3573_s4, 256, %s6632_s7, [#allocation5], %s5292_s9, %s5292_s9, %s5293_s28  }
0x1612   : > { %5252 = dma.done.wait (%p4583_p10), [#allocation5], 256  }
0x1613   : > { %5254 = vsyncadd (%p4583_p10), [#allocation5], 4294967040 }
0x1614 PF: > { %s6633_s30 = sld [smem:[#allocation44_spill]] }
0x1615   : > { %s6634_s7 = sld [smem:[#allocation41_spill]] }
0x1616   : > { %s6635_s4 = sld [smem:[#allocation42_spill]] }
0x1617   : > { %s6636_s8 = sld [smem:[#allocation45_spill]] }
0x161a   : > { %p58_p3 = scmp.ge.s32.totalorder %s6633_s30, 4  }
0x161c   :  { %60 = sbr.rel (!%p58_p3) target bundleno = 43 (0x2b), region = 355 }
0x1621   :  { %3588 = vsyncpa [#allocation4], 1 }
0x1622   :  { %3590 = vsyncpa [#allocation4 + $0x1], 1 }
0x1623   :  { %3591 = vsyncpa [#allocation7], 1 }
0x1624   :  { %3593 = vsyncpa [#allocation7 + $0x1], 1 }
0x1625   :  { %3594 = vsyncpa [#allocation10], 1 }
0x1626   :  { %3596 = vsyncpa [#allocation10 + $0x1], 1 }
0x1627   :  { %3597 = vsyncpa [#allocation13], 1 }
0x1628   :  { %3599 = vsyncpa [#allocation13 + $0x1], 1 }
0x1629   :  { %3600 = vsyncpa [#allocation16], 1 }
0x162a   :  { %3602 = vsyncpa [#allocation16 + $0x1], 1 }
0x162b   :  { %3603 = vsyncpa [#allocation19], 1 }
0x162c   :  { %3605 = vsyncpa [#allocation19 + $0x1], 1 }
0x162d   :  { %3606 = vsyncpa [#allocation22], 1 }
0x162e   :  { %3608 = vsyncpa [#allocation22 + $0x1], 1 }
0x162f   :  { %3609 = vsyncpa [#allocation25], 1 }
0x1630   :  { %3610 = vsyncpa [#allocation28], 1 }
0x1631   :  { %3611 = vsyncpa [#allocation5], 1 }
0x1632   :  { %3613 = vsyncpa [#allocation5 + $0x1], 1 }

</bundles_post_ra>
